<compile_context>
chip_gen: v5e
topology: v5e:2x2
jax: 0.10.0
libtpu: 0.0.40
codegen_flags: <defaults>
</compile_context>

<pallas_src>
import functools

import jax
import jax.numpy as jnp
import numpy as np
from jax import lax
from jax.experimental import pallas as pl
from jax.experimental.pallas import tpu as pltpu


# --------------------------------------------------------------------------- kernel

def _se_block1d_kernel(x_ref, w1_ref, w2_ref, o_ref, *gate_ref, k):
    """One row-block of SE_Block1D.forward, fully VMEM resident."""
    x = x_ref[...]                                              # (bn, c) f32
    bn, c = x.shape

    # ---- excitation MLP on the MXU (f32 accumulation).  hid is zero-padded
    # to a multiple of 8 in the wrapper (bit-identical result).
    h = jnp.maximum(jnp.dot(x, w1_ref[...],
                            preferred_element_type=jnp.float32), 0.0)
    z = jnp.dot(h, w2_ref[...], preferred_element_type=jnp.float32)
    w = jax.nn.sigmoid(z)                                       # gate, (bn, c)
    if gate_ref:                                                # debug/validation only
        gate_ref[0][...] = w

    col = lax.broadcasted_iota(jnp.int32, (bn, c), 1)           # lane index j

    # ---- stable descending rank:
    #   rank[i, j] = #{l : w[i,l] > w[i,j]  or  (w[i,l] == w[i,j] and l < j)}
    # Loop over the comparand column l; w[:, l:l+1] is a static lane slice
    # (lane-broadcast in the compare), so there are no per-iteration selects or
    # cross-lane reductions.  Partial sums keep the add chain shallow.
    n_part = 4
    rank_parts = [jnp.zeros((bn, c), jnp.int32) for _ in range(n_part)]
    for l in range(c):
        w_l = w[:, l:l + 1]                                     # (bn, 1)
        ahead = (w_l > w) | ((w_l == w) & (col > l))
        rank_parts[l % n_part] = rank_parts[l % n_part] + ahead.astype(jnp.int32)
    rank = rank_parts[0]
    for p in rank_parts[1:]:
        rank = rank + p                                         # (bn, c)

    # ---- torch.where(index < k): sorted positions occupied by an original
    # column < k (exactly k matches per row).  rank[:, l:l+1] is the sorted
    # position of original column l.
    m_parts = [jnp.zeros((bn, c), jnp.int32), jnp.zeros((bn, c), jnp.int32)]
    for l in range(k):
        r_l = rank[:, l:l + 1]                                  # (bn, 1)
        m_parts[l % 2] = m_parts[l % 2] + (col == r_l).astype(jnp.int32)
    m = (m_parts[0] + m_parts[1]) > 0                           # (bn, c) bool

    # ---- compaction slot = exclusive prefix count of m, as one MXU matmul
    # against a constant strictly-lower-triangular matrix (values <= c, exact).
    li = lax.broadcasted_iota(jnp.int32, (c, c), 0)
    ji = lax.broadcasted_iota(jnp.int32, (c, c), 1)
    tri = (li < ji).astype(jnp.float32)
    slot = jnp.dot(m.astype(jnp.float32), tri,
                   preferred_element_type=jnp.float32).astype(jnp.int32)
    sel = jnp.where(m, slot, -1)                                # (bn, c)

    # ---- out[:, t] = x[t-th selected sorted position] * (t-th largest gate).
    # Each masked sum has exactly one nonzero per row, so it is exact.  Results
    # are written straight into their output lane: no (bn, k) accumulator
    # read-modify-write chain and no extra select per iteration.
    for t in range(k):
        v_w = jnp.sum(jnp.where(rank == t, w, 0.0), axis=-1, keepdims=True)   # (bn, 1)
        v_x = jnp.sum(jnp.where(sel == t, x, 0.0), axis=-1, keepdims=True)    # (bn, 1)
        o_ref[:, t:t + 1] = v_x * v_w


# --------------------------------------------------------------------------- wrapper

def se_block1d_forward(x, w1, w2, *, k, block_rows=128, return_gate=False):
    """SE_Block1D.forward.  Returns out (n, k); with return_gate=True also the gate."""
    n, c = x.shape
    hid = w1.shape[1]
    assert w2.shape == (hid, c) and 0 < k <= c

    # Zero-pad the tiny hidden dim (c // r, e.g. 4) up to a multiple of 8:
    # relu(x @ 0) = 0 and zero rows of W2 add nothing, so results are
    # bit-identical, but both MXU operands become natively (8,128)-tileable.
    hid_p = max(8, ((hid + 7) // 8) * 8)
    w1p = jnp.pad(w1.astype(jnp.float32), ((0, 0), (0, hid_p - hid)))
    w2p = jnp.pad(w2.astype(jnp.float32), ((0, hid_p - hid), (0, 0)))

    # Row blocking: keep bn a multiple of 8 and guarantee at least 2 row blocks
    # whenever possible so v7x's two TensorCores both get work under the
    # "parallel" grid axis (no-op on v5e / v6e).
    block_rows = int(min(max(block_rows, 8), 512))
    n8 = ((n + 7) // 8) * 8
    bn = min(block_rows, n8)
    if n8 // bn < 2 and n8 >= 16:
        bn = ((n8 // 2 + 7) // 8) * 8
    grid = (n8 + bn - 1) // bn
    n_pad = grid * bn

    xp = x.astype(jnp.float32)
    if n_pad != n:
        xp = jnp.pad(xp, ((0, n_pad - n), (0, 0)))

    out_shape = [jax.ShapeDtypeStruct((n_pad, k), jnp.float32)]
    out_specs = [pl.BlockSpec((bn, k), lambda i: (i, 0))]
    if return_gate:
        out_shape.append(jax.ShapeDtypeStruct((n_pad, c), jnp.float32))
        out_specs.append(pl.BlockSpec((bn, c), lambda i: (i, 0)))

    res = pl.pallas_call(
        functools.partial(_se_block1d_kernel, k=k),
        out_shape=tuple(out_shape),
        grid=(grid,),
        in_specs=[pl.BlockSpec((bn, c), lambda i: (i, 0)),
                  pl.BlockSpec((c, hid_p), lambda i: (0, 0)),
                  pl.BlockSpec((hid_p, c), lambda i: (0, 0))],
        out_specs=tuple(out_specs),
        compiler_params=pltpu.CompilerParams(
            dimension_semantics=("parallel",),
            vmem_limit_bytes=32 * 1024 * 1024),
    )(xp, w1p, w2p)

    out = res[0][:n]
    if return_gate:
        return out, res[1][:n]
    return out


# --------------------------------------------------------------------------- pure-JAX reference

def ref_excitation(x, w1, w2):
    hp = jax.lax.Precision.HIGHEST
    h = jnp.maximum(jnp.dot(x, w1, precision=hp), 0.0)
    return jax.nn.sigmoid(jnp.dot(h, w2, precision=hp))


def ref_select(x, w, k):
    """The sort / where(index < k) / gather / scale part of SE_Block1D.forward."""
    n, c = x.shape
    order = jnp.argsort(-w, axis=-1)                            # stable descending
    w_top = jnp.take_along_axis(w, order, axis=-1)[:, :k]
    mask = order < k                                            # torch.where(index < k)
    cols = jnp.arange(c)[None, :]
    pos = jnp.sort(jnp.where(mask, cols, c), axis=-1)[:, :k]    # ascending positions
    x_sel = jnp.take_along_axis(x, pos, axis=-1)                # x[index].reshape(n, -1)
    return x_sel * w_top


# --------------------------------------------------------------------------- main

if __name__ == "__main__":
    n, c, k, r = 16, 64, 32, 16          # SE_Block1D(c=64) with default k=32, r=16
    hid = c // r

    key = jax.random.PRNGKey(0)
    kx, k1, k2 = jax.random.split(key, 3)
    x = jax.random.normal(kx, (n, c), jnp.float32)
    w1 = 0.3 * jax.random.normal(k1, (c, hid), jnp.float32)   # fc1 (no bias), (in, out)
    w2 = 0.5 * jax.random.normal(k2, (hid, c), jnp.float32)   # fc2 (no bias), (in, out)

    # Fast (production) path: no gate writeback.
    fwd = jax.jit(functools.partial(se_block1d_forward, k=k))
    out = jax.block_until_ready(fwd(x, w1, w2))
    assert out.shape == (n, k) and out.dtype == jnp.float32

    # Debug path (emits the gate), used only for validation.
    fwd_dbg = jax.jit(functools.partial(se_block1d_forward, k=k, return_gate=True))
    out_dbg, gate = jax.block_until_ready(fwd_dbg(x, w1, w2))

    # 0) fast path agrees with the debug path.
    err_fast = float(jnp.max(jnp.abs(out - out_dbg)))
    assert np.isfinite(err_fast) and err_fast < 1e-5, f"fast/debug mismatch: {err_fast}"

    # 1) excitation gate matches the module's MLP + sigmoid.
    ref_w = ref_excitation(x, w1, w2)
    err_gate = float(jnp.max(jnp.abs(gate - ref_w)))
    assert np.isfinite(err_gate) and err_gate < 1e-2, f"gate mismatch: {err_gate}"

    # 2) sort / top-k / where(index<k) / gather / scale logic is exact, evaluated
    #    on the kernel's own gate (isolates the discrete logic from matmul rounding).
    exp_out = ref_select(x, gate, k)
    err_sel = float(jnp.max(jnp.abs(out_dbg - exp_out)))
    assert np.isfinite(err_sel) and err_sel < 1e-5, f"selection mismatch: {err_sel}"

    # 3) end-to-end vs the pure-JAX reference whenever both agree on ordering.
    if bool(jnp.all(jnp.argsort(-ref_w, axis=-1) == jnp.argsort(-gate, axis=-1))):
        err_e2e = float(jnp.max(jnp.abs(out_dbg - ref_select(x, ref_w, k))))
        assert err_e2e < 1e-3, f"end-to-end mismatch: {err_e2e}"

    print("KERNEL_OK")
</pallas_src>

<mosaic_0001>
module attributes {stable_mosaic.version = 11 : i64} {
  func.func @_se_block1d_kernel(%arg0: i32, %arg1: memref<8x64xf32, #tpu.memory_space<vmem>>, %arg2: memref<64x8xf32, #tpu.memory_space<vmem>>, %arg3: memref<8x64xf32, #tpu.memory_space<vmem>>, %arg4: memref<8x32xf32, #tpu.memory_space<vmem>>) attributes {dimension_semantics = [#tpu.dimension_semantics<parallel>], iteration_bounds = array<i64: 2>, scalar_prefetch = 0 : i64, scratch_operands = 0 : i64, tpu.core_type = #tpu.core_type<tc>, window_params = [{transform_indices = @transform_0, window_bounds = array<i64: 8, 64>}, {pipeline_mode = #tpu.pipeline_mode<synchronous>, transform_indices = @transform_1, window_bounds = array<i64: 64, 8>}, {pipeline_mode = #tpu.pipeline_mode<synchronous>, transform_indices = @transform_2, window_bounds = array<i64: 8, 64>}, {transform_indices = @transform_3, window_bounds = array<i64: 8, 32>}]} {
    %c0 = arith.constant 0 : index
    %c0_0 = arith.constant 0 : index
    %0 = vector.load %arg1[%c0, %c0_0] : memref<8x64xf32, #tpu.memory_space<vmem>>, vector<8x64xf32>
    %c0_1 = arith.constant 0 : index
    %c0_2 = arith.constant 0 : index
    %1 = vector.load %arg2[%c0_1, %c0_2] : memref<64x8xf32, #tpu.memory_space<vmem>>, vector<64x8xf32>
    %cst = arith.constant dense<0.000000e+00> : vector<8x8xf32>
    %2 = tpu.matmul %0, %1, %cst {dimension_numbers = #tpu.dot_dimension_numbers<[1], [0], [0], [1], [0, 0, 1, 1], [], []>} : vector<8x64xf32>, vector<64x8xf32>, vector<8x8xf32> -> vector<8x8xf32>
    %cst_3 = arith.constant 0.000000e+00 : f32
    %3 = vector.broadcast %cst_3 : f32 to vector<8x8xf32>
    %4 = arith.maximumf %2, %3 : vector<8x8xf32>
    %c0_4 = arith.constant 0 : index
    %c0_5 = arith.constant 0 : index
    %5 = vector.load %arg3[%c0_4, %c0_5] : memref<8x64xf32, #tpu.memory_space<vmem>>, vector<8x64xf32>
    %cst_6 = arith.constant dense<0.000000e+00> : vector<8x64xf32>
    %6 = tpu.matmul %4, %5, %cst_6 {dimension_numbers = #tpu.dot_dimension_numbers<[1], [0], [0], [1], [0, 0, 1, 1], [], []>} : vector<8x8xf32>, vector<8x64xf32>, vector<8x64xf32> -> vector<8x64xf32>
    %7 = arith.negf %6 : vector<8x64xf32>
    %8 = math.exp %7 : vector<8x64xf32>
    %cst_7 = arith.constant 1.000000e+00 : f32
    %9 = vector.broadcast %cst_7 : f32 to vector<8x64xf32>
    %10 = arith.addf %9, %8 : vector<8x64xf32>
    %11 = arith.divf %9, %10 : vector<8x64xf32>
    %12 = tpu.iota {dimensions = array<i32: 1>} : vector<8x64xi32>
    %c0_i32 = arith.constant 0 : i32
    %13 = vector.broadcast %c0_i32 : i32 to vector<8x64xi32>
    %c0_i32_8 = arith.constant 0 : i32
    %14 = vector.broadcast %c0_i32_8 : i32 to vector<8x64xi32>
    %c0_i32_9 = arith.constant 0 : i32
    %15 = vector.broadcast %c0_i32_9 : i32 to vector<8x64xi32>
    %c0_i32_10 = arith.constant 0 : i32
    %16 = vector.broadcast %c0_i32_10 : i32 to vector<8x64xi32>
    %17 = vector.extract_strided_slice %11 {offsets = [0, 0], sizes = [8, 1], strides = [1, 1]} : vector<8x64xf32> to vector<8x1xf32>
    %18 = vector.broadcast %17 : vector<8x1xf32> to vector<8x64xf32>
    %19 = arith.cmpf ogt, %18, %11 : vector<8x64xf32>
    %20 = vector.broadcast %17 : vector<8x1xf32> to vector<8x64xf32>
    %21 = arith.cmpf oeq, %20, %11 : vector<8x64xf32>
    %c0_i32_11 = arith.constant 0 : i32
    %22 = vector.broadcast %c0_i32_11 : i32 to vector<8x64xi32>
    %23 = arith.cmpi sgt, %12, %22 : vector<8x64xi32>
    %24 = arith.andi %21, %23 : vector<8x64xi1>
    %25 = arith.ori %19, %24 : vector<8x64xi1>
    %26 = arith.extui %25 : vector<8x64xi1> to vector<8x64xi32>
    %27 = arith.addi %13, %26 : vector<8x64xi32>
    %28 = vector.extract_strided_slice %11 {offsets = [0, 1], sizes = [8, 1], strides = [1, 1]} : vector<8x64xf32> to vector<8x1xf32>
    %29 = vector.broadcast %28 : vector<8x1xf32> to vector<8x64xf32>
    %30 = arith.cmpf ogt, %29, %11 : vector<8x64xf32>
    %31 = vector.broadcast %28 : vector<8x1xf32> to vector<8x64xf32>
    %32 = arith.cmpf oeq, %31, %11 : vector<8x64xf32>
    %c1_i32 = arith.constant 1 : i32
    %33 = vector.broadcast %c1_i32 : i32 to vector<8x64xi32>
    %34 = arith.cmpi sgt, %12, %33 : vector<8x64xi32>
    %35 = arith.andi %32, %34 : vector<8x64xi1>
    %36 = arith.ori %30, %35 : vector<8x64xi1>
    %37 = arith.extui %36 : vector<8x64xi1> to vector<8x64xi32>
    %38 = arith.addi %14, %37 : vector<8x64xi32>
    %39 = vector.extract_strided_slice %11 {offsets = [0, 2], sizes = [8, 1], strides = [1, 1]} : vector<8x64xf32> to vector<8x1xf32>
    %40 = vector.broadcast %39 : vector<8x1xf32> to vector<8x64xf32>
    %41 = arith.cmpf ogt, %40, %11 : vector<8x64xf32>
    %42 = vector.broadcast %39 : vector<8x1xf32> to vector<8x64xf32>
    %43 = arith.cmpf oeq, %42, %11 : vector<8x64xf32>
    %c2_i32 = arith.constant 2 : i32
    %44 = vector.broadcast %c2_i32 : i32 to vector<8x64xi32>
    %45 = arith.cmpi sgt, %12, %44 : vector<8x64xi32>
    %46 = arith.andi %43, %45 : vector<8x64xi1>
    %47 = arith.ori %41, %46 : vector<8x64xi1>
    %48 = arith.extui %47 : vector<8x64xi1> to vector<8x64xi32>
    %49 = arith.addi %15, %48 : vector<8x64xi32>
    %50 = vector.extract_strided_slice %11 {offsets = [0, 3], sizes = [8, 1], strides = [1, 1]} : vector<8x64xf32> to vector<8x1xf32>
    %51 = vector.broadcast %50 : vector<8x1xf32> to vector<8x64xf32>
    %52 = arith.cmpf ogt, %51, %11 : vector<8x64xf32>
    %53 = vector.broadcast %50 : vector<8x1xf32> to vector<8x64xf32>
    %54 = arith.cmpf oeq, %53, %11 : vector<8x64xf32>
    %c3_i32 = arith.constant 3 : i32
    %55 = vector.broadcast %c3_i32 : i32 to vector<8x64xi32>
    %56 = arith.cmpi sgt, %12, %55 : vector<8x64xi32>
    %57 = arith.andi %54, %56 : vector<8x64xi1>
    %58 = arith.ori %52, %57 : vector<8x64xi1>
    %59 = arith.extui %58 : vector<8x64xi1> to vector<8x64xi32>
    %60 = arith.addi %16, %59 : vector<8x64xi32>
    %61 = vector.extract_strided_slice %11 {offsets = [0, 4], sizes = [8, 1], strides = [1, 1]} : vector<8x64xf32> to vector<8x1xf32>
    %62 = vector.broadcast %61 : vector<8x1xf32> to vector<8x64xf32>
    %63 = arith.cmpf ogt, %62, %11 : vector<8x64xf32>
    %64 = vector.broadcast %61 : vector<8x1xf32> to vector<8x64xf32>
    %65 = arith.cmpf oeq, %64, %11 : vector<8x64xf32>
    %c4_i32 = arith.constant 4 : i32
    %66 = vector.broadcast %c4_i32 : i32 to vector<8x64xi32>
    %67 = arith.cmpi sgt, %12, %66 : vector<8x64xi32>
    %68 = arith.andi %65, %67 : vector<8x64xi1>
    %69 = arith.ori %63, %68 : vector<8x64xi1>
    %70 = arith.extui %69 : vector<8x64xi1> to vector<8x64xi32>
    %71 = arith.addi %27, %70 : vector<8x64xi32>
    %72 = vector.extract_strided_slice %11 {offsets = [0, 5], sizes = [8, 1], strides = [1, 1]} : vector<8x64xf32> to vector<8x1xf32>
    %73 = vector.broadcast %72 : vector<8x1xf32> to vector<8x64xf32>
    %74 = arith.cmpf ogt, %73, %11 : vector<8x64xf32>
    %75 = vector.broadcast %72 : vector<8x1xf32> to vector<8x64xf32>
    %76 = arith.cmpf oeq, %75, %11 : vector<8x64xf32>
    %c5_i32 = arith.constant 5 : i32
    %77 = vector.broadcast %c5_i32 : i32 to vector<8x64xi32>
    %78 = arith.cmpi sgt, %12, %77 : vector<8x64xi32>
    %79 = arith.andi %76, %78 : vector<8x64xi1>
    %80 = arith.ori %74, %79 : vector<8x64xi1>
    %81 = arith.extui %80 : vector<8x64xi1> to vector<8x64xi32>
    %82 = arith.addi %38, %81 : vector<8x64xi32>
    %83 = vector.extract_strided_slice %11 {offsets = [0, 6], sizes = [8, 1], strides = [1, 1]} : vector<8x64xf32> to vector<8x1xf32>
    %84 = vector.broadcast %83 : vector<8x1xf32> to vector<8x64xf32>
    %85 = arith.cmpf ogt, %84, %11 : vector<8x64xf32>
    %86 = vector.broadcast %83 : vector<8x1xf32> to vector<8x64xf32>
    %87 = arith.cmpf oeq, %86, %11 : vector<8x64xf32>
    %c6_i32 = arith.constant 6 : i32
    %88 = vector.broadcast %c6_i32 : i32 to vector<8x64xi32>
    %89 = arith.cmpi sgt, %12, %88 : vector<8x64xi32>
    %90 = arith.andi %87, %89 : vector<8x64xi1>
    %91 = arith.ori %85, %90 : vector<8x64xi1>
    %92 = arith.extui %91 : vector<8x64xi1> to vector<8x64xi32>
    %93 = arith.addi %49, %92 : vector<8x64xi32>
    %94 = vector.extract_strided_slice %11 {offsets = [0, 7], sizes = [8, 1], strides = [1, 1]} : vector<8x64xf32> to vector<8x1xf32>
    %95 = vector.broadcast %94 : vector<8x1xf32> to vector<8x64xf32>
    %96 = arith.cmpf ogt, %95, %11 : vector<8x64xf32>
    %97 = vector.broadcast %94 : vector<8x1xf32> to vector<8x64xf32>
    %98 = arith.cmpf oeq, %97, %11 : vector<8x64xf32>
    %c7_i32 = arith.constant 7 : i32
    %99 = vector.broadcast %c7_i32 : i32 to vector<8x64xi32>
    %100 = arith.cmpi sgt, %12, %99 : vector<8x64xi32>
    %101 = arith.andi %98, %100 : vector<8x64xi1>
    %102 = arith.ori %96, %101 : vector<8x64xi1>
    %103 = arith.extui %102 : vector<8x64xi1> to vector<8x64xi32>
    %104 = arith.addi %60, %103 : vector<8x64xi32>
    %105 = vector.extract_strided_slice %11 {offsets = [0, 8], sizes = [8, 1], strides = [1, 1]} : vector<8x64xf32> to vector<8x1xf32>
    %106 = vector.broadcast %105 : vector<8x1xf32> to vector<8x64xf32>
    %107 = arith.cmpf ogt, %106, %11 : vector<8x64xf32>
    %108 = vector.broadcast %105 : vector<8x1xf32> to vector<8x64xf32>
    %109 = arith.cmpf oeq, %108, %11 : vector<8x64xf32>
    %c8_i32 = arith.constant 8 : i32
    %110 = vector.broadcast %c8_i32 : i32 to vector<8x64xi32>
    %111 = arith.cmpi sgt, %12, %110 : vector<8x64xi32>
    %112 = arith.andi %109, %111 : vector<8x64xi1>
    %113 = arith.ori %107, %112 : vector<8x64xi1>
    %114 = arith.extui %113 : vector<8x64xi1> to vector<8x64xi32>
    %115 = arith.addi %71, %114 : vector<8x64xi32>
    %116 = vector.extract_strided_slice %11 {offsets = [0, 9], sizes = [8, 1], strides = [1, 1]} : vector<8x64xf32> to vector<8x1xf32>
    %117 = vector.broadcast %116 : vector<8x1xf32> to vector<8x64xf32>
    %118 = arith.cmpf ogt, %117, %11 : vector<8x64xf32>
    %119 = vector.broadcast %116 : vector<8x1xf32> to vector<8x64xf32>
    %120 = arith.cmpf oeq, %119, %11 : vector<8x64xf32>
    %c9_i32 = arith.constant 9 : i32
    %121 = vector.broadcast %c9_i32 : i32 to vector<8x64xi32>
    %122 = arith.cmpi sgt, %12, %121 : vector<8x64xi32>
    %123 = arith.andi %120, %122 : vector<8x64xi1>
    %124 = arith.ori %118, %123 : vector<8x64xi1>
    %125 = arith.extui %124 : vector<8x64xi1> to vector<8x64xi32>
    %126 = arith.addi %82, %125 : vector<8x64xi32>
    %127 = vector.extract_strided_slice %11 {offsets = [0, 10], sizes = [8, 1], strides = [1, 1]} : vector<8x64xf32> to vector<8x1xf32>
    %128 = vector.broadcast %127 : vector<8x1xf32> to vector<8x64xf32>
    %129 = arith.cmpf ogt, %128, %11 : vector<8x64xf32>
    %130 = vector.broadcast %127 : vector<8x1xf32> to vector<8x64xf32>
    %131 = arith.cmpf oeq, %130, %11 : vector<8x64xf32>
    %c10_i32 = arith.constant 10 : i32
    %132 = vector.broadcast %c10_i32 : i32 to vector<8x64xi32>
    %133 = arith.cmpi sgt, %12, %132 : vector<8x64xi32>
    %134 = arith.andi %131, %133 : vector<8x64xi1>
    %135 = arith.ori %129, %134 : vector<8x64xi1>
    %136 = arith.extui %135 : vector<8x64xi1> to vector<8x64xi32>
    %137 = arith.addi %93, %136 : vector<8x64xi32>
    %138 = vector.extract_strided_slice %11 {offsets = [0, 11], sizes = [8, 1], strides = [1, 1]} : vector<8x64xf32> to vector<8x1xf32>
    %139 = vector.broadcast %138 : vector<8x1xf32> to vector<8x64xf32>
    %140 = arith.cmpf ogt, %139, %11 : vector<8x64xf32>
    %141 = vector.broadcast %138 : vector<8x1xf32> to vector<8x64xf32>
    %142 = arith.cmpf oeq, %141, %11 : vector<8x64xf32>
    %c11_i32 = arith.constant 11 : i32
    %143 = vector.broadcast %c11_i32 : i32 to vector<8x64xi32>
    %144 = arith.cmpi sgt, %12, %143 : vector<8x64xi32>
    %145 = arith.andi %142, %144 : vector<8x64xi1>
    %146 = arith.ori %140, %145 : vector<8x64xi1>
    %147 = arith.extui %146 : vector<8x64xi1> to vector<8x64xi32>
    %148 = arith.addi %104, %147 : vector<8x64xi32>
    %149 = vector.extract_strided_slice %11 {offsets = [0, 12], sizes = [8, 1], strides = [1, 1]} : vector<8x64xf32> to vector<8x1xf32>
    %150 = vector.broadcast %149 : vector<8x1xf32> to vector<8x64xf32>
    %151 = arith.cmpf ogt, %150, %11 : vector<8x64xf32>
    %152 = vector.broadcast %149 : vector<8x1xf32> to vector<8x64xf32>
    %153 = arith.cmpf oeq, %152, %11 : vector<8x64xf32>
    %c12_i32 = arith.constant 12 : i32
    %154 = vector.broadcast %c12_i32 : i32 to vector<8x64xi32>
    %155 = arith.cmpi sgt, %12, %154 : vector<8x64xi32>
    %156 = arith.andi %153, %155 : vector<8x64xi1>
    %157 = arith.ori %151, %156 : vector<8x64xi1>
    %158 = arith.extui %157 : vector<8x64xi1> to vector<8x64xi32>
    %159 = arith.addi %115, %158 : vector<8x64xi32>
    %160 = vector.extract_strided_slice %11 {offsets = [0, 13], sizes = [8, 1], strides = [1, 1]} : vector<8x64xf32> to vector<8x1xf32>
    %161 = vector.broadcast %160 : vector<8x1xf32> to vector<8x64xf32>
    %162 = arith.cmpf ogt, %161, %11 : vector<8x64xf32>
    %163 = vector.broadcast %160 : vector<8x1xf32> to vector<8x64xf32>
    %164 = arith.cmpf oeq, %163, %11 : vector<8x64xf32>
    %c13_i32 = arith.constant 13 : i32
    %165 = vector.broadcast %c13_i32 : i32 to vector<8x64xi32>
    %166 = arith.cmpi sgt, %12, %165 : vector<8x64xi32>
    %167 = arith.andi %164, %166 : vector<8x64xi1>
    %168 = arith.ori %162, %167 : vector<8x64xi1>
    %169 = arith.extui %168 : vector<8x64xi1> to vector<8x64xi32>
    %170 = arith.addi %126, %169 : vector<8x64xi32>
    %171 = vector.extract_strided_slice %11 {offsets = [0, 14], sizes = [8, 1], strides = [1, 1]} : vector<8x64xf32> to vector<8x1xf32>
    %172 = vector.broadcast %171 : vector<8x1xf32> to vector<8x64xf32>
    %173 = arith.cmpf ogt, %172, %11 : vector<8x64xf32>
    %174 = vector.broadcast %171 : vector<8x1xf32> to vector<8x64xf32>
    %175 = arith.cmpf oeq, %174, %11 : vector<8x64xf32>
    %c14_i32 = arith.constant 14 : i32
    %176 = vector.broadcast %c14_i32 : i32 to vector<8x64xi32>
    %177 = arith.cmpi sgt, %12, %176 : vector<8x64xi32>
    %178 = arith.andi %175, %177 : vector<8x64xi1>
    %179 = arith.ori %173, %178 : vector<8x64xi1>
    %180 = arith.extui %179 : vector<8x64xi1> to vector<8x64xi32>
    %181 = arith.addi %137, %180 : vector<8x64xi32>
    %182 = vector.extract_strided_slice %11 {offsets = [0, 15], sizes = [8, 1], strides = [1, 1]} : vector<8x64xf32> to vector<8x1xf32>
    %183 = vector.broadcast %182 : vector<8x1xf32> to vector<8x64xf32>
    %184 = arith.cmpf ogt, %183, %11 : vector<8x64xf32>
    %185 = vector.broadcast %182 : vector<8x1xf32> to vector<8x64xf32>
    %186 = arith.cmpf oeq, %185, %11 : vector<8x64xf32>
    %c15_i32 = arith.constant 15 : i32
    %187 = vector.broadcast %c15_i32 : i32 to vector<8x64xi32>
    %188 = arith.cmpi sgt, %12, %187 : vector<8x64xi32>
    %189 = arith.andi %186, %188 : vector<8x64xi1>
    %190 = arith.ori %184, %189 : vector<8x64xi1>
    %191 = arith.extui %190 : vector<8x64xi1> to vector<8x64xi32>
    %192 = arith.addi %148, %191 : vector<8x64xi32>
    %193 = vector.extract_strided_slice %11 {offsets = [0, 16], sizes = [8, 1], strides = [1, 1]} : vector<8x64xf32> to vector<8x1xf32>
    %194 = vector.broadcast %193 : vector<8x1xf32> to vector<8x64xf32>
    %195 = arith.cmpf ogt, %194, %11 : vector<8x64xf32>
    %196 = vector.broadcast %193 : vector<8x1xf32> to vector<8x64xf32>
    %197 = arith.cmpf oeq, %196, %11 : vector<8x64xf32>
    %c16_i32 = arith.constant 16 : i32
    %198 = vector.broadcast %c16_i32 : i32 to vector<8x64xi32>
    %199 = arith.cmpi sgt, %12, %198 : vector<8x64xi32>
    %200 = arith.andi %197, %199 : vector<8x64xi1>
    %201 = arith.ori %195, %200 : vector<8x64xi1>
    %202 = arith.extui %201 : vector<8x64xi1> to vector<8x64xi32>
    %203 = arith.addi %159, %202 : vector<8x64xi32>
    %204 = vector.extract_strided_slice %11 {offsets = [0, 17], sizes = [8, 1], strides = [1, 1]} : vector<8x64xf32> to vector<8x1xf32>
    %205 = vector.broadcast %204 : vector<8x1xf32> to vector<8x64xf32>
    %206 = arith.cmpf ogt, %205, %11 : vector<8x64xf32>
    %207 = vector.broadcast %204 : vector<8x1xf32> to vector<8x64xf32>
    %208 = arith.cmpf oeq, %207, %11 : vector<8x64xf32>
    %c17_i32 = arith.constant 17 : i32
    %209 = vector.broadcast %c17_i32 : i32 to vector<8x64xi32>
    %210 = arith.cmpi sgt, %12, %209 : vector<8x64xi32>
    %211 = arith.andi %208, %210 : vector<8x64xi1>
    %212 = arith.ori %206, %211 : vector<8x64xi1>
    %213 = arith.extui %212 : vector<8x64xi1> to vector<8x64xi32>
    %214 = arith.addi %170, %213 : vector<8x64xi32>
    %215 = vector.extract_strided_slice %11 {offsets = [0, 18], sizes = [8, 1], strides = [1, 1]} : vector<8x64xf32> to vector<8x1xf32>
    %216 = vector.broadcast %215 : vector<8x1xf32> to vector<8x64xf32>
    %217 = arith.cmpf ogt, %216, %11 : vector<8x64xf32>
    %218 = vector.broadcast %215 : vector<8x1xf32> to vector<8x64xf32>
    %219 = arith.cmpf oeq, %218, %11 : vector<8x64xf32>
    %c18_i32 = arith.constant 18 : i32
    %220 = vector.broadcast %c18_i32 : i32 to vector<8x64xi32>
    %221 = arith.cmpi sgt, %12, %220 : vector<8x64xi32>
    %222 = arith.andi %219, %221 : vector<8x64xi1>
    %223 = arith.ori %217, %222 : vector<8x64xi1>
    %224 = arith.extui %223 : vector<8x64xi1> to vector<8x64xi32>
    %225 = arith.addi %181, %224 : vector<8x64xi32>
    %226 = vector.extract_strided_slice %11 {offsets = [0, 19], sizes = [8, 1], strides = [1, 1]} : vector<8x64xf32> to vector<8x1xf32>
    %227 = vector.broadcast %226 : vector<8x1xf32> to vector<8x64xf32>
    %228 = arith.cmpf ogt, %227, %11 : vector<8x64xf32>
    %229 = vector.broadcast %226 : vector<8x1xf32> to vector<8x64xf32>
    %230 = arith.cmpf oeq, %229, %11 : vector<8x64xf32>
    %c19_i32 = arith.constant 19 : i32
    %231 = vector.broadcast %c19_i32 : i32 to vector<8x64xi32>
    %232 = arith.cmpi sgt, %12, %231 : vector<8x64xi32>
    %233 = arith.andi %230, %232 : vector<8x64xi1>
    %234 = arith.ori %228, %233 : vector<8x64xi1>
    %235 = arith.extui %234 : vector<8x64xi1> to vector<8x64xi32>
    %236 = arith.addi %192, %235 : vector<8x64xi32>
    %237 = vector.extract_strided_slice %11 {offsets = [0, 20], sizes = [8, 1], strides = [1, 1]} : vector<8x64xf32> to vector<8x1xf32>
    %238 = vector.broadcast %237 : vector<8x1xf32> to vector<8x64xf32>
    %239 = arith.cmpf ogt, %238, %11 : vector<8x64xf32>
    %240 = vector.broadcast %237 : vector<8x1xf32> to vector<8x64xf32>
    %241 = arith.cmpf oeq, %240, %11 : vector<8x64xf32>
    %c20_i32 = arith.constant 20 : i32
    %242 = vector.broadcast %c20_i32 : i32 to vector<8x64xi32>
    %243 = arith.cmpi sgt, %12, %242 : vector<8x64xi32>
    %244 = arith.andi %241, %243 : vector<8x64xi1>
    %245 = arith.ori %239, %244 : vector<8x64xi1>
    %246 = arith.extui %245 : vector<8x64xi1> to vector<8x64xi32>
    %247 = arith.addi %203, %246 : vector<8x64xi32>
    %248 = vector.extract_strided_slice %11 {offsets = [0, 21], sizes = [8, 1], strides = [1, 1]} : vector<8x64xf32> to vector<8x1xf32>
    %249 = vector.broadcast %248 : vector<8x1xf32> to vector<8x64xf32>
    %250 = arith.cmpf ogt, %249, %11 : vector<8x64xf32>
    %251 = vector.broadcast %248 : vector<8x1xf32> to vector<8x64xf32>
    %252 = arith.cmpf oeq, %251, %11 : vector<8x64xf32>
    %c21_i32 = arith.constant 21 : i32
    %253 = vector.broadcast %c21_i32 : i32 to vector<8x64xi32>
    %254 = arith.cmpi sgt, %12, %253 : vector<8x64xi32>
    %255 = arith.andi %252, %254 : vector<8x64xi1>
    %256 = arith.ori %250, %255 : vector<8x64xi1>
    %257 = arith.extui %256 : vector<8x64xi1> to vector<8x64xi32>
    %258 = arith.addi %214, %257 : vector<8x64xi32>
    %259 = vector.extract_strided_slice %11 {offsets = [0, 22], sizes = [8, 1], strides = [1, 1]} : vector<8x64xf32> to vector<8x1xf32>
    %260 = vector.broadcast %259 : vector<8x1xf32> to vector<8x64xf32>
    %261 = arith.cmpf ogt, %260, %11 : vector<8x64xf32>
    %262 = vector.broadcast %259 : vector<8x1xf32> to vector<8x64xf32>
    %263 = arith.cmpf oeq, %262, %11 : vector<8x64xf32>
    %c22_i32 = arith.constant 22 : i32
    %264 = vector.broadcast %c22_i32 : i32 to vector<8x64xi32>
    %265 = arith.cmpi sgt, %12, %264 : vector<8x64xi32>
    %266 = arith.andi %263, %265 : vector<8x64xi1>
    %267 = arith.ori %261, %266 : vector<8x64xi1>
    %268 = arith.extui %267 : vector<8x64xi1> to vector<8x64xi32>
    %269 = arith.addi %225, %268 : vector<8x64xi32>
    %270 = vector.extract_strided_slice %11 {offsets = [0, 23], sizes = [8, 1], strides = [1, 1]} : vector<8x64xf32> to vector<8x1xf32>
    %271 = vector.broadcast %270 : vector<8x1xf32> to vector<8x64xf32>
    %272 = arith.cmpf ogt, %271, %11 : vector<8x64xf32>
    %273 = vector.broadcast %270 : vector<8x1xf32> to vector<8x64xf32>
    %274 = arith.cmpf oeq, %273, %11 : vector<8x64xf32>
    %c23_i32 = arith.constant 23 : i32
    %275 = vector.broadcast %c23_i32 : i32 to vector<8x64xi32>
    %276 = arith.cmpi sgt, %12, %275 : vector<8x64xi32>
    %277 = arith.andi %274, %276 : vector<8x64xi1>
    %278 = arith.ori %272, %277 : vector<8x64xi1>
    %279 = arith.extui %278 : vector<8x64xi1> to vector<8x64xi32>
    %280 = arith.addi %236, %279 : vector<8x64xi32>
    %281 = vector.extract_strided_slice %11 {offsets = [0, 24], sizes = [8, 1], strides = [1, 1]} : vector<8x64xf32> to vector<8x1xf32>
    %282 = vector.broadcast %281 : vector<8x1xf32> to vector<8x64xf32>
    %283 = arith.cmpf ogt, %282, %11 : vector<8x64xf32>
    %284 = vector.broadcast %281 : vector<8x1xf32> to vector<8x64xf32>
    %285 = arith.cmpf oeq, %284, %11 : vector<8x64xf32>
    %c24_i32 = arith.constant 24 : i32
    %286 = vector.broadcast %c24_i32 : i32 to vector<8x64xi32>
    %287 = arith.cmpi sgt, %12, %286 : vector<8x64xi32>
    %288 = arith.andi %285, %287 : vector<8x64xi1>
    %289 = arith.ori %283, %288 : vector<8x64xi1>
    %290 = arith.extui %289 : vector<8x64xi1> to vector<8x64xi32>
    %291 = arith.addi %247, %290 : vector<8x64xi32>
    %292 = vector.extract_strided_slice %11 {offsets = [0, 25], sizes = [8, 1], strides = [1, 1]} : vector<8x64xf32> to vector<8x1xf32>
    %293 = vector.broadcast %292 : vector<8x1xf32> to vector<8x64xf32>
    %294 = arith.cmpf ogt, %293, %11 : vector<8x64xf32>
    %295 = vector.broadcast %292 : vector<8x1xf32> to vector<8x64xf32>
    %296 = arith.cmpf oeq, %295, %11 : vector<8x64xf32>
    %c25_i32 = arith.constant 25 : i32
    %297 = vector.broadcast %c25_i32 : i32 to vector<8x64xi32>
    %298 = arith.cmpi sgt, %12, %297 : vector<8x64xi32>
    %299 = arith.andi %296, %298 : vector<8x64xi1>
    %300 = arith.ori %294, %299 : vector<8x64xi1>
    %301 = arith.extui %300 : vector<8x64xi1> to vector<8x64xi32>
    %302 = arith.addi %258, %301 : vector<8x64xi32>
    %303 = vector.extract_strided_slice %11 {offsets = [0, 26], sizes = [8, 1], strides = [1, 1]} : vector<8x64xf32> to vector<8x1xf32>
    %304 = vector.broadcast %303 : vector<8x1xf32> to vector<8x64xf32>
    %305 = arith.cmpf ogt, %304, %11 : vector<8x64xf32>
    %306 = vector.broadcast %303 : vector<8x1xf32> to vector<8x64xf32>
    %307 = arith.cmpf oeq, %306, %11 : vector<8x64xf32>
    %c26_i32 = arith.constant 26 : i32
    %308 = vector.broadcast %c26_i32 : i32 to vector<8x64xi32>
    %309 = arith.cmpi sgt, %12, %308 : vector<8x64xi32>
    %310 = arith.andi %307, %309 : vector<8x64xi1>
    %311 = arith.ori %305, %310 : vector<8x64xi1>
    %312 = arith.extui %311 : vector<8x64xi1> to vector<8x64xi32>
    %313 = arith.addi %269, %312 : vector<8x64xi32>
    %314 = vector.extract_strided_slice %11 {offsets = [0, 27], sizes = [8, 1], strides = [1, 1]} : vector<8x64xf32> to vector<8x1xf32>
    %315 = vector.broadcast %314 : vector<8x1xf32> to vector<8x64xf32>
    %316 = arith.cmpf ogt, %315, %11 : vector<8x64xf32>
    %317 = vector.broadcast %314 : vector<8x1xf32> to vector<8x64xf32>
    %318 = arith.cmpf oeq, %317, %11 : vector<8x64xf32>
    %c27_i32 = arith.constant 27 : i32
    %319 = vector.broadcast %c27_i32 : i32 to vector<8x64xi32>
    %320 = arith.cmpi sgt, %12, %319 : vector<8x64xi32>
    %321 = arith.andi %318, %320 : vector<8x64xi1>
    %322 = arith.ori %316, %321 : vector<8x64xi1>
    %323 = arith.extui %322 : vector<8x64xi1> to vector<8x64xi32>
    %324 = arith.addi %280, %323 : vector<8x64xi32>
    %325 = vector.extract_strided_slice %11 {offsets = [0, 28], sizes = [8, 1], strides = [1, 1]} : vector<8x64xf32> to vector<8x1xf32>
    %326 = vector.broadcast %325 : vector<8x1xf32> to vector<8x64xf32>
    %327 = arith.cmpf ogt, %326, %11 : vector<8x64xf32>
    %328 = vector.broadcast %325 : vector<8x1xf32> to vector<8x64xf32>
    %329 = arith.cmpf oeq, %328, %11 : vector<8x64xf32>
    %c28_i32 = arith.constant 28 : i32
    %330 = vector.broadcast %c28_i32 : i32 to vector<8x64xi32>
    %331 = arith.cmpi sgt, %12, %330 : vector<8x64xi32>
    %332 = arith.andi %329, %331 : vector<8x64xi1>
    %333 = arith.ori %327, %332 : vector<8x64xi1>
    %334 = arith.extui %333 : vector<8x64xi1> to vector<8x64xi32>
    %335 = arith.addi %291, %334 : vector<8x64xi32>
    %336 = vector.extract_strided_slice %11 {offsets = [0, 29], sizes = [8, 1], strides = [1, 1]} : vector<8x64xf32> to vector<8x1xf32>
    %337 = vector.broadcast %336 : vector<8x1xf32> to vector<8x64xf32>
    %338 = arith.cmpf ogt, %337, %11 : vector<8x64xf32>
    %339 = vector.broadcast %336 : vector<8x1xf32> to vector<8x64xf32>
    %340 = arith.cmpf oeq, %339, %11 : vector<8x64xf32>
    %c29_i32 = arith.constant 29 : i32
    %341 = vector.broadcast %c29_i32 : i32 to vector<8x64xi32>
    %342 = arith.cmpi sgt, %12, %341 : vector<8x64xi32>
    %343 = arith.andi %340, %342 : vector<8x64xi1>
    %344 = arith.ori %338, %343 : vector<8x64xi1>
    %345 = arith.extui %344 : vector<8x64xi1> to vector<8x64xi32>
    %346 = arith.addi %302, %345 : vector<8x64xi32>
    %347 = vector.extract_strided_slice %11 {offsets = [0, 30], sizes = [8, 1], strides = [1, 1]} : vector<8x64xf32> to vector<8x1xf32>
    %348 = vector.broadcast %347 : vector<8x1xf32> to vector<8x64xf32>
    %349 = arith.cmpf ogt, %348, %11 : vector<8x64xf32>
    %350 = vector.broadcast %347 : vector<8x1xf32> to vector<8x64xf32>
    %351 = arith.cmpf oeq, %350, %11 : vector<8x64xf32>
    %c30_i32 = arith.constant 30 : i32
    %352 = vector.broadcast %c30_i32 : i32 to vector<8x64xi32>
    %353 = arith.cmpi sgt, %12, %352 : vector<8x64xi32>
    %354 = arith.andi %351, %353 : vector<8x64xi1>
    %355 = arith.ori %349, %354 : vector<8x64xi1>
    %356 = arith.extui %355 : vector<8x64xi1> to vector<8x64xi32>
    %357 = arith.addi %313, %356 : vector<8x64xi32>
    %358 = vector.extract_strided_slice %11 {offsets = [0, 31], sizes = [8, 1], strides = [1, 1]} : vector<8x64xf32> to vector<8x1xf32>
    %359 = vector.broadcast %358 : vector<8x1xf32> to vector<8x64xf32>
    %360 = arith.cmpf ogt, %359, %11 : vector<8x64xf32>
    %361 = vector.broadcast %358 : vector<8x1xf32> to vector<8x64xf32>
    %362 = arith.cmpf oeq, %361, %11 : vector<8x64xf32>
    %c31_i32 = arith.constant 31 : i32
    %363 = vector.broadcast %c31_i32 : i32 to vector<8x64xi32>
    %364 = arith.cmpi sgt, %12, %363 : vector<8x64xi32>
    %365 = arith.andi %362, %364 : vector<8x64xi1>
    %366 = arith.ori %360, %365 : vector<8x64xi1>
    %367 = arith.extui %366 : vector<8x64xi1> to vector<8x64xi32>
    %368 = arith.addi %324, %367 : vector<8x64xi32>
    %369 = vector.extract_strided_slice %11 {offsets = [0, 32], sizes = [8, 1], strides = [1, 1]} : vector<8x64xf32> to vector<8x1xf32>
    %370 = vector.broadcast %369 : vector<8x1xf32> to vector<8x64xf32>
    %371 = arith.cmpf ogt, %370, %11 : vector<8x64xf32>
    %372 = vector.broadcast %369 : vector<8x1xf32> to vector<8x64xf32>
    %373 = arith.cmpf oeq, %372, %11 : vector<8x64xf32>
    %c32_i32 = arith.constant 32 : i32
    %374 = vector.broadcast %c32_i32 : i32 to vector<8x64xi32>
    %375 = arith.cmpi sgt, %12, %374 : vector<8x64xi32>
    %376 = arith.andi %373, %375 : vector<8x64xi1>
    %377 = arith.ori %371, %376 : vector<8x64xi1>
    %378 = arith.extui %377 : vector<8x64xi1> to vector<8x64xi32>
    %379 = arith.addi %335, %378 : vector<8x64xi32>
    %380 = vector.extract_strided_slice %11 {offsets = [0, 33], sizes = [8, 1], strides = [1, 1]} : vector<8x64xf32> to vector<8x1xf32>
    %381 = vector.broadcast %380 : vector<8x1xf32> to vector<8x64xf32>
    %382 = arith.cmpf ogt, %381, %11 : vector<8x64xf32>
    %383 = vector.broadcast %380 : vector<8x1xf32> to vector<8x64xf32>
    %384 = arith.cmpf oeq, %383, %11 : vector<8x64xf32>
    %c33_i32 = arith.constant 33 : i32
    %385 = vector.broadcast %c33_i32 : i32 to vector<8x64xi32>
    %386 = arith.cmpi sgt, %12, %385 : vector<8x64xi32>
    %387 = arith.andi %384, %386 : vector<8x64xi1>
    %388 = arith.ori %382, %387 : vector<8x64xi1>
    %389 = arith.extui %388 : vector<8x64xi1> to vector<8x64xi32>
    %390 = arith.addi %346, %389 : vector<8x64xi32>
    %391 = vector.extract_strided_slice %11 {offsets = [0, 34], sizes = [8, 1], strides = [1, 1]} : vector<8x64xf32> to vector<8x1xf32>
    %392 = vector.broadcast %391 : vector<8x1xf32> to vector<8x64xf32>
    %393 = arith.cmpf ogt, %392, %11 : vector<8x64xf32>
    %394 = vector.broadcast %391 : vector<8x1xf32> to vector<8x64xf32>
    %395 = arith.cmpf oeq, %394, %11 : vector<8x64xf32>
    %c34_i32 = arith.constant 34 : i32
    %396 = vector.broadcast %c34_i32 : i32 to vector<8x64xi32>
    %397 = arith.cmpi sgt, %12, %396 : vector<8x64xi32>
    %398 = arith.andi %395, %397 : vector<8x64xi1>
    %399 = arith.ori %393, %398 : vector<8x64xi1>
    %400 = arith.extui %399 : vector<8x64xi1> to vector<8x64xi32>
    %401 = arith.addi %357, %400 : vector<8x64xi32>
    %402 = vector.extract_strided_slice %11 {offsets = [0, 35], sizes = [8, 1], strides = [1, 1]} : vector<8x64xf32> to vector<8x1xf32>
    %403 = vector.broadcast %402 : vector<8x1xf32> to vector<8x64xf32>
    %404 = arith.cmpf ogt, %403, %11 : vector<8x64xf32>
    %405 = vector.broadcast %402 : vector<8x1xf32> to vector<8x64xf32>
    %406 = arith.cmpf oeq, %405, %11 : vector<8x64xf32>
    %c35_i32 = arith.constant 35 : i32
    %407 = vector.broadcast %c35_i32 : i32 to vector<8x64xi32>
    %408 = arith.cmpi sgt, %12, %407 : vector<8x64xi32>
    %409 = arith.andi %406, %408 : vector<8x64xi1>
    %410 = arith.ori %404, %409 : vector<8x64xi1>
    %411 = arith.extui %410 : vector<8x64xi1> to vector<8x64xi32>
    %412 = arith.addi %368, %411 : vector<8x64xi32>
    %413 = vector.extract_strided_slice %11 {offsets = [0, 36], sizes = [8, 1], strides = [1, 1]} : vector<8x64xf32> to vector<8x1xf32>
    %414 = vector.broadcast %413 : vector<8x1xf32> to vector<8x64xf32>
    %415 = arith.cmpf ogt, %414, %11 : vector<8x64xf32>
    %416 = vector.broadcast %413 : vector<8x1xf32> to vector<8x64xf32>
    %417 = arith.cmpf oeq, %416, %11 : vector<8x64xf32>
    %c36_i32 = arith.constant 36 : i32
    %418 = vector.broadcast %c36_i32 : i32 to vector<8x64xi32>
    %419 = arith.cmpi sgt, %12, %418 : vector<8x64xi32>
    %420 = arith.andi %417, %419 : vector<8x64xi1>
    %421 = arith.ori %415, %420 : vector<8x64xi1>
    %422 = arith.extui %421 : vector<8x64xi1> to vector<8x64xi32>
    %423 = arith.addi %379, %422 : vector<8x64xi32>
    %424 = vector.extract_strided_slice %11 {offsets = [0, 37], sizes = [8, 1], strides = [1, 1]} : vector<8x64xf32> to vector<8x1xf32>
    %425 = vector.broadcast %424 : vector<8x1xf32> to vector<8x64xf32>
    %426 = arith.cmpf ogt, %425, %11 : vector<8x64xf32>
    %427 = vector.broadcast %424 : vector<8x1xf32> to vector<8x64xf32>
    %428 = arith.cmpf oeq, %427, %11 : vector<8x64xf32>
    %c37_i32 = arith.constant 37 : i32
    %429 = vector.broadcast %c37_i32 : i32 to vector<8x64xi32>
    %430 = arith.cmpi sgt, %12, %429 : vector<8x64xi32>
    %431 = arith.andi %428, %430 : vector<8x64xi1>
    %432 = arith.ori %426, %431 : vector<8x64xi1>
    %433 = arith.extui %432 : vector<8x64xi1> to vector<8x64xi32>
    %434 = arith.addi %390, %433 : vector<8x64xi32>
    %435 = vector.extract_strided_slice %11 {offsets = [0, 38], sizes = [8, 1], strides = [1, 1]} : vector<8x64xf32> to vector<8x1xf32>
    %436 = vector.broadcast %435 : vector<8x1xf32> to vector<8x64xf32>
    %437 = arith.cmpf ogt, %436, %11 : vector<8x64xf32>
    %438 = vector.broadcast %435 : vector<8x1xf32> to vector<8x64xf32>
    %439 = arith.cmpf oeq, %438, %11 : vector<8x64xf32>
    %c38_i32 = arith.constant 38 : i32
    %440 = vector.broadcast %c38_i32 : i32 to vector<8x64xi32>
    %441 = arith.cmpi sgt, %12, %440 : vector<8x64xi32>
    %442 = arith.andi %439, %441 : vector<8x64xi1>
    %443 = arith.ori %437, %442 : vector<8x64xi1>
    %444 = arith.extui %443 : vector<8x64xi1> to vector<8x64xi32>
    %445 = arith.addi %401, %444 : vector<8x64xi32>
    %446 = vector.extract_strided_slice %11 {offsets = [0, 39], sizes = [8, 1], strides = [1, 1]} : vector<8x64xf32> to vector<8x1xf32>
    %447 = vector.broadcast %446 : vector<8x1xf32> to vector<8x64xf32>
    %448 = arith.cmpf ogt, %447, %11 : vector<8x64xf32>
    %449 = vector.broadcast %446 : vector<8x1xf32> to vector<8x64xf32>
    %450 = arith.cmpf oeq, %449, %11 : vector<8x64xf32>
    %c39_i32 = arith.constant 39 : i32
    %451 = vector.broadcast %c39_i32 : i32 to vector<8x64xi32>
    %452 = arith.cmpi sgt, %12, %451 : vector<8x64xi32>
    %453 = arith.andi %450, %452 : vector<8x64xi1>
    %454 = arith.ori %448, %453 : vector<8x64xi1>
    %455 = arith.extui %454 : vector<8x64xi1> to vector<8x64xi32>
    %456 = arith.addi %412, %455 : vector<8x64xi32>
    %457 = vector.extract_strided_slice %11 {offsets = [0, 40], sizes = [8, 1], strides = [1, 1]} : vector<8x64xf32> to vector<8x1xf32>
    %458 = vector.broadcast %457 : vector<8x1xf32> to vector<8x64xf32>
    %459 = arith.cmpf ogt, %458, %11 : vector<8x64xf32>
    %460 = vector.broadcast %457 : vector<8x1xf32> to vector<8x64xf32>
    %461 = arith.cmpf oeq, %460, %11 : vector<8x64xf32>
    %c40_i32 = arith.constant 40 : i32
    %462 = vector.broadcast %c40_i32 : i32 to vector<8x64xi32>
    %463 = arith.cmpi sgt, %12, %462 : vector<8x64xi32>
    %464 = arith.andi %461, %463 : vector<8x64xi1>
    %465 = arith.ori %459, %464 : vector<8x64xi1>
    %466 = arith.extui %465 : vector<8x64xi1> to vector<8x64xi32>
    %467 = arith.addi %423, %466 : vector<8x64xi32>
    %468 = vector.extract_strided_slice %11 {offsets = [0, 41], sizes = [8, 1], strides = [1, 1]} : vector<8x64xf32> to vector<8x1xf32>
    %469 = vector.broadcast %468 : vector<8x1xf32> to vector<8x64xf32>
    %470 = arith.cmpf ogt, %469, %11 : vector<8x64xf32>
    %471 = vector.broadcast %468 : vector<8x1xf32> to vector<8x64xf32>
    %472 = arith.cmpf oeq, %471, %11 : vector<8x64xf32>
    %c41_i32 = arith.constant 41 : i32
    %473 = vector.broadcast %c41_i32 : i32 to vector<8x64xi32>
    %474 = arith.cmpi sgt, %12, %473 : vector<8x64xi32>
    %475 = arith.andi %472, %474 : vector<8x64xi1>
    %476 = arith.ori %470, %475 : vector<8x64xi1>
    %477 = arith.extui %476 : vector<8x64xi1> to vector<8x64xi32>
    %478 = arith.addi %434, %477 : vector<8x64xi32>
    %479 = vector.extract_strided_slice %11 {offsets = [0, 42], sizes = [8, 1], strides = [1, 1]} : vector<8x64xf32> to vector<8x1xf32>
    %480 = vector.broadcast %479 : vector<8x1xf32> to vector<8x64xf32>
    %481 = arith.cmpf ogt, %480, %11 : vector<8x64xf32>
    %482 = vector.broadcast %479 : vector<8x1xf32> to vector<8x64xf32>
    %483 = arith.cmpf oeq, %482, %11 : vector<8x64xf32>
    %c42_i32 = arith.constant 42 : i32
    %484 = vector.broadcast %c42_i32 : i32 to vector<8x64xi32>
    %485 = arith.cmpi sgt, %12, %484 : vector<8x64xi32>
    %486 = arith.andi %483, %485 : vector<8x64xi1>
    %487 = arith.ori %481, %486 : vector<8x64xi1>
    %488 = arith.extui %487 : vector<8x64xi1> to vector<8x64xi32>
    %489 = arith.addi %445, %488 : vector<8x64xi32>
    %490 = vector.extract_strided_slice %11 {offsets = [0, 43], sizes = [8, 1], strides = [1, 1]} : vector<8x64xf32> to vector<8x1xf32>
    %491 = vector.broadcast %490 : vector<8x1xf32> to vector<8x64xf32>
    %492 = arith.cmpf ogt, %491, %11 : vector<8x64xf32>
    %493 = vector.broadcast %490 : vector<8x1xf32> to vector<8x64xf32>
    %494 = arith.cmpf oeq, %493, %11 : vector<8x64xf32>
    %c43_i32 = arith.constant 43 : i32
    %495 = vector.broadcast %c43_i32 : i32 to vector<8x64xi32>
    %496 = arith.cmpi sgt, %12, %495 : vector<8x64xi32>
    %497 = arith.andi %494, %496 : vector<8x64xi1>
    %498 = arith.ori %492, %497 : vector<8x64xi1>
    %499 = arith.extui %498 : vector<8x64xi1> to vector<8x64xi32>
    %500 = arith.addi %456, %499 : vector<8x64xi32>
    %501 = vector.extract_strided_slice %11 {offsets = [0, 44], sizes = [8, 1], strides = [1, 1]} : vector<8x64xf32> to vector<8x1xf32>
    %502 = vector.broadcast %501 : vector<8x1xf32> to vector<8x64xf32>
    %503 = arith.cmpf ogt, %502, %11 : vector<8x64xf32>
    %504 = vector.broadcast %501 : vector<8x1xf32> to vector<8x64xf32>
    %505 = arith.cmpf oeq, %504, %11 : vector<8x64xf32>
    %c44_i32 = arith.constant 44 : i32
    %506 = vector.broadcast %c44_i32 : i32 to vector<8x64xi32>
    %507 = arith.cmpi sgt, %12, %506 : vector<8x64xi32>
    %508 = arith.andi %505, %507 : vector<8x64xi1>
    %509 = arith.ori %503, %508 : vector<8x64xi1>
    %510 = arith.extui %509 : vector<8x64xi1> to vector<8x64xi32>
    %511 = arith.addi %467, %510 : vector<8x64xi32>
    %512 = vector.extract_strided_slice %11 {offsets = [0, 45], sizes = [8, 1], strides = [1, 1]} : vector<8x64xf32> to vector<8x1xf32>
    %513 = vector.broadcast %512 : vector<8x1xf32> to vector<8x64xf32>
    %514 = arith.cmpf ogt, %513, %11 : vector<8x64xf32>
    %515 = vector.broadcast %512 : vector<8x1xf32> to vector<8x64xf32>
    %516 = arith.cmpf oeq, %515, %11 : vector<8x64xf32>
    %c45_i32 = arith.constant 45 : i32
    %517 = vector.broadcast %c45_i32 : i32 to vector<8x64xi32>
    %518 = arith.cmpi sgt, %12, %517 : vector<8x64xi32>
    %519 = arith.andi %516, %518 : vector<8x64xi1>
    %520 = arith.ori %514, %519 : vector<8x64xi1>
    %521 = arith.extui %520 : vector<8x64xi1> to vector<8x64xi32>
    %522 = arith.addi %478, %521 : vector<8x64xi32>
    %523 = vector.extract_strided_slice %11 {offsets = [0, 46], sizes = [8, 1], strides = [1, 1]} : vector<8x64xf32> to vector<8x1xf32>
    %524 = vector.broadcast %523 : vector<8x1xf32> to vector<8x64xf32>
    %525 = arith.cmpf ogt, %524, %11 : vector<8x64xf32>
    %526 = vector.broadcast %523 : vector<8x1xf32> to vector<8x64xf32>
    %527 = arith.cmpf oeq, %526, %11 : vector<8x64xf32>
    %c46_i32 = arith.constant 46 : i32
    %528 = vector.broadcast %c46_i32 : i32 to vector<8x64xi32>
    %529 = arith.cmpi sgt, %12, %528 : vector<8x64xi32>
    %530 = arith.andi %527, %529 : vector<8x64xi1>
    %531 = arith.ori %525, %530 : vector<8x64xi1>
    %532 = arith.extui %531 : vector<8x64xi1> to vector<8x64xi32>
    %533 = arith.addi %489, %532 : vector<8x64xi32>
    %534 = vector.extract_strided_slice %11 {offsets = [0, 47], sizes = [8, 1], strides = [1, 1]} : vector<8x64xf32> to vector<8x1xf32>
    %535 = vector.broadcast %534 : vector<8x1xf32> to vector<8x64xf32>
    %536 = arith.cmpf ogt, %535, %11 : vector<8x64xf32>
    %537 = vector.broadcast %534 : vector<8x1xf32> to vector<8x64xf32>
    %538 = arith.cmpf oeq, %537, %11 : vector<8x64xf32>
    %c47_i32 = arith.constant 47 : i32
    %539 = vector.broadcast %c47_i32 : i32 to vector<8x64xi32>
    %540 = arith.cmpi sgt, %12, %539 : vector<8x64xi32>
    %541 = arith.andi %538, %540 : vector<8x64xi1>
    %542 = arith.ori %536, %541 : vector<8x64xi1>
    %543 = arith.extui %542 : vector<8x64xi1> to vector<8x64xi32>
    %544 = arith.addi %500, %543 : vector<8x64xi32>
    %545 = vector.extract_strided_slice %11 {offsets = [0, 48], sizes = [8, 1], strides = [1, 1]} : vector<8x64xf32> to vector<8x1xf32>
    %546 = vector.broadcast %545 : vector<8x1xf32> to vector<8x64xf32>
    %547 = arith.cmpf ogt, %546, %11 : vector<8x64xf32>
    %548 = vector.broadcast %545 : vector<8x1xf32> to vector<8x64xf32>
    %549 = arith.cmpf oeq, %548, %11 : vector<8x64xf32>
    %c48_i32 = arith.constant 48 : i32
    %550 = vector.broadcast %c48_i32 : i32 to vector<8x64xi32>
    %551 = arith.cmpi sgt, %12, %550 : vector<8x64xi32>
    %552 = arith.andi %549, %551 : vector<8x64xi1>
    %553 = arith.ori %547, %552 : vector<8x64xi1>
    %554 = arith.extui %553 : vector<8x64xi1> to vector<8x64xi32>
    %555 = arith.addi %511, %554 : vector<8x64xi32>
    %556 = vector.extract_strided_slice %11 {offsets = [0, 49], sizes = [8, 1], strides = [1, 1]} : vector<8x64xf32> to vector<8x1xf32>
    %557 = vector.broadcast %556 : vector<8x1xf32> to vector<8x64xf32>
    %558 = arith.cmpf ogt, %557, %11 : vector<8x64xf32>
    %559 = vector.broadcast %556 : vector<8x1xf32> to vector<8x64xf32>
    %560 = arith.cmpf oeq, %559, %11 : vector<8x64xf32>
    %c49_i32 = arith.constant 49 : i32
    %561 = vector.broadcast %c49_i32 : i32 to vector<8x64xi32>
    %562 = arith.cmpi sgt, %12, %561 : vector<8x64xi32>
    %563 = arith.andi %560, %562 : vector<8x64xi1>
    %564 = arith.ori %558, %563 : vector<8x64xi1>
    %565 = arith.extui %564 : vector<8x64xi1> to vector<8x64xi32>
    %566 = arith.addi %522, %565 : vector<8x64xi32>
    %567 = vector.extract_strided_slice %11 {offsets = [0, 50], sizes = [8, 1], strides = [1, 1]} : vector<8x64xf32> to vector<8x1xf32>
    %568 = vector.broadcast %567 : vector<8x1xf32> to vector<8x64xf32>
    %569 = arith.cmpf ogt, %568, %11 : vector<8x64xf32>
    %570 = vector.broadcast %567 : vector<8x1xf32> to vector<8x64xf32>
    %571 = arith.cmpf oeq, %570, %11 : vector<8x64xf32>
    %c50_i32 = arith.constant 50 : i32
    %572 = vector.broadcast %c50_i32 : i32 to vector<8x64xi32>
    %573 = arith.cmpi sgt, %12, %572 : vector<8x64xi32>
    %574 = arith.andi %571, %573 : vector<8x64xi1>
    %575 = arith.ori %569, %574 : vector<8x64xi1>
    %576 = arith.extui %575 : vector<8x64xi1> to vector<8x64xi32>
    %577 = arith.addi %533, %576 : vector<8x64xi32>
    %578 = vector.extract_strided_slice %11 {offsets = [0, 51], sizes = [8, 1], strides = [1, 1]} : vector<8x64xf32> to vector<8x1xf32>
    %579 = vector.broadcast %578 : vector<8x1xf32> to vector<8x64xf32>
    %580 = arith.cmpf ogt, %579, %11 : vector<8x64xf32>
    %581 = vector.broadcast %578 : vector<8x1xf32> to vector<8x64xf32>
    %582 = arith.cmpf oeq, %581, %11 : vector<8x64xf32>
    %c51_i32 = arith.constant 51 : i32
    %583 = vector.broadcast %c51_i32 : i32 to vector<8x64xi32>
    %584 = arith.cmpi sgt, %12, %583 : vector<8x64xi32>
    %585 = arith.andi %582, %584 : vector<8x64xi1>
    %586 = arith.ori %580, %585 : vector<8x64xi1>
    %587 = arith.extui %586 : vector<8x64xi1> to vector<8x64xi32>
    %588 = arith.addi %544, %587 : vector<8x64xi32>
    %589 = vector.extract_strided_slice %11 {offsets = [0, 52], sizes = [8, 1], strides = [1, 1]} : vector<8x64xf32> to vector<8x1xf32>
    %590 = vector.broadcast %589 : vector<8x1xf32> to vector<8x64xf32>
    %591 = arith.cmpf ogt, %590, %11 : vector<8x64xf32>
    %592 = vector.broadcast %589 : vector<8x1xf32> to vector<8x64xf32>
    %593 = arith.cmpf oeq, %592, %11 : vector<8x64xf32>
    %c52_i32 = arith.constant 52 : i32
    %594 = vector.broadcast %c52_i32 : i32 to vector<8x64xi32>
    %595 = arith.cmpi sgt, %12, %594 : vector<8x64xi32>
    %596 = arith.andi %593, %595 : vector<8x64xi1>
    %597 = arith.ori %591, %596 : vector<8x64xi1>
    %598 = arith.extui %597 : vector<8x64xi1> to vector<8x64xi32>
    %599 = arith.addi %555, %598 : vector<8x64xi32>
    %600 = vector.extract_strided_slice %11 {offsets = [0, 53], sizes = [8, 1], strides = [1, 1]} : vector<8x64xf32> to vector<8x1xf32>
    %601 = vector.broadcast %600 : vector<8x1xf32> to vector<8x64xf32>
    %602 = arith.cmpf ogt, %601, %11 : vector<8x64xf32>
    %603 = vector.broadcast %600 : vector<8x1xf32> to vector<8x64xf32>
    %604 = arith.cmpf oeq, %603, %11 : vector<8x64xf32>
    %c53_i32 = arith.constant 53 : i32
    %605 = vector.broadcast %c53_i32 : i32 to vector<8x64xi32>
    %606 = arith.cmpi sgt, %12, %605 : vector<8x64xi32>
    %607 = arith.andi %604, %606 : vector<8x64xi1>
    %608 = arith.ori %602, %607 : vector<8x64xi1>
    %609 = arith.extui %608 : vector<8x64xi1> to vector<8x64xi32>
    %610 = arith.addi %566, %609 : vector<8x64xi32>
    %611 = vector.extract_strided_slice %11 {offsets = [0, 54], sizes = [8, 1], strides = [1, 1]} : vector<8x64xf32> to vector<8x1xf32>
    %612 = vector.broadcast %611 : vector<8x1xf32> to vector<8x64xf32>
    %613 = arith.cmpf ogt, %612, %11 : vector<8x64xf32>
    %614 = vector.broadcast %611 : vector<8x1xf32> to vector<8x64xf32>
    %615 = arith.cmpf oeq, %614, %11 : vector<8x64xf32>
    %c54_i32 = arith.constant 54 : i32
    %616 = vector.broadcast %c54_i32 : i32 to vector<8x64xi32>
    %617 = arith.cmpi sgt, %12, %616 : vector<8x64xi32>
    %618 = arith.andi %615, %617 : vector<8x64xi1>
    %619 = arith.ori %613, %618 : vector<8x64xi1>
    %620 = arith.extui %619 : vector<8x64xi1> to vector<8x64xi32>
    %621 = arith.addi %577, %620 : vector<8x64xi32>
    %622 = vector.extract_strided_slice %11 {offsets = [0, 55], sizes = [8, 1], strides = [1, 1]} : vector<8x64xf32> to vector<8x1xf32>
    %623 = vector.broadcast %622 : vector<8x1xf32> to vector<8x64xf32>
    %624 = arith.cmpf ogt, %623, %11 : vector<8x64xf32>
    %625 = vector.broadcast %622 : vector<8x1xf32> to vector<8x64xf32>
    %626 = arith.cmpf oeq, %625, %11 : vector<8x64xf32>
    %c55_i32 = arith.constant 55 : i32
    %627 = vector.broadcast %c55_i32 : i32 to vector<8x64xi32>
    %628 = arith.cmpi sgt, %12, %627 : vector<8x64xi32>
    %629 = arith.andi %626, %628 : vector<8x64xi1>
    %630 = arith.ori %624, %629 : vector<8x64xi1>
    %631 = arith.extui %630 : vector<8x64xi1> to vector<8x64xi32>
    %632 = arith.addi %588, %631 : vector<8x64xi32>
    %633 = vector.extract_strided_slice %11 {offsets = [0, 56], sizes = [8, 1], strides = [1, 1]} : vector<8x64xf32> to vector<8x1xf32>
    %634 = vector.broadcast %633 : vector<8x1xf32> to vector<8x64xf32>
    %635 = arith.cmpf ogt, %634, %11 : vector<8x64xf32>
    %636 = vector.broadcast %633 : vector<8x1xf32> to vector<8x64xf32>
    %637 = arith.cmpf oeq, %636, %11 : vector<8x64xf32>
    %c56_i32 = arith.constant 56 : i32
    %638 = vector.broadcast %c56_i32 : i32 to vector<8x64xi32>
    %639 = arith.cmpi sgt, %12, %638 : vector<8x64xi32>
    %640 = arith.andi %637, %639 : vector<8x64xi1>
    %641 = arith.ori %635, %640 : vector<8x64xi1>
    %642 = arith.extui %641 : vector<8x64xi1> to vector<8x64xi32>
    %643 = arith.addi %599, %642 : vector<8x64xi32>
    %644 = vector.extract_strided_slice %11 {offsets = [0, 57], sizes = [8, 1], strides = [1, 1]} : vector<8x64xf32> to vector<8x1xf32>
    %645 = vector.broadcast %644 : vector<8x1xf32> to vector<8x64xf32>
    %646 = arith.cmpf ogt, %645, %11 : vector<8x64xf32>
    %647 = vector.broadcast %644 : vector<8x1xf32> to vector<8x64xf32>
    %648 = arith.cmpf oeq, %647, %11 : vector<8x64xf32>
    %c57_i32 = arith.constant 57 : i32
    %649 = vector.broadcast %c57_i32 : i32 to vector<8x64xi32>
    %650 = arith.cmpi sgt, %12, %649 : vector<8x64xi32>
    %651 = arith.andi %648, %650 : vector<8x64xi1>
    %652 = arith.ori %646, %651 : vector<8x64xi1>
    %653 = arith.extui %652 : vector<8x64xi1> to vector<8x64xi32>
    %654 = arith.addi %610, %653 : vector<8x64xi32>
    %655 = vector.extract_strided_slice %11 {offsets = [0, 58], sizes = [8, 1], strides = [1, 1]} : vector<8x64xf32> to vector<8x1xf32>
    %656 = vector.broadcast %655 : vector<8x1xf32> to vector<8x64xf32>
    %657 = arith.cmpf ogt, %656, %11 : vector<8x64xf32>
    %658 = vector.broadcast %655 : vector<8x1xf32> to vector<8x64xf32>
    %659 = arith.cmpf oeq, %658, %11 : vector<8x64xf32>
    %c58_i32 = arith.constant 58 : i32
    %660 = vector.broadcast %c58_i32 : i32 to vector<8x64xi32>
    %661 = arith.cmpi sgt, %12, %660 : vector<8x64xi32>
    %662 = arith.andi %659, %661 : vector<8x64xi1>
    %663 = arith.ori %657, %662 : vector<8x64xi1>
    %664 = arith.extui %663 : vector<8x64xi1> to vector<8x64xi32>
    %665 = arith.addi %621, %664 : vector<8x64xi32>
    %666 = vector.extract_strided_slice %11 {offsets = [0, 59], sizes = [8, 1], strides = [1, 1]} : vector<8x64xf32> to vector<8x1xf32>
    %667 = vector.broadcast %666 : vector<8x1xf32> to vector<8x64xf32>
    %668 = arith.cmpf ogt, %667, %11 : vector<8x64xf32>
    %669 = vector.broadcast %666 : vector<8x1xf32> to vector<8x64xf32>
    %670 = arith.cmpf oeq, %669, %11 : vector<8x64xf32>
    %c59_i32 = arith.constant 59 : i32
    %671 = vector.broadcast %c59_i32 : i32 to vector<8x64xi32>
    %672 = arith.cmpi sgt, %12, %671 : vector<8x64xi32>
    %673 = arith.andi %670, %672 : vector<8x64xi1>
    %674 = arith.ori %668, %673 : vector<8x64xi1>
    %675 = arith.extui %674 : vector<8x64xi1> to vector<8x64xi32>
    %676 = arith.addi %632, %675 : vector<8x64xi32>
    %677 = vector.extract_strided_slice %11 {offsets = [0, 60], sizes = [8, 1], strides = [1, 1]} : vector<8x64xf32> to vector<8x1xf32>
    %678 = vector.broadcast %677 : vector<8x1xf32> to vector<8x64xf32>
    %679 = arith.cmpf ogt, %678, %11 : vector<8x64xf32>
    %680 = vector.broadcast %677 : vector<8x1xf32> to vector<8x64xf32>
    %681 = arith.cmpf oeq, %680, %11 : vector<8x64xf32>
    %c60_i32 = arith.constant 60 : i32
    %682 = vector.broadcast %c60_i32 : i32 to vector<8x64xi32>
    %683 = arith.cmpi sgt, %12, %682 : vector<8x64xi32>
    %684 = arith.andi %681, %683 : vector<8x64xi1>
    %685 = arith.ori %679, %684 : vector<8x64xi1>
    %686 = arith.extui %685 : vector<8x64xi1> to vector<8x64xi32>
    %687 = arith.addi %643, %686 : vector<8x64xi32>
    %688 = vector.extract_strided_slice %11 {offsets = [0, 61], sizes = [8, 1], strides = [1, 1]} : vector<8x64xf32> to vector<8x1xf32>
    %689 = vector.broadcast %688 : vector<8x1xf32> to vector<8x64xf32>
    %690 = arith.cmpf ogt, %689, %11 : vector<8x64xf32>
    %691 = vector.broadcast %688 : vector<8x1xf32> to vector<8x64xf32>
    %692 = arith.cmpf oeq, %691, %11 : vector<8x64xf32>
    %c61_i32 = arith.constant 61 : i32
    %693 = vector.broadcast %c61_i32 : i32 to vector<8x64xi32>
    %694 = arith.cmpi sgt, %12, %693 : vector<8x64xi32>
    %695 = arith.andi %692, %694 : vector<8x64xi1>
    %696 = arith.ori %690, %695 : vector<8x64xi1>
    %697 = arith.extui %696 : vector<8x64xi1> to vector<8x64xi32>
    %698 = arith.addi %654, %697 : vector<8x64xi32>
    %699 = vector.extract_strided_slice %11 {offsets = [0, 62], sizes = [8, 1], strides = [1, 1]} : vector<8x64xf32> to vector<8x1xf32>
    %700 = vector.broadcast %699 : vector<8x1xf32> to vector<8x64xf32>
    %701 = arith.cmpf ogt, %700, %11 : vector<8x64xf32>
    %702 = vector.broadcast %699 : vector<8x1xf32> to vector<8x64xf32>
    %703 = arith.cmpf oeq, %702, %11 : vector<8x64xf32>
    %c62_i32 = arith.constant 62 : i32
    %704 = vector.broadcast %c62_i32 : i32 to vector<8x64xi32>
    %705 = arith.cmpi sgt, %12, %704 : vector<8x64xi32>
    %706 = arith.andi %703, %705 : vector<8x64xi1>
    %707 = arith.ori %701, %706 : vector<8x64xi1>
    %708 = arith.extui %707 : vector<8x64xi1> to vector<8x64xi32>
    %709 = arith.addi %665, %708 : vector<8x64xi32>
    %710 = vector.extract_strided_slice %11 {offsets = [0, 63], sizes = [8, 1], strides = [1, 1]} : vector<8x64xf32> to vector<8x1xf32>
    %711 = vector.broadcast %710 : vector<8x1xf32> to vector<8x64xf32>
    %712 = arith.cmpf ogt, %711, %11 : vector<8x64xf32>
    %713 = vector.broadcast %710 : vector<8x1xf32> to vector<8x64xf32>
    %714 = arith.cmpf oeq, %713, %11 : vector<8x64xf32>
    %c63_i32 = arith.constant 63 : i32
    %715 = vector.broadcast %c63_i32 : i32 to vector<8x64xi32>
    %716 = arith.cmpi sgt, %12, %715 : vector<8x64xi32>
    %717 = arith.andi %714, %716 : vector<8x64xi1>
    %718 = arith.ori %712, %717 : vector<8x64xi1>
    %719 = arith.extui %718 : vector<8x64xi1> to vector<8x64xi32>
    %720 = arith.addi %676, %719 : vector<8x64xi32>
    %721 = arith.addi %687, %698 : vector<8x64xi32>
    %722 = arith.addi %721, %709 : vector<8x64xi32>
    %723 = arith.addi %722, %720 : vector<8x64xi32>
    %c0_i32_12 = arith.constant 0 : i32
    %724 = vector.broadcast %c0_i32_12 : i32 to vector<8x64xi32>
    %c0_i32_13 = arith.constant 0 : i32
    %725 = vector.broadcast %c0_i32_13 : i32 to vector<8x64xi32>
    %726 = vector.extract_strided_slice %723 {offsets = [0, 0], sizes = [8, 1], strides = [1, 1]} : vector<8x64xi32> to vector<8x1xi32>
    %727 = vector.broadcast %726 : vector<8x1xi32> to vector<8x64xi32>
    %728 = arith.cmpi eq, %12, %727 : vector<8x64xi32>
    %729 = arith.extui %728 : vector<8x64xi1> to vector<8x64xi32>
    %730 = arith.addi %724, %729 : vector<8x64xi32>
    %731 = vector.extract_strided_slice %723 {offsets = [0, 1], sizes = [8, 1], strides = [1, 1]} : vector<8x64xi32> to vector<8x1xi32>
    %732 = vector.broadcast %731 : vector<8x1xi32> to vector<8x64xi32>
    %733 = arith.cmpi eq, %12, %732 : vector<8x64xi32>
    %734 = arith.extui %733 : vector<8x64xi1> to vector<8x64xi32>
    %735 = arith.addi %725, %734 : vector<8x64xi32>
    %736 = vector.extract_strided_slice %723 {offsets = [0, 2], sizes = [8, 1], strides = [1, 1]} : vector<8x64xi32> to vector<8x1xi32>
    %737 = vector.broadcast %736 : vector<8x1xi32> to vector<8x64xi32>
    %738 = arith.cmpi eq, %12, %737 : vector<8x64xi32>
    %739 = arith.extui %738 : vector<8x64xi1> to vector<8x64xi32>
    %740 = arith.addi %730, %739 : vector<8x64xi32>
    %741 = vector.extract_strided_slice %723 {offsets = [0, 3], sizes = [8, 1], strides = [1, 1]} : vector<8x64xi32> to vector<8x1xi32>
    %742 = vector.broadcast %741 : vector<8x1xi32> to vector<8x64xi32>
    %743 = arith.cmpi eq, %12, %742 : vector<8x64xi32>
    %744 = arith.extui %743 : vector<8x64xi1> to vector<8x64xi32>
    %745 = arith.addi %735, %744 : vector<8x64xi32>
    %746 = vector.extract_strided_slice %723 {offsets = [0, 4], sizes = [8, 1], strides = [1, 1]} : vector<8x64xi32> to vector<8x1xi32>
    %747 = vector.broadcast %746 : vector<8x1xi32> to vector<8x64xi32>
    %748 = arith.cmpi eq, %12, %747 : vector<8x64xi32>
    %749 = arith.extui %748 : vector<8x64xi1> to vector<8x64xi32>
    %750 = arith.addi %740, %749 : vector<8x64xi32>
    %751 = vector.extract_strided_slice %723 {offsets = [0, 5], sizes = [8, 1], strides = [1, 1]} : vector<8x64xi32> to vector<8x1xi32>
    %752 = vector.broadcast %751 : vector<8x1xi32> to vector<8x64xi32>
    %753 = arith.cmpi eq, %12, %752 : vector<8x64xi32>
    %754 = arith.extui %753 : vector<8x64xi1> to vector<8x64xi32>
    %755 = arith.addi %745, %754 : vector<8x64xi32>
    %756 = vector.extract_strided_slice %723 {offsets = [0, 6], sizes = [8, 1], strides = [1, 1]} : vector<8x64xi32> to vector<8x1xi32>
    %757 = vector.broadcast %756 : vector<8x1xi32> to vector<8x64xi32>
    %758 = arith.cmpi eq, %12, %757 : vector<8x64xi32>
    %759 = arith.extui %758 : vector<8x64xi1> to vector<8x64xi32>
    %760 = arith.addi %750, %759 : vector<8x64xi32>
    %761 = vector.extract_strided_slice %723 {offsets = [0, 7], sizes = [8, 1], strides = [1, 1]} : vector<8x64xi32> to vector<8x1xi32>
    %762 = vector.broadcast %761 : vector<8x1xi32> to vector<8x64xi32>
    %763 = arith.cmpi eq, %12, %762 : vector<8x64xi32>
    %764 = arith.extui %763 : vector<8x64xi1> to vector<8x64xi32>
    %765 = arith.addi %755, %764 : vector<8x64xi32>
    %766 = vector.extract_strided_slice %723 {offsets = [0, 8], sizes = [8, 1], strides = [1, 1]} : vector<8x64xi32> to vector<8x1xi32>
    %767 = vector.broadcast %766 : vector<8x1xi32> to vector<8x64xi32>
    %768 = arith.cmpi eq, %12, %767 : vector<8x64xi32>
    %769 = arith.extui %768 : vector<8x64xi1> to vector<8x64xi32>
    %770 = arith.addi %760, %769 : vector<8x64xi32>
    %771 = vector.extract_strided_slice %723 {offsets = [0, 9], sizes = [8, 1], strides = [1, 1]} : vector<8x64xi32> to vector<8x1xi32>
    %772 = vector.broadcast %771 : vector<8x1xi32> to vector<8x64xi32>
    %773 = arith.cmpi eq, %12, %772 : vector<8x64xi32>
    %774 = arith.extui %773 : vector<8x64xi1> to vector<8x64xi32>
    %775 = arith.addi %765, %774 : vector<8x64xi32>
    %776 = vector.extract_strided_slice %723 {offsets = [0, 10], sizes = [8, 1], strides = [1, 1]} : vector<8x64xi32> to vector<8x1xi32>
    %777 = vector.broadcast %776 : vector<8x1xi32> to vector<8x64xi32>
    %778 = arith.cmpi eq, %12, %777 : vector<8x64xi32>
    %779 = arith.extui %778 : vector<8x64xi1> to vector<8x64xi32>
    %780 = arith.addi %770, %779 : vector<8x64xi32>
    %781 = vector.extract_strided_slice %723 {offsets = [0, 11], sizes = [8, 1], strides = [1, 1]} : vector<8x64xi32> to vector<8x1xi32>
    %782 = vector.broadcast %781 : vector<8x1xi32> to vector<8x64xi32>
    %783 = arith.cmpi eq, %12, %782 : vector<8x64xi32>
    %784 = arith.extui %783 : vector<8x64xi1> to vector<8x64xi32>
    %785 = arith.addi %775, %784 : vector<8x64xi32>
    %786 = vector.extract_strided_slice %723 {offsets = [0, 12], sizes = [8, 1], strides = [1, 1]} : vector<8x64xi32> to vector<8x1xi32>
    %787 = vector.broadcast %786 : vector<8x1xi32> to vector<8x64xi32>
    %788 = arith.cmpi eq, %12, %787 : vector<8x64xi32>
    %789 = arith.extui %788 : vector<8x64xi1> to vector<8x64xi32>
    %790 = arith.addi %780, %789 : vector<8x64xi32>
    %791 = vector.extract_strided_slice %723 {offsets = [0, 13], sizes = [8, 1], strides = [1, 1]} : vector<8x64xi32> to vector<8x1xi32>
    %792 = vector.broadcast %791 : vector<8x1xi32> to vector<8x64xi32>
    %793 = arith.cmpi eq, %12, %792 : vector<8x64xi32>
    %794 = arith.extui %793 : vector<8x64xi1> to vector<8x64xi32>
    %795 = arith.addi %785, %794 : vector<8x64xi32>
    %796 = vector.extract_strided_slice %723 {offsets = [0, 14], sizes = [8, 1], strides = [1, 1]} : vector<8x64xi32> to vector<8x1xi32>
    %797 = vector.broadcast %796 : vector<8x1xi32> to vector<8x64xi32>
    %798 = arith.cmpi eq, %12, %797 : vector<8x64xi32>
    %799 = arith.extui %798 : vector<8x64xi1> to vector<8x64xi32>
    %800 = arith.addi %790, %799 : vector<8x64xi32>
    %801 = vector.extract_strided_slice %723 {offsets = [0, 15], sizes = [8, 1], strides = [1, 1]} : vector<8x64xi32> to vector<8x1xi32>
    %802 = vector.broadcast %801 : vector<8x1xi32> to vector<8x64xi32>
    %803 = arith.cmpi eq, %12, %802 : vector<8x64xi32>
    %804 = arith.extui %803 : vector<8x64xi1> to vector<8x64xi32>
    %805 = arith.addi %795, %804 : vector<8x64xi32>
    %806 = vector.extract_strided_slice %723 {offsets = [0, 16], sizes = [8, 1], strides = [1, 1]} : vector<8x64xi32> to vector<8x1xi32>
    %807 = vector.broadcast %806 : vector<8x1xi32> to vector<8x64xi32>
    %808 = arith.cmpi eq, %12, %807 : vector<8x64xi32>
    %809 = arith.extui %808 : vector<8x64xi1> to vector<8x64xi32>
    %810 = arith.addi %800, %809 : vector<8x64xi32>
    %811 = vector.extract_strided_slice %723 {offsets = [0, 17], sizes = [8, 1], strides = [1, 1]} : vector<8x64xi32> to vector<8x1xi32>
    %812 = vector.broadcast %811 : vector<8x1xi32> to vector<8x64xi32>
    %813 = arith.cmpi eq, %12, %812 : vector<8x64xi32>
    %814 = arith.extui %813 : vector<8x64xi1> to vector<8x64xi32>
    %815 = arith.addi %805, %814 : vector<8x64xi32>
    %816 = vector.extract_strided_slice %723 {offsets = [0, 18], sizes = [8, 1], strides = [1, 1]} : vector<8x64xi32> to vector<8x1xi32>
    %817 = vector.broadcast %816 : vector<8x1xi32> to vector<8x64xi32>
    %818 = arith.cmpi eq, %12, %817 : vector<8x64xi32>
    %819 = arith.extui %818 : vector<8x64xi1> to vector<8x64xi32>
    %820 = arith.addi %810, %819 : vector<8x64xi32>
    %821 = vector.extract_strided_slice %723 {offsets = [0, 19], sizes = [8, 1], strides = [1, 1]} : vector<8x64xi32> to vector<8x1xi32>
    %822 = vector.broadcast %821 : vector<8x1xi32> to vector<8x64xi32>
    %823 = arith.cmpi eq, %12, %822 : vector<8x64xi32>
    %824 = arith.extui %823 : vector<8x64xi1> to vector<8x64xi32>
    %825 = arith.addi %815, %824 : vector<8x64xi32>
    %826 = vector.extract_strided_slice %723 {offsets = [0, 20], sizes = [8, 1], strides = [1, 1]} : vector<8x64xi32> to vector<8x1xi32>
    %827 = vector.broadcast %826 : vector<8x1xi32> to vector<8x64xi32>
    %828 = arith.cmpi eq, %12, %827 : vector<8x64xi32>
    %829 = arith.extui %828 : vector<8x64xi1> to vector<8x64xi32>
    %830 = arith.addi %820, %829 : vector<8x64xi32>
    %831 = vector.extract_strided_slice %723 {offsets = [0, 21], sizes = [8, 1], strides = [1, 1]} : vector<8x64xi32> to vector<8x1xi32>
    %832 = vector.broadcast %831 : vector<8x1xi32> to vector<8x64xi32>
    %833 = arith.cmpi eq, %12, %832 : vector<8x64xi32>
    %834 = arith.extui %833 : vector<8x64xi1> to vector<8x64xi32>
    %835 = arith.addi %825, %834 : vector<8x64xi32>
    %836 = vector.extract_strided_slice %723 {offsets = [0, 22], sizes = [8, 1], strides = [1, 1]} : vector<8x64xi32> to vector<8x1xi32>
    %837 = vector.broadcast %836 : vector<8x1xi32> to vector<8x64xi32>
    %838 = arith.cmpi eq, %12, %837 : vector<8x64xi32>
    %839 = arith.extui %838 : vector<8x64xi1> to vector<8x64xi32>
    %840 = arith.addi %830, %839 : vector<8x64xi32>
    %841 = vector.extract_strided_slice %723 {offsets = [0, 23], sizes = [8, 1], strides = [1, 1]} : vector<8x64xi32> to vector<8x1xi32>
    %842 = vector.broadcast %841 : vector<8x1xi32> to vector<8x64xi32>
    %843 = arith.cmpi eq, %12, %842 : vector<8x64xi32>
    %844 = arith.extui %843 : vector<8x64xi1> to vector<8x64xi32>
    %845 = arith.addi %835, %844 : vector<8x64xi32>
    %846 = vector.extract_strided_slice %723 {offsets = [0, 24], sizes = [8, 1], strides = [1, 1]} : vector<8x64xi32> to vector<8x1xi32>
    %847 = vector.broadcast %846 : vector<8x1xi32> to vector<8x64xi32>
    %848 = arith.cmpi eq, %12, %847 : vector<8x64xi32>
    %849 = arith.extui %848 : vector<8x64xi1> to vector<8x64xi32>
    %850 = arith.addi %840, %849 : vector<8x64xi32>
    %851 = vector.extract_strided_slice %723 {offsets = [0, 25], sizes = [8, 1], strides = [1, 1]} : vector<8x64xi32> to vector<8x1xi32>
    %852 = vector.broadcast %851 : vector<8x1xi32> to vector<8x64xi32>
    %853 = arith.cmpi eq, %12, %852 : vector<8x64xi32>
    %854 = arith.extui %853 : vector<8x64xi1> to vector<8x64xi32>
    %855 = arith.addi %845, %854 : vector<8x64xi32>
    %856 = vector.extract_strided_slice %723 {offsets = [0, 26], sizes = [8, 1], strides = [1, 1]} : vector<8x64xi32> to vector<8x1xi32>
    %857 = vector.broadcast %856 : vector<8x1xi32> to vector<8x64xi32>
    %858 = arith.cmpi eq, %12, %857 : vector<8x64xi32>
    %859 = arith.extui %858 : vector<8x64xi1> to vector<8x64xi32>
    %860 = arith.addi %850, %859 : vector<8x64xi32>
    %861 = vector.extract_strided_slice %723 {offsets = [0, 27], sizes = [8, 1], strides = [1, 1]} : vector<8x64xi32> to vector<8x1xi32>
    %862 = vector.broadcast %861 : vector<8x1xi32> to vector<8x64xi32>
    %863 = arith.cmpi eq, %12, %862 : vector<8x64xi32>
    %864 = arith.extui %863 : vector<8x64xi1> to vector<8x64xi32>
    %865 = arith.addi %855, %864 : vector<8x64xi32>
    %866 = vector.extract_strided_slice %723 {offsets = [0, 28], sizes = [8, 1], strides = [1, 1]} : vector<8x64xi32> to vector<8x1xi32>
    %867 = vector.broadcast %866 : vector<8x1xi32> to vector<8x64xi32>
    %868 = arith.cmpi eq, %12, %867 : vector<8x64xi32>
    %869 = arith.extui %868 : vector<8x64xi1> to vector<8x64xi32>
    %870 = arith.addi %860, %869 : vector<8x64xi32>
    %871 = vector.extract_strided_slice %723 {offsets = [0, 29], sizes = [8, 1], strides = [1, 1]} : vector<8x64xi32> to vector<8x1xi32>
    %872 = vector.broadcast %871 : vector<8x1xi32> to vector<8x64xi32>
    %873 = arith.cmpi eq, %12, %872 : vector<8x64xi32>
    %874 = arith.extui %873 : vector<8x64xi1> to vector<8x64xi32>
    %875 = arith.addi %865, %874 : vector<8x64xi32>
    %876 = vector.extract_strided_slice %723 {offsets = [0, 30], sizes = [8, 1], strides = [1, 1]} : vector<8x64xi32> to vector<8x1xi32>
    %877 = vector.broadcast %876 : vector<8x1xi32> to vector<8x64xi32>
    %878 = arith.cmpi eq, %12, %877 : vector<8x64xi32>
    %879 = arith.extui %878 : vector<8x64xi1> to vector<8x64xi32>
    %880 = arith.addi %870, %879 : vector<8x64xi32>
    %881 = vector.extract_strided_slice %723 {offsets = [0, 31], sizes = [8, 1], strides = [1, 1]} : vector<8x64xi32> to vector<8x1xi32>
    %882 = vector.broadcast %881 : vector<8x1xi32> to vector<8x64xi32>
    %883 = arith.cmpi eq, %12, %882 : vector<8x64xi32>
    %884 = arith.extui %883 : vector<8x64xi1> to vector<8x64xi32>
    %885 = arith.addi %875, %884 : vector<8x64xi32>
    %886 = arith.addi %880, %885 : vector<8x64xi32>
    %c0_i32_14 = arith.constant 0 : i32
    %887 = vector.broadcast %c0_i32_14 : i32 to vector<8x64xi32>
    %888 = arith.cmpi sgt, %886, %887 : vector<8x64xi32>
    %889 = tpu.iota {dimensions = array<i32: 0>} : vector<64x64xi32>
    %890 = tpu.iota {dimensions = array<i32: 1>} : vector<64x64xi32>
    %891 = arith.cmpi slt, %889, %890 : vector<64x64xi32>
    %892 = arith.extui %891 : vector<64x64xi1> to vector<64x64xi32>
    %893 = arith.sitofp %892 : vector<64x64xi32> to vector<64x64xf32>
    %894 = arith.extui %888 : vector<8x64xi1> to vector<8x64xi32>
    %895 = arith.sitofp %894 : vector<8x64xi32> to vector<8x64xf32>
    %cst_15 = arith.constant dense<0.000000e+00> : vector<8x64xf32>
    %896 = tpu.matmul %895, %893, %cst_15 {dimension_numbers = #tpu.dot_dimension_numbers<[1], [0], [0], [1], [0, 0, 1, 1], [], []>} : vector<8x64xf32>, vector<64x64xf32>, vector<8x64xf32> -> vector<8x64xf32>
    %897 = arith.fptosi %896 : vector<8x64xf32> to vector<8x64xi32>
    %c-1_i32 = arith.constant -1 : i32
    %898 = vector.broadcast %c-1_i32 : i32 to vector<8x64xi32>
    %899 = arith.select %888, %897, %898 : vector<8x64xi1>, vector<8x64xi32>
    %c0_i32_16 = arith.constant 0 : i32
    %900 = vector.broadcast %c0_i32_16 : i32 to vector<8x64xi32>
    %901 = arith.cmpi eq, %723, %900 : vector<8x64xi32>
    %cst_17 = arith.constant 0.000000e+00 : f32
    %902 = vector.broadcast %cst_17 : f32 to vector<8x64xf32>
    %903 = arith.select %901, %11, %902 : vector<8x64xi1>, vector<8x64xf32>
    %cst_18 = arith.constant dense<0.000000e+00> : vector<8xf32>
    %904 = vector.multi_reduction <add>, %903, %cst_18 [1] : vector<8x64xf32> to vector<8xf32>
    %905 = vector.shape_cast %904 : vector<8xf32> to vector<8x1xf32>
    %c0_i32_19 = arith.constant 0 : i32
    %906 = vector.broadcast %c0_i32_19 : i32 to vector<8x64xi32>
    %907 = arith.cmpi eq, %899, %906 : vector<8x64xi32>
    %cst_20 = arith.constant 0.000000e+00 : f32
    %908 = vector.broadcast %cst_20 : f32 to vector<8x64xf32>
    %909 = arith.select %907, %0, %908 : vector<8x64xi1>, vector<8x64xf32>
    %cst_21 = arith.constant dense<0.000000e+00> : vector<8xf32>
    %910 = vector.multi_reduction <add>, %909, %cst_21 [1] : vector<8x64xf32> to vector<8xf32>
    %911 = vector.shape_cast %910 : vector<8xf32> to vector<8x1xf32>
    %912 = arith.mulf %911, %905 : vector<8x1xf32>
    %c0_22 = arith.constant 0 : index
    %c0_23 = arith.constant 0 : index
    %913 = vector.load %arg4[%c0_22, %c0_23] : memref<8x32xf32, #tpu.memory_space<vmem>>, vector<8x1xf32>
    tpu.vector_store %arg4[%c0_22, %c0_23], %912 {strides = array<i32>} : memref<8x32xf32, #tpu.memory_space<vmem>>, vector<8x1xf32>,
    %c1_i32_24 = arith.constant 1 : i32
    %914 = vector.broadcast %c1_i32_24 : i32 to vector<8x64xi32>
    %915 = arith.cmpi eq, %723, %914 : vector<8x64xi32>
    %cst_25 = arith.constant 0.000000e+00 : f32
    %916 = vector.broadcast %cst_25 : f32 to vector<8x64xf32>
    %917 = arith.select %915, %11, %916 : vector<8x64xi1>, vector<8x64xf32>
    %cst_26 = arith.constant dense<0.000000e+00> : vector<8xf32>
    %918 = vector.multi_reduction <add>, %917, %cst_26 [1] : vector<8x64xf32> to vector<8xf32>
    %919 = vector.shape_cast %918 : vector<8xf32> to vector<8x1xf32>
    %c1_i32_27 = arith.constant 1 : i32
    %920 = vector.broadcast %c1_i32_27 : i32 to vector<8x64xi32>
    %921 = arith.cmpi eq, %899, %920 : vector<8x64xi32>
    %cst_28 = arith.constant 0.000000e+00 : f32
    %922 = vector.broadcast %cst_28 : f32 to vector<8x64xf32>
    %923 = arith.select %921, %0, %922 : vector<8x64xi1>, vector<8x64xf32>
    %cst_29 = arith.constant dense<0.000000e+00> : vector<8xf32>
    %924 = vector.multi_reduction <add>, %923, %cst_29 [1] : vector<8x64xf32> to vector<8xf32>
    %925 = vector.shape_cast %924 : vector<8xf32> to vector<8x1xf32>
    %926 = arith.mulf %925, %919 : vector<8x1xf32>
    %c0_30 = arith.constant 0 : index
    %c1 = arith.constant 1 : index
    %927 = vector.load %arg4[%c0_30, %c1] : memref<8x32xf32, #tpu.memory_space<vmem>>, vector<8x1xf32>
    tpu.vector_store %arg4[%c0_30, %c1], %926 {strides = array<i32>} : memref<8x32xf32, #tpu.memory_space<vmem>>, vector<8x1xf32>,
    %c2_i32_31 = arith.constant 2 : i32
    %928 = vector.broadcast %c2_i32_31 : i32 to vector<8x64xi32>
    %929 = arith.cmpi eq, %723, %928 : vector<8x64xi32>
    %cst_32 = arith.constant 0.000000e+00 : f32
    %930 = vector.broadcast %cst_32 : f32 to vector<8x64xf32>
    %931 = arith.select %929, %11, %930 : vector<8x64xi1>, vector<8x64xf32>
    %cst_33 = arith.constant dense<0.000000e+00> : vector<8xf32>
    %932 = vector.multi_reduction <add>, %931, %cst_33 [1] : vector<8x64xf32> to vector<8xf32>
    %933 = vector.shape_cast %932 : vector<8xf32> to vector<8x1xf32>
    %c2_i32_34 = arith.constant 2 : i32
    %934 = vector.broadcast %c2_i32_34 : i32 to vector<8x64xi32>
    %935 = arith.cmpi eq, %899, %934 : vector<8x64xi32>
    %cst_35 = arith.constant 0.000000e+00 : f32
    %936 = vector.broadcast %cst_35 : f32 to vector<8x64xf32>
    %937 = arith.select %935, %0, %936 : vector<8x64xi1>, vector<8x64xf32>
    %cst_36 = arith.constant dense<0.000000e+00> : vector<8xf32>
    %938 = vector.multi_reduction <add>, %937, %cst_36 [1] : vector<8x64xf32> to vector<8xf32>
    %939 = vector.shape_cast %938 : vector<8xf32> to vector<8x1xf32>
    %940 = arith.mulf %939, %933 : vector<8x1xf32>
    %c0_37 = arith.constant 0 : index
    %c2 = arith.constant 2 : index
    %941 = vector.load %arg4[%c0_37, %c2] : memref<8x32xf32, #tpu.memory_space<vmem>>, vector<8x1xf32>
    tpu.vector_store %arg4[%c0_37, %c2], %940 {strides = array<i32>} : memref<8x32xf32, #tpu.memory_space<vmem>>, vector<8x1xf32>,
    %c3_i32_38 = arith.constant 3 : i32
    %942 = vector.broadcast %c3_i32_38 : i32 to vector<8x64xi32>
    %943 = arith.cmpi eq, %723, %942 : vector<8x64xi32>
    %cst_39 = arith.constant 0.000000e+00 : f32
    %944 = vector.broadcast %cst_39 : f32 to vector<8x64xf32>
    %945 = arith.select %943, %11, %944 : vector<8x64xi1>, vector<8x64xf32>
    %cst_40 = arith.constant dense<0.000000e+00> : vector<8xf32>
    %946 = vector.multi_reduction <add>, %945, %cst_40 [1] : vector<8x64xf32> to vector<8xf32>
    %947 = vector.shape_cast %946 : vector<8xf32> to vector<8x1xf32>
    %c3_i32_41 = arith.constant 3 : i32
    %948 = vector.broadcast %c3_i32_41 : i32 to vector<8x64xi32>
    %949 = arith.cmpi eq, %899, %948 : vector<8x64xi32>
    %cst_42 = arith.constant 0.000000e+00 : f32
    %950 = vector.broadcast %cst_42 : f32 to vector<8x64xf32>
    %951 = arith.select %949, %0, %950 : vector<8x64xi1>, vector<8x64xf32>
    %cst_43 = arith.constant dense<0.000000e+00> : vector<8xf32>
    %952 = vector.multi_reduction <add>, %951, %cst_43 [1] : vector<8x64xf32> to vector<8xf32>
    %953 = vector.shape_cast %952 : vector<8xf32> to vector<8x1xf32>
    %954 = arith.mulf %953, %947 : vector<8x1xf32>
    %c0_44 = arith.constant 0 : index
    %c3 = arith.constant 3 : index
    %955 = vector.load %arg4[%c0_44, %c3] : memref<8x32xf32, #tpu.memory_space<vmem>>, vector<8x1xf32>
    tpu.vector_store %arg4[%c0_44, %c3], %954 {strides = array<i32>} : memref<8x32xf32, #tpu.memory_space<vmem>>, vector<8x1xf32>,
    %c4_i32_45 = arith.constant 4 : i32
    %956 = vector.broadcast %c4_i32_45 : i32 to vector<8x64xi32>
    %957 = arith.cmpi eq, %723, %956 : vector<8x64xi32>
    %cst_46 = arith.constant 0.000000e+00 : f32
    %958 = vector.broadcast %cst_46 : f32 to vector<8x64xf32>
    %959 = arith.select %957, %11, %958 : vector<8x64xi1>, vector<8x64xf32>
    %cst_47 = arith.constant dense<0.000000e+00> : vector<8xf32>
    %960 = vector.multi_reduction <add>, %959, %cst_47 [1] : vector<8x64xf32> to vector<8xf32>
    %961 = vector.shape_cast %960 : vector<8xf32> to vector<8x1xf32>
    %c4_i32_48 = arith.constant 4 : i32
    %962 = vector.broadcast %c4_i32_48 : i32 to vector<8x64xi32>
    %963 = arith.cmpi eq, %899, %962 : vector<8x64xi32>
    %cst_49 = arith.constant 0.000000e+00 : f32
    %964 = vector.broadcast %cst_49 : f32 to vector<8x64xf32>
    %965 = arith.select %963, %0, %964 : vector<8x64xi1>, vector<8x64xf32>
    %cst_50 = arith.constant dense<0.000000e+00> : vector<8xf32>
    %966 = vector.multi_reduction <add>, %965, %cst_50 [1] : vector<8x64xf32> to vector<8xf32>
    %967 = vector.shape_cast %966 : vector<8xf32> to vector<8x1xf32>
    %968 = arith.mulf %967, %961 : vector<8x1xf32>
    %c0_51 = arith.constant 0 : index
    %c4 = arith.constant 4 : index
    %969 = vector.load %arg4[%c0_51, %c4] : memref<8x32xf32, #tpu.memory_space<vmem>>, vector<8x1xf32>
    tpu.vector_store %arg4[%c0_51, %c4], %968 {strides = array<i32>} : memref<8x32xf32, #tpu.memory_space<vmem>>, vector<8x1xf32>,
    %c5_i32_52 = arith.constant 5 : i32
    %970 = vector.broadcast %c5_i32_52 : i32 to vector<8x64xi32>
    %971 = arith.cmpi eq, %723, %970 : vector<8x64xi32>
    %cst_53 = arith.constant 0.000000e+00 : f32
    %972 = vector.broadcast %cst_53 : f32 to vector<8x64xf32>
    %973 = arith.select %971, %11, %972 : vector<8x64xi1>, vector<8x64xf32>
    %cst_54 = arith.constant dense<0.000000e+00> : vector<8xf32>
    %974 = vector.multi_reduction <add>, %973, %cst_54 [1] : vector<8x64xf32> to vector<8xf32>
    %975 = vector.shape_cast %974 : vector<8xf32> to vector<8x1xf32>
    %c5_i32_55 = arith.constant 5 : i32
    %976 = vector.broadcast %c5_i32_55 : i32 to vector<8x64xi32>
    %977 = arith.cmpi eq, %899, %976 : vector<8x64xi32>
    %cst_56 = arith.constant 0.000000e+00 : f32
    %978 = vector.broadcast %cst_56 : f32 to vector<8x64xf32>
    %979 = arith.select %977, %0, %978 : vector<8x64xi1>, vector<8x64xf32>
    %cst_57 = arith.constant dense<0.000000e+00> : vector<8xf32>
    %980 = vector.multi_reduction <add>, %979, %cst_57 [1] : vector<8x64xf32> to vector<8xf32>
    %981 = vector.shape_cast %980 : vector<8xf32> to vector<8x1xf32>
    %982 = arith.mulf %981, %975 : vector<8x1xf32>
    %c0_58 = arith.constant 0 : index
    %c5 = arith.constant 5 : index
    %983 = vector.load %arg4[%c0_58, %c5] : memref<8x32xf32, #tpu.memory_space<vmem>>, vector<8x1xf32>
    tpu.vector_store %arg4[%c0_58, %c5], %982 {strides = array<i32>} : memref<8x32xf32, #tpu.memory_space<vmem>>, vector<8x1xf32>,
    %c6_i32_59 = arith.constant 6 : i32
    %984 = vector.broadcast %c6_i32_59 : i32 to vector<8x64xi32>
    %985 = arith.cmpi eq, %723, %984 : vector<8x64xi32>
    %cst_60 = arith.constant 0.000000e+00 : f32
    %986 = vector.broadcast %cst_60 : f32 to vector<8x64xf32>
    %987 = arith.select %985, %11, %986 : vector<8x64xi1>, vector<8x64xf32>
    %cst_61 = arith.constant dense<0.000000e+00> : vector<8xf32>
    %988 = vector.multi_reduction <add>, %987, %cst_61 [1] : vector<8x64xf32> to vector<8xf32>
    %989 = vector.shape_cast %988 : vector<8xf32> to vector<8x1xf32>
    %c6_i32_62 = arith.constant 6 : i32
    %990 = vector.broadcast %c6_i32_62 : i32 to vector<8x64xi32>
    %991 = arith.cmpi eq, %899, %990 : vector<8x64xi32>
    %cst_63 = arith.constant 0.000000e+00 : f32
    %992 = vector.broadcast %cst_63 : f32 to vector<8x64xf32>
    %993 = arith.select %991, %0, %992 : vector<8x64xi1>, vector<8x64xf32>
    %cst_64 = arith.constant dense<0.000000e+00> : vector<8xf32>
    %994 = vector.multi_reduction <add>, %993, %cst_64 [1] : vector<8x64xf32> to vector<8xf32>
    %995 = vector.shape_cast %994 : vector<8xf32> to vector<8x1xf32>
    %996 = arith.mulf %995, %989 : vector<8x1xf32>
    %c0_65 = arith.constant 0 : index
    %c6 = arith.constant 6 : index
    %997 = vector.load %arg4[%c0_65, %c6] : memref<8x32xf32, #tpu.memory_space<vmem>>, vector<8x1xf32>
    tpu.vector_store %arg4[%c0_65, %c6], %996 {strides = array<i32>} : memref<8x32xf32, #tpu.memory_space<vmem>>, vector<8x1xf32>,
    %c7_i32_66 = arith.constant 7 : i32
    %998 = vector.broadcast %c7_i32_66 : i32 to vector<8x64xi32>
    %999 = arith.cmpi eq, %723, %998 : vector<8x64xi32>
    %cst_67 = arith.constant 0.000000e+00 : f32
    %1000 = vector.broadcast %cst_67 : f32 to vector<8x64xf32>
    %1001 = arith.select %999, %11, %1000 : vector<8x64xi1>, vector<8x64xf32>
    %cst_68 = arith.constant dense<0.000000e+00> : vector<8xf32>
    %1002 = vector.multi_reduction <add>, %1001, %cst_68 [1] : vector<8x64xf32> to vector<8xf32>
    %1003 = vector.shape_cast %1002 : vector<8xf32> to vector<8x1xf32>
    %c7_i32_69 = arith.constant 7 : i32
    %1004 = vector.broadcast %c7_i32_69 : i32 to vector<8x64xi32>
    %1005 = arith.cmpi eq, %899, %1004 : vector<8x64xi32>
    %cst_70 = arith.constant 0.000000e+00 : f32
    %1006 = vector.broadcast %cst_70 : f32 to vector<8x64xf32>
    %1007 = arith.select %1005, %0, %1006 : vector<8x64xi1>, vector<8x64xf32>
    %cst_71 = arith.constant dense<0.000000e+00> : vector<8xf32>
    %1008 = vector.multi_reduction <add>, %1007, %cst_71 [1] : vector<8x64xf32> to vector<8xf32>
    %1009 = vector.shape_cast %1008 : vector<8xf32> to vector<8x1xf32>
    %1010 = arith.mulf %1009, %1003 : vector<8x1xf32>
    %c0_72 = arith.constant 0 : index
    %c7 = arith.constant 7 : index
    %1011 = vector.load %arg4[%c0_72, %c7] : memref<8x32xf32, #tpu.memory_space<vmem>>, vector<8x1xf32>
    tpu.vector_store %arg4[%c0_72, %c7], %1010 {strides = array<i32>} : memref<8x32xf32, #tpu.memory_space<vmem>>, vector<8x1xf32>,
    %c8_i32_73 = arith.constant 8 : i32
    %1012 = vector.broadcast %c8_i32_73 : i32 to vector<8x64xi32>
    %1013 = arith.cmpi eq, %723, %1012 : vector<8x64xi32>
    %cst_74 = arith.constant 0.000000e+00 : f32
    %1014 = vector.broadcast %cst_74 : f32 to vector<8x64xf32>
    %1015 = arith.select %1013, %11, %1014 : vector<8x64xi1>, vector<8x64xf32>
    %cst_75 = arith.constant dense<0.000000e+00> : vector<8xf32>
    %1016 = vector.multi_reduction <add>, %1015, %cst_75 [1] : vector<8x64xf32> to vector<8xf32>
    %1017 = vector.shape_cast %1016 : vector<8xf32> to vector<8x1xf32>
    %c8_i32_76 = arith.constant 8 : i32
    %1018 = vector.broadcast %c8_i32_76 : i32 to vector<8x64xi32>
    %1019 = arith.cmpi eq, %899, %1018 : vector<8x64xi32>
    %cst_77 = arith.constant 0.000000e+00 : f32
    %1020 = vector.broadcast %cst_77 : f32 to vector<8x64xf32>
    %1021 = arith.select %1019, %0, %1020 : vector<8x64xi1>, vector<8x64xf32>
    %cst_78 = arith.constant dense<0.000000e+00> : vector<8xf32>
    %1022 = vector.multi_reduction <add>, %1021, %cst_78 [1] : vector<8x64xf32> to vector<8xf32>
    %1023 = vector.shape_cast %1022 : vector<8xf32> to vector<8x1xf32>
    %1024 = arith.mulf %1023, %1017 : vector<8x1xf32>
    %c0_79 = arith.constant 0 : index
    %c8 = arith.constant 8 : index
    %1025 = vector.load %arg4[%c0_79, %c8] : memref<8x32xf32, #tpu.memory_space<vmem>>, vector<8x1xf32>
    tpu.vector_store %arg4[%c0_79, %c8], %1024 {strides = array<i32>} : memref<8x32xf32, #tpu.memory_space<vmem>>, vector<8x1xf32>,
    %c9_i32_80 = arith.constant 9 : i32
    %1026 = vector.broadcast %c9_i32_80 : i32 to vector<8x64xi32>
    %1027 = arith.cmpi eq, %723, %1026 : vector<8x64xi32>
    %cst_81 = arith.constant 0.000000e+00 : f32
    %1028 = vector.broadcast %cst_81 : f32 to vector<8x64xf32>
    %1029 = arith.select %1027, %11, %1028 : vector<8x64xi1>, vector<8x64xf32>
    %cst_82 = arith.constant dense<0.000000e+00> : vector<8xf32>
    %1030 = vector.multi_reduction <add>, %1029, %cst_82 [1] : vector<8x64xf32> to vector<8xf32>
    %1031 = vector.shape_cast %1030 : vector<8xf32> to vector<8x1xf32>
    %c9_i32_83 = arith.constant 9 : i32
    %1032 = vector.broadcast %c9_i32_83 : i32 to vector<8x64xi32>
    %1033 = arith.cmpi eq, %899, %1032 : vector<8x64xi32>
    %cst_84 = arith.constant 0.000000e+00 : f32
    %1034 = vector.broadcast %cst_84 : f32 to vector<8x64xf32>
    %1035 = arith.select %1033, %0, %1034 : vector<8x64xi1>, vector<8x64xf32>
    %cst_85 = arith.constant dense<0.000000e+00> : vector<8xf32>
    %1036 = vector.multi_reduction <add>, %1035, %cst_85 [1] : vector<8x64xf32> to vector<8xf32>
    %1037 = vector.shape_cast %1036 : vector<8xf32> to vector<8x1xf32>
    %1038 = arith.mulf %1037, %1031 : vector<8x1xf32>
    %c0_86 = arith.constant 0 : index
    %c9 = arith.constant 9 : index
    %1039 = vector.load %arg4[%c0_86, %c9] : memref<8x32xf32, #tpu.memory_space<vmem>>, vector<8x1xf32>
    tpu.vector_store %arg4[%c0_86, %c9], %1038 {strides = array<i32>} : memref<8x32xf32, #tpu.memory_space<vmem>>, vector<8x1xf32>,
    %c10_i32_87 = arith.constant 10 : i32
    %1040 = vector.broadcast %c10_i32_87 : i32 to vector<8x64xi32>
    %1041 = arith.cmpi eq, %723, %1040 : vector<8x64xi32>
    %cst_88 = arith.constant 0.000000e+00 : f32
    %1042 = vector.broadcast %cst_88 : f32 to vector<8x64xf32>
    %1043 = arith.select %1041, %11, %1042 : vector<8x64xi1>, vector<8x64xf32>
    %cst_89 = arith.constant dense<0.000000e+00> : vector<8xf32>
    %1044 = vector.multi_reduction <add>, %1043, %cst_89 [1] : vector<8x64xf32> to vector<8xf32>
    %1045 = vector.shape_cast %1044 : vector<8xf32> to vector<8x1xf32>
    %c10_i32_90 = arith.constant 10 : i32
    %1046 = vector.broadcast %c10_i32_90 : i32 to vector<8x64xi32>
    %1047 = arith.cmpi eq, %899, %1046 : vector<8x64xi32>
    %cst_91 = arith.constant 0.000000e+00 : f32
    %1048 = vector.broadcast %cst_91 : f32 to vector<8x64xf32>
    %1049 = arith.select %1047, %0, %1048 : vector<8x64xi1>, vector<8x64xf32>
    %cst_92 = arith.constant dense<0.000000e+00> : vector<8xf32>
    %1050 = vector.multi_reduction <add>, %1049, %cst_92 [1] : vector<8x64xf32> to vector<8xf32>
    %1051 = vector.shape_cast %1050 : vector<8xf32> to vector<8x1xf32>
    %1052 = arith.mulf %1051, %1045 : vector<8x1xf32>
    %c0_93 = arith.constant 0 : index
    %c10 = arith.constant 10 : index
    %1053 = vector.load %arg4[%c0_93, %c10] : memref<8x32xf32, #tpu.memory_space<vmem>>, vector<8x1xf32>
    tpu.vector_store %arg4[%c0_93, %c10], %1052 {strides = array<i32>} : memref<8x32xf32, #tpu.memory_space<vmem>>, vector<8x1xf32>,
    %c11_i32_94 = arith.constant 11 : i32
    %1054 = vector.broadcast %c11_i32_94 : i32 to vector<8x64xi32>
    %1055 = arith.cmpi eq, %723, %1054 : vector<8x64xi32>
    %cst_95 = arith.constant 0.000000e+00 : f32
    %1056 = vector.broadcast %cst_95 : f32 to vector<8x64xf32>
    %1057 = arith.select %1055, %11, %1056 : vector<8x64xi1>, vector<8x64xf32>
    %cst_96 = arith.constant dense<0.000000e+00> : vector<8xf32>
    %1058 = vector.multi_reduction <add>, %1057, %cst_96 [1] : vector<8x64xf32> to vector<8xf32>
    %1059 = vector.shape_cast %1058 : vector<8xf32> to vector<8x1xf32>
    %c11_i32_97 = arith.constant 11 : i32
    %1060 = vector.broadcast %c11_i32_97 : i32 to vector<8x64xi32>
    %1061 = arith.cmpi eq, %899, %1060 : vector<8x64xi32>
    %cst_98 = arith.constant 0.000000e+00 : f32
    %1062 = vector.broadcast %cst_98 : f32 to vector<8x64xf32>
    %1063 = arith.select %1061, %0, %1062 : vector<8x64xi1>, vector<8x64xf32>
    %cst_99 = arith.constant dense<0.000000e+00> : vector<8xf32>
    %1064 = vector.multi_reduction <add>, %1063, %cst_99 [1] : vector<8x64xf32> to vector<8xf32>
    %1065 = vector.shape_cast %1064 : vector<8xf32> to vector<8x1xf32>
    %1066 = arith.mulf %1065, %1059 : vector<8x1xf32>
    %c0_100 = arith.constant 0 : index
    %c11 = arith.constant 11 : index
    %1067 = vector.load %arg4[%c0_100, %c11] : memref<8x32xf32, #tpu.memory_space<vmem>>, vector<8x1xf32>
    tpu.vector_store %arg4[%c0_100, %c11], %1066 {strides = array<i32>} : memref<8x32xf32, #tpu.memory_space<vmem>>, vector<8x1xf32>,
    %c12_i32_101 = arith.constant 12 : i32
    %1068 = vector.broadcast %c12_i32_101 : i32 to vector<8x64xi32>
    %1069 = arith.cmpi eq, %723, %1068 : vector<8x64xi32>
    %cst_102 = arith.constant 0.000000e+00 : f32
    %1070 = vector.broadcast %cst_102 : f32 to vector<8x64xf32>
    %1071 = arith.select %1069, %11, %1070 : vector<8x64xi1>, vector<8x64xf32>
    %cst_103 = arith.constant dense<0.000000e+00> : vector<8xf32>
    %1072 = vector.multi_reduction <add>, %1071, %cst_103 [1] : vector<8x64xf32> to vector<8xf32>
    %1073 = vector.shape_cast %1072 : vector<8xf32> to vector<8x1xf32>
    %c12_i32_104 = arith.constant 12 : i32
    %1074 = vector.broadcast %c12_i32_104 : i32 to vector<8x64xi32>
    %1075 = arith.cmpi eq, %899, %1074 : vector<8x64xi32>
    %cst_105 = arith.constant 0.000000e+00 : f32
    %1076 = vector.broadcast %cst_105 : f32 to vector<8x64xf32>
    %1077 = arith.select %1075, %0, %1076 : vector<8x64xi1>, vector<8x64xf32>
    %cst_106 = arith.constant dense<0.000000e+00> : vector<8xf32>
    %1078 = vector.multi_reduction <add>, %1077, %cst_106 [1] : vector<8x64xf32> to vector<8xf32>
    %1079 = vector.shape_cast %1078 : vector<8xf32> to vector<8x1xf32>
    %1080 = arith.mulf %1079, %1073 : vector<8x1xf32>
    %c0_107 = arith.constant 0 : index
    %c12 = arith.constant 12 : index
    %1081 = vector.load %arg4[%c0_107, %c12] : memref<8x32xf32, #tpu.memory_space<vmem>>, vector<8x1xf32>
    tpu.vector_store %arg4[%c0_107, %c12], %1080 {strides = array<i32>} : memref<8x32xf32, #tpu.memory_space<vmem>>, vector<8x1xf32>,
    %c13_i32_108 = arith.constant 13 : i32
    %1082 = vector.broadcast %c13_i32_108 : i32 to vector<8x64xi32>
    %1083 = arith.cmpi eq, %723, %1082 : vector<8x64xi32>
    %cst_109 = arith.constant 0.000000e+00 : f32
    %1084 = vector.broadcast %cst_109 : f32 to vector<8x64xf32>
    %1085 = arith.select %1083, %11, %1084 : vector<8x64xi1>, vector<8x64xf32>
    %cst_110 = arith.constant dense<0.000000e+00> : vector<8xf32>
    %1086 = vector.multi_reduction <add>, %1085, %cst_110 [1] : vector<8x64xf32> to vector<8xf32>
    %1087 = vector.shape_cast %1086 : vector<8xf32> to vector<8x1xf32>
    %c13_i32_111 = arith.constant 13 : i32
    %1088 = vector.broadcast %c13_i32_111 : i32 to vector<8x64xi32>
    %1089 = arith.cmpi eq, %899, %1088 : vector<8x64xi32>
    %cst_112 = arith.constant 0.000000e+00 : f32
    %1090 = vector.broadcast %cst_112 : f32 to vector<8x64xf32>
    %1091 = arith.select %1089, %0, %1090 : vector<8x64xi1>, vector<8x64xf32>
    %cst_113 = arith.constant dense<0.000000e+00> : vector<8xf32>
    %1092 = vector.multi_reduction <add>, %1091, %cst_113 [1] : vector<8x64xf32> to vector<8xf32>
    %1093 = vector.shape_cast %1092 : vector<8xf32> to vector<8x1xf32>
    %1094 = arith.mulf %1093, %1087 : vector<8x1xf32>
    %c0_114 = arith.constant 0 : index
    %c13 = arith.constant 13 : index
    %1095 = vector.load %arg4[%c0_114, %c13] : memref<8x32xf32, #tpu.memory_space<vmem>>, vector<8x1xf32>
    tpu.vector_store %arg4[%c0_114, %c13], %1094 {strides = array<i32>} : memref<8x32xf32, #tpu.memory_space<vmem>>, vector<8x1xf32>,
    %c14_i32_115 = arith.constant 14 : i32
    %1096 = vector.broadcast %c14_i32_115 : i32 to vector<8x64xi32>
    %1097 = arith.cmpi eq, %723, %1096 : vector<8x64xi32>
    %cst_116 = arith.constant 0.000000e+00 : f32
    %1098 = vector.broadcast %cst_116 : f32 to vector<8x64xf32>
    %1099 = arith.select %1097, %11, %1098 : vector<8x64xi1>, vector<8x64xf32>
    %cst_117 = arith.constant dense<0.000000e+00> : vector<8xf32>
    %1100 = vector.multi_reduction <add>, %1099, %cst_117 [1] : vector<8x64xf32> to vector<8xf32>
    %1101 = vector.shape_cast %1100 : vector<8xf32> to vector<8x1xf32>
    %c14_i32_118 = arith.constant 14 : i32
    %1102 = vector.broadcast %c14_i32_118 : i32 to vector<8x64xi32>
    %1103 = arith.cmpi eq, %899, %1102 : vector<8x64xi32>
    %cst_119 = arith.constant 0.000000e+00 : f32
    %1104 = vector.broadcast %cst_119 : f32 to vector<8x64xf32>
    %1105 = arith.select %1103, %0, %1104 : vector<8x64xi1>, vector<8x64xf32>
    %cst_120 = arith.constant dense<0.000000e+00> : vector<8xf32>
    %1106 = vector.multi_reduction <add>, %1105, %cst_120 [1] : vector<8x64xf32> to vector<8xf32>
    %1107 = vector.shape_cast %1106 : vector<8xf32> to vector<8x1xf32>
    %1108 = arith.mulf %1107, %1101 : vector<8x1xf32>
    %c0_121 = arith.constant 0 : index
    %c14 = arith.constant 14 : index
    %1109 = vector.load %arg4[%c0_121, %c14] : memref<8x32xf32, #tpu.memory_space<vmem>>, vector<8x1xf32>
    tpu.vector_store %arg4[%c0_121, %c14], %1108 {strides = array<i32>} : memref<8x32xf32, #tpu.memory_space<vmem>>, vector<8x1xf32>,
    %c15_i32_122 = arith.constant 15 : i32
    %1110 = vector.broadcast %c15_i32_122 : i32 to vector<8x64xi32>
    %1111 = arith.cmpi eq, %723, %1110 : vector<8x64xi32>
    %cst_123 = arith.constant 0.000000e+00 : f32
    %1112 = vector.broadcast %cst_123 : f32 to vector<8x64xf32>
    %1113 = arith.select %1111, %11, %1112 : vector<8x64xi1>, vector<8x64xf32>
    %cst_124 = arith.constant dense<0.000000e+00> : vector<8xf32>
    %1114 = vector.multi_reduction <add>, %1113, %cst_124 [1] : vector<8x64xf32> to vector<8xf32>
    %1115 = vector.shape_cast %1114 : vector<8xf32> to vector<8x1xf32>
    %c15_i32_125 = arith.constant 15 : i32
    %1116 = vector.broadcast %c15_i32_125 : i32 to vector<8x64xi32>
    %1117 = arith.cmpi eq, %899, %1116 : vector<8x64xi32>
    %cst_126 = arith.constant 0.000000e+00 : f32
    %1118 = vector.broadcast %cst_126 : f32 to vector<8x64xf32>
    %1119 = arith.select %1117, %0, %1118 : vector<8x64xi1>, vector<8x64xf32>
    %cst_127 = arith.constant dense<0.000000e+00> : vector<8xf32>
    %1120 = vector.multi_reduction <add>, %1119, %cst_127 [1] : vector<8x64xf32> to vector<8xf32>
    %1121 = vector.shape_cast %1120 : vector<8xf32> to vector<8x1xf32>
    %1122 = arith.mulf %1121, %1115 : vector<8x1xf32>
    %c0_128 = arith.constant 0 : index
    %c15 = arith.constant 15 : index
    %1123 = vector.load %arg4[%c0_128, %c15] : memref<8x32xf32, #tpu.memory_space<vmem>>, vector<8x1xf32>
    tpu.vector_store %arg4[%c0_128, %c15], %1122 {strides = array<i32>} : memref<8x32xf32, #tpu.memory_space<vmem>>, vector<8x1xf32>,
    %c16_i32_129 = arith.constant 16 : i32
    %1124 = vector.broadcast %c16_i32_129 : i32 to vector<8x64xi32>
    %1125 = arith.cmpi eq, %723, %1124 : vector<8x64xi32>
    %cst_130 = arith.constant 0.000000e+00 : f32
    %1126 = vector.broadcast %cst_130 : f32 to vector<8x64xf32>
    %1127 = arith.select %1125, %11, %1126 : vector<8x64xi1>, vector<8x64xf32>
    %cst_131 = arith.constant dense<0.000000e+00> : vector<8xf32>
    %1128 = vector.multi_reduction <add>, %1127, %cst_131 [1] : vector<8x64xf32> to vector<8xf32>
    %1129 = vector.shape_cast %1128 : vector<8xf32> to vector<8x1xf32>
    %c16_i32_132 = arith.constant 16 : i32
    %1130 = vector.broadcast %c16_i32_132 : i32 to vector<8x64xi32>
    %1131 = arith.cmpi eq, %899, %1130 : vector<8x64xi32>
    %cst_133 = arith.constant 0.000000e+00 : f32
    %1132 = vector.broadcast %cst_133 : f32 to vector<8x64xf32>
    %1133 = arith.select %1131, %0, %1132 : vector<8x64xi1>, vector<8x64xf32>
    %cst_134 = arith.constant dense<0.000000e+00> : vector<8xf32>
    %1134 = vector.multi_reduction <add>, %1133, %cst_134 [1] : vector<8x64xf32> to vector<8xf32>
    %1135 = vector.shape_cast %1134 : vector<8xf32> to vector<8x1xf32>
    %1136 = arith.mulf %1135, %1129 : vector<8x1xf32>
    %c0_135 = arith.constant 0 : index
    %c16 = arith.constant 16 : index
    %1137 = vector.load %arg4[%c0_135, %c16] : memref<8x32xf32, #tpu.memory_space<vmem>>, vector<8x1xf32>
    tpu.vector_store %arg4[%c0_135, %c16], %1136 {strides = array<i32>} : memref<8x32xf32, #tpu.memory_space<vmem>>, vector<8x1xf32>,
    %c17_i32_136 = arith.constant 17 : i32
    %1138 = vector.broadcast %c17_i32_136 : i32 to vector<8x64xi32>
    %1139 = arith.cmpi eq, %723, %1138 : vector<8x64xi32>
    %cst_137 = arith.constant 0.000000e+00 : f32
    %1140 = vector.broadcast %cst_137 : f32 to vector<8x64xf32>
    %1141 = arith.select %1139, %11, %1140 : vector<8x64xi1>, vector<8x64xf32>
    %cst_138 = arith.constant dense<0.000000e+00> : vector<8xf32>
    %1142 = vector.multi_reduction <add>, %1141, %cst_138 [1] : vector<8x64xf32> to vector<8xf32>
    %1143 = vector.shape_cast %1142 : vector<8xf32> to vector<8x1xf32>
    %c17_i32_139 = arith.constant 17 : i32
    %1144 = vector.broadcast %c17_i32_139 : i32 to vector<8x64xi32>
    %1145 = arith.cmpi eq, %899, %1144 : vector<8x64xi32>
    %cst_140 = arith.constant 0.000000e+00 : f32
    %1146 = vector.broadcast %cst_140 : f32 to vector<8x64xf32>
    %1147 = arith.select %1145, %0, %1146 : vector<8x64xi1>, vector<8x64xf32>
    %cst_141 = arith.constant dense<0.000000e+00> : vector<8xf32>
    %1148 = vector.multi_reduction <add>, %1147, %cst_141 [1] : vector<8x64xf32> to vector<8xf32>
    %1149 = vector.shape_cast %1148 : vector<8xf32> to vector<8x1xf32>
    %1150 = arith.mulf %1149, %1143 : vector<8x1xf32>
    %c0_142 = arith.constant 0 : index
    %c17 = arith.constant 17 : index
    %1151 = vector.load %arg4[%c0_142, %c17] : memref<8x32xf32, #tpu.memory_space<vmem>>, vector<8x1xf32>
    tpu.vector_store %arg4[%c0_142, %c17], %1150 {strides = array<i32>} : memref<8x32xf32, #tpu.memory_space<vmem>>, vector<8x1xf32>,
    %c18_i32_143 = arith.constant 18 : i32
    %1152 = vector.broadcast %c18_i32_143 : i32 to vector<8x64xi32>
    %1153 = arith.cmpi eq, %723, %1152 : vector<8x64xi32>
    %cst_144 = arith.constant 0.000000e+00 : f32
    %1154 = vector.broadcast %cst_144 : f32 to vector<8x64xf32>
    %1155 = arith.select %1153, %11, %1154 : vector<8x64xi1>, vector<8x64xf32>
    %cst_145 = arith.constant dense<0.000000e+00> : vector<8xf32>
    %1156 = vector.multi_reduction <add>, %1155, %cst_145 [1] : vector<8x64xf32> to vector<8xf32>
    %1157 = vector.shape_cast %1156 : vector<8xf32> to vector<8x1xf32>
    %c18_i32_146 = arith.constant 18 : i32
    %1158 = vector.broadcast %c18_i32_146 : i32 to vector<8x64xi32>
    %1159 = arith.cmpi eq, %899, %1158 : vector<8x64xi32>
    %cst_147 = arith.constant 0.000000e+00 : f32
    %1160 = vector.broadcast %cst_147 : f32 to vector<8x64xf32>
    %1161 = arith.select %1159, %0, %1160 : vector<8x64xi1>, vector<8x64xf32>
    %cst_148 = arith.constant dense<0.000000e+00> : vector<8xf32>
    %1162 = vector.multi_reduction <add>, %1161, %cst_148 [1] : vector<8x64xf32> to vector<8xf32>
    %1163 = vector.shape_cast %1162 : vector<8xf32> to vector<8x1xf32>
    %1164 = arith.mulf %1163, %1157 : vector<8x1xf32>
    %c0_149 = arith.constant 0 : index
    %c18 = arith.constant 18 : index
    %1165 = vector.load %arg4[%c0_149, %c18] : memref<8x32xf32, #tpu.memory_space<vmem>>, vector<8x1xf32>
    tpu.vector_store %arg4[%c0_149, %c18], %1164 {strides = array<i32>} : memref<8x32xf32, #tpu.memory_space<vmem>>, vector<8x1xf32>,
    %c19_i32_150 = arith.constant 19 : i32
    %1166 = vector.broadcast %c19_i32_150 : i32 to vector<8x64xi32>
    %1167 = arith.cmpi eq, %723, %1166 : vector<8x64xi32>
    %cst_151 = arith.constant 0.000000e+00 : f32
    %1168 = vector.broadcast %cst_151 : f32 to vector<8x64xf32>
    %1169 = arith.select %1167, %11, %1168 : vector<8x64xi1>, vector<8x64xf32>
    %cst_152 = arith.constant dense<0.000000e+00> : vector<8xf32>
    %1170 = vector.multi_reduction <add>, %1169, %cst_152 [1] : vector<8x64xf32> to vector<8xf32>
    %1171 = vector.shape_cast %1170 : vector<8xf32> to vector<8x1xf32>
    %c19_i32_153 = arith.constant 19 : i32
    %1172 = vector.broadcast %c19_i32_153 : i32 to vector<8x64xi32>
    %1173 = arith.cmpi eq, %899, %1172 : vector<8x64xi32>
    %cst_154 = arith.constant 0.000000e+00 : f32
    %1174 = vector.broadcast %cst_154 : f32 to vector<8x64xf32>
    %1175 = arith.select %1173, %0, %1174 : vector<8x64xi1>, vector<8x64xf32>
    %cst_155 = arith.constant dense<0.000000e+00> : vector<8xf32>
    %1176 = vector.multi_reduction <add>, %1175, %cst_155 [1] : vector<8x64xf32> to vector<8xf32>
    %1177 = vector.shape_cast %1176 : vector<8xf32> to vector<8x1xf32>
    %1178 = arith.mulf %1177, %1171 : vector<8x1xf32>
    %c0_156 = arith.constant 0 : index
    %c19 = arith.constant 19 : index
    %1179 = vector.load %arg4[%c0_156, %c19] : memref<8x32xf32, #tpu.memory_space<vmem>>, vector<8x1xf32>
    tpu.vector_store %arg4[%c0_156, %c19], %1178 {strides = array<i32>} : memref<8x32xf32, #tpu.memory_space<vmem>>, vector<8x1xf32>,
    %c20_i32_157 = arith.constant 20 : i32
    %1180 = vector.broadcast %c20_i32_157 : i32 to vector<8x64xi32>
    %1181 = arith.cmpi eq, %723, %1180 : vector<8x64xi32>
    %cst_158 = arith.constant 0.000000e+00 : f32
    %1182 = vector.broadcast %cst_158 : f32 to vector<8x64xf32>
    %1183 = arith.select %1181, %11, %1182 : vector<8x64xi1>, vector<8x64xf32>
    %cst_159 = arith.constant dense<0.000000e+00> : vector<8xf32>
    %1184 = vector.multi_reduction <add>, %1183, %cst_159 [1] : vector<8x64xf32> to vector<8xf32>
    %1185 = vector.shape_cast %1184 : vector<8xf32> to vector<8x1xf32>
    %c20_i32_160 = arith.constant 20 : i32
    %1186 = vector.broadcast %c20_i32_160 : i32 to vector<8x64xi32>
    %1187 = arith.cmpi eq, %899, %1186 : vector<8x64xi32>
    %cst_161 = arith.constant 0.000000e+00 : f32
    %1188 = vector.broadcast %cst_161 : f32 to vector<8x64xf32>
    %1189 = arith.select %1187, %0, %1188 : vector<8x64xi1>, vector<8x64xf32>
    %cst_162 = arith.constant dense<0.000000e+00> : vector<8xf32>
    %1190 = vector.multi_reduction <add>, %1189, %cst_162 [1] : vector<8x64xf32> to vector<8xf32>
    %1191 = vector.shape_cast %1190 : vector<8xf32> to vector<8x1xf32>
    %1192 = arith.mulf %1191, %1185 : vector<8x1xf32>
    %c0_163 = arith.constant 0 : index
    %c20 = arith.constant 20 : index
    %1193 = vector.load %arg4[%c0_163, %c20] : memref<8x32xf32, #tpu.memory_space<vmem>>, vector<8x1xf32>
    tpu.vector_store %arg4[%c0_163, %c20], %1192 {strides = array<i32>} : memref<8x32xf32, #tpu.memory_space<vmem>>, vector<8x1xf32>,
    %c21_i32_164 = arith.constant 21 : i32
    %1194 = vector.broadcast %c21_i32_164 : i32 to vector<8x64xi32>
    %1195 = arith.cmpi eq, %723, %1194 : vector<8x64xi32>
    %cst_165 = arith.constant 0.000000e+00 : f32
    %1196 = vector.broadcast %cst_165 : f32 to vector<8x64xf32>
    %1197 = arith.select %1195, %11, %1196 : vector<8x64xi1>, vector<8x64xf32>
    %cst_166 = arith.constant dense<0.000000e+00> : vector<8xf32>
    %1198 = vector.multi_reduction <add>, %1197, %cst_166 [1] : vector<8x64xf32> to vector<8xf32>
    %1199 = vector.shape_cast %1198 : vector<8xf32> to vector<8x1xf32>
    %c21_i32_167 = arith.constant 21 : i32
    %1200 = vector.broadcast %c21_i32_167 : i32 to vector<8x64xi32>
    %1201 = arith.cmpi eq, %899, %1200 : vector<8x64xi32>
    %cst_168 = arith.constant 0.000000e+00 : f32
    %1202 = vector.broadcast %cst_168 : f32 to vector<8x64xf32>
    %1203 = arith.select %1201, %0, %1202 : vector<8x64xi1>, vector<8x64xf32>
    %cst_169 = arith.constant dense<0.000000e+00> : vector<8xf32>
    %1204 = vector.multi_reduction <add>, %1203, %cst_169 [1] : vector<8x64xf32> to vector<8xf32>
    %1205 = vector.shape_cast %1204 : vector<8xf32> to vector<8x1xf32>
    %1206 = arith.mulf %1205, %1199 : vector<8x1xf32>
    %c0_170 = arith.constant 0 : index
    %c21 = arith.constant 21 : index
    %1207 = vector.load %arg4[%c0_170, %c21] : memref<8x32xf32, #tpu.memory_space<vmem>>, vector<8x1xf32>
    tpu.vector_store %arg4[%c0_170, %c21], %1206 {strides = array<i32>} : memref<8x32xf32, #tpu.memory_space<vmem>>, vector<8x1xf32>,
    %c22_i32_171 = arith.constant 22 : i32
    %1208 = vector.broadcast %c22_i32_171 : i32 to vector<8x64xi32>
    %1209 = arith.cmpi eq, %723, %1208 : vector<8x64xi32>
    %cst_172 = arith.constant 0.000000e+00 : f32
    %1210 = vector.broadcast %cst_172 : f32 to vector<8x64xf32>
    %1211 = arith.select %1209, %11, %1210 : vector<8x64xi1>, vector<8x64xf32>
    %cst_173 = arith.constant dense<0.000000e+00> : vector<8xf32>
    %1212 = vector.multi_reduction <add>, %1211, %cst_173 [1] : vector<8x64xf32> to vector<8xf32>
    %1213 = vector.shape_cast %1212 : vector<8xf32> to vector<8x1xf32>
    %c22_i32_174 = arith.constant 22 : i32
    %1214 = vector.broadcast %c22_i32_174 : i32 to vector<8x64xi32>
    %1215 = arith.cmpi eq, %899, %1214 : vector<8x64xi32>
    %cst_175 = arith.constant 0.000000e+00 : f32
    %1216 = vector.broadcast %cst_175 : f32 to vector<8x64xf32>
    %1217 = arith.select %1215, %0, %1216 : vector<8x64xi1>, vector<8x64xf32>
    %cst_176 = arith.constant dense<0.000000e+00> : vector<8xf32>
    %1218 = vector.multi_reduction <add>, %1217, %cst_176 [1] : vector<8x64xf32> to vector<8xf32>
    %1219 = vector.shape_cast %1218 : vector<8xf32> to vector<8x1xf32>
    %1220 = arith.mulf %1219, %1213 : vector<8x1xf32>
    %c0_177 = arith.constant 0 : index
    %c22 = arith.constant 22 : index
    %1221 = vector.load %arg4[%c0_177, %c22] : memref<8x32xf32, #tpu.memory_space<vmem>>, vector<8x1xf32>
    tpu.vector_store %arg4[%c0_177, %c22], %1220 {strides = array<i32>} : memref<8x32xf32, #tpu.memory_space<vmem>>, vector<8x1xf32>,
    %c23_i32_178 = arith.constant 23 : i32
    %1222 = vector.broadcast %c23_i32_178 : i32 to vector<8x64xi32>
    %1223 = arith.cmpi eq, %723, %1222 : vector<8x64xi32>
    %cst_179 = arith.constant 0.000000e+00 : f32
    %1224 = vector.broadcast %cst_179 : f32 to vector<8x64xf32>
    %1225 = arith.select %1223, %11, %1224 : vector<8x64xi1>, vector<8x64xf32>
    %cst_180 = arith.constant dense<0.000000e+00> : vector<8xf32>
    %1226 = vector.multi_reduction <add>, %1225, %cst_180 [1] : vector<8x64xf32> to vector<8xf32>
    %1227 = vector.shape_cast %1226 : vector<8xf32> to vector<8x1xf32>
    %c23_i32_181 = arith.constant 23 : i32
    %1228 = vector.broadcast %c23_i32_181 : i32 to vector<8x64xi32>
    %1229 = arith.cmpi eq, %899, %1228 : vector<8x64xi32>
    %cst_182 = arith.constant 0.000000e+00 : f32
    %1230 = vector.broadcast %cst_182 : f32 to vector<8x64xf32>
    %1231 = arith.select %1229, %0, %1230 : vector<8x64xi1>, vector<8x64xf32>
    %cst_183 = arith.constant dense<0.000000e+00> : vector<8xf32>
    %1232 = vector.multi_reduction <add>, %1231, %cst_183 [1] : vector<8x64xf32> to vector<8xf32>
    %1233 = vector.shape_cast %1232 : vector<8xf32> to vector<8x1xf32>
    %1234 = arith.mulf %1233, %1227 : vector<8x1xf32>
    %c0_184 = arith.constant 0 : index
    %c23 = arith.constant 23 : index
    %1235 = vector.load %arg4[%c0_184, %c23] : memref<8x32xf32, #tpu.memory_space<vmem>>, vector<8x1xf32>
    tpu.vector_store %arg4[%c0_184, %c23], %1234 {strides = array<i32>} : memref<8x32xf32, #tpu.memory_space<vmem>>, vector<8x1xf32>,
    %c24_i32_185 = arith.constant 24 : i32
    %1236 = vector.broadcast %c24_i32_185 : i32 to vector<8x64xi32>
    %1237 = arith.cmpi eq, %723, %1236 : vector<8x64xi32>
    %cst_186 = arith.constant 0.000000e+00 : f32
    %1238 = vector.broadcast %cst_186 : f32 to vector<8x64xf32>
    %1239 = arith.select %1237, %11, %1238 : vector<8x64xi1>, vector<8x64xf32>
    %cst_187 = arith.constant dense<0.000000e+00> : vector<8xf32>
    %1240 = vector.multi_reduction <add>, %1239, %cst_187 [1] : vector<8x64xf32> to vector<8xf32>
    %1241 = vector.shape_cast %1240 : vector<8xf32> to vector<8x1xf32>
    %c24_i32_188 = arith.constant 24 : i32
    %1242 = vector.broadcast %c24_i32_188 : i32 to vector<8x64xi32>
    %1243 = arith.cmpi eq, %899, %1242 : vector<8x64xi32>
    %cst_189 = arith.constant 0.000000e+00 : f32
    %1244 = vector.broadcast %cst_189 : f32 to vector<8x64xf32>
    %1245 = arith.select %1243, %0, %1244 : vector<8x64xi1>, vector<8x64xf32>
    %cst_190 = arith.constant dense<0.000000e+00> : vector<8xf32>
    %1246 = vector.multi_reduction <add>, %1245, %cst_190 [1] : vector<8x64xf32> to vector<8xf32>
    %1247 = vector.shape_cast %1246 : vector<8xf32> to vector<8x1xf32>
    %1248 = arith.mulf %1247, %1241 : vector<8x1xf32>
    %c0_191 = arith.constant 0 : index
    %c24 = arith.constant 24 : index
    %1249 = vector.load %arg4[%c0_191, %c24] : memref<8x32xf32, #tpu.memory_space<vmem>>, vector<8x1xf32>
    tpu.vector_store %arg4[%c0_191, %c24], %1248 {strides = array<i32>} : memref<8x32xf32, #tpu.memory_space<vmem>>, vector<8x1xf32>,
    %c25_i32_192 = arith.constant 25 : i32
    %1250 = vector.broadcast %c25_i32_192 : i32 to vector<8x64xi32>
    %1251 = arith.cmpi eq, %723, %1250 : vector<8x64xi32>
    %cst_193 = arith.constant 0.000000e+00 : f32
    %1252 = vector.broadcast %cst_193 : f32 to vector<8x64xf32>
    %1253 = arith.select %1251, %11, %1252 : vector<8x64xi1>, vector<8x64xf32>
    %cst_194 = arith.constant dense<0.000000e+00> : vector<8xf32>
    %1254 = vector.multi_reduction <add>, %1253, %cst_194 [1] : vector<8x64xf32> to vector<8xf32>
    %1255 = vector.shape_cast %1254 : vector<8xf32> to vector<8x1xf32>
    %c25_i32_195 = arith.constant 25 : i32
    %1256 = vector.broadcast %c25_i32_195 : i32 to vector<8x64xi32>
    %1257 = arith.cmpi eq, %899, %1256 : vector<8x64xi32>
    %cst_196 = arith.constant 0.000000e+00 : f32
    %1258 = vector.broadcast %cst_196 : f32 to vector<8x64xf32>
    %1259 = arith.select %1257, %0, %1258 : vector<8x64xi1>, vector<8x64xf32>
    %cst_197 = arith.constant dense<0.000000e+00> : vector<8xf32>
    %1260 = vector.multi_reduction <add>, %1259, %cst_197 [1] : vector<8x64xf32> to vector<8xf32>
    %1261 = vector.shape_cast %1260 : vector<8xf32> to vector<8x1xf32>
    %1262 = arith.mulf %1261, %1255 : vector<8x1xf32>
    %c0_198 = arith.constant 0 : index
    %c25 = arith.constant 25 : index
    %1263 = vector.load %arg4[%c0_198, %c25] : memref<8x32xf32, #tpu.memory_space<vmem>>, vector<8x1xf32>
    tpu.vector_store %arg4[%c0_198, %c25], %1262 {strides = array<i32>} : memref<8x32xf32, #tpu.memory_space<vmem>>, vector<8x1xf32>,
    %c26_i32_199 = arith.constant 26 : i32
    %1264 = vector.broadcast %c26_i32_199 : i32 to vector<8x64xi32>
    %1265 = arith.cmpi eq, %723, %1264 : vector<8x64xi32>
    %cst_200 = arith.constant 0.000000e+00 : f32
    %1266 = vector.broadcast %cst_200 : f32 to vector<8x64xf32>
    %1267 = arith.select %1265, %11, %1266 : vector<8x64xi1>, vector<8x64xf32>
    %cst_201 = arith.constant dense<0.000000e+00> : vector<8xf32>
    %1268 = vector.multi_reduction <add>, %1267, %cst_201 [1] : vector<8x64xf32> to vector<8xf32>
    %1269 = vector.shape_cast %1268 : vector<8xf32> to vector<8x1xf32>
    %c26_i32_202 = arith.constant 26 : i32
    %1270 = vector.broadcast %c26_i32_202 : i32 to vector<8x64xi32>
    %1271 = arith.cmpi eq, %899, %1270 : vector<8x64xi32>
    %cst_203 = arith.constant 0.000000e+00 : f32
    %1272 = vector.broadcast %cst_203 : f32 to vector<8x64xf32>
    %1273 = arith.select %1271, %0, %1272 : vector<8x64xi1>, vector<8x64xf32>
    %cst_204 = arith.constant dense<0.000000e+00> : vector<8xf32>
    %1274 = vector.multi_reduction <add>, %1273, %cst_204 [1] : vector<8x64xf32> to vector<8xf32>
    %1275 = vector.shape_cast %1274 : vector<8xf32> to vector<8x1xf32>
    %1276 = arith.mulf %1275, %1269 : vector<8x1xf32>
    %c0_205 = arith.constant 0 : index
    %c26 = arith.constant 26 : index
    %1277 = vector.load %arg4[%c0_205, %c26] : memref<8x32xf32, #tpu.memory_space<vmem>>, vector<8x1xf32>
    tpu.vector_store %arg4[%c0_205, %c26], %1276 {strides = array<i32>} : memref<8x32xf32, #tpu.memory_space<vmem>>, vector<8x1xf32>,
    %c27_i32_206 = arith.constant 27 : i32
    %1278 = vector.broadcast %c27_i32_206 : i32 to vector<8x64xi32>
    %1279 = arith.cmpi eq, %723, %1278 : vector<8x64xi32>
    %cst_207 = arith.constant 0.000000e+00 : f32
    %1280 = vector.broadcast %cst_207 : f32 to vector<8x64xf32>
    %1281 = arith.select %1279, %11, %1280 : vector<8x64xi1>, vector<8x64xf32>
    %cst_208 = arith.constant dense<0.000000e+00> : vector<8xf32>
    %1282 = vector.multi_reduction <add>, %1281, %cst_208 [1] : vector<8x64xf32> to vector<8xf32>
    %1283 = vector.shape_cast %1282 : vector<8xf32> to vector<8x1xf32>
    %c27_i32_209 = arith.constant 27 : i32
    %1284 = vector.broadcast %c27_i32_209 : i32 to vector<8x64xi32>
    %1285 = arith.cmpi eq, %899, %1284 : vector<8x64xi32>
    %cst_210 = arith.constant 0.000000e+00 : f32
    %1286 = vector.broadcast %cst_210 : f32 to vector<8x64xf32>
    %1287 = arith.select %1285, %0, %1286 : vector<8x64xi1>, vector<8x64xf32>
    %cst_211 = arith.constant dense<0.000000e+00> : vector<8xf32>
    %1288 = vector.multi_reduction <add>, %1287, %cst_211 [1] : vector<8x64xf32> to vector<8xf32>
    %1289 = vector.shape_cast %1288 : vector<8xf32> to vector<8x1xf32>
    %1290 = arith.mulf %1289, %1283 : vector<8x1xf32>
    %c0_212 = arith.constant 0 : index
    %c27 = arith.constant 27 : index
    %1291 = vector.load %arg4[%c0_212, %c27] : memref<8x32xf32, #tpu.memory_space<vmem>>, vector<8x1xf32>
    tpu.vector_store %arg4[%c0_212, %c27], %1290 {strides = array<i32>} : memref<8x32xf32, #tpu.memory_space<vmem>>, vector<8x1xf32>,
    %c28_i32_213 = arith.constant 28 : i32
    %1292 = vector.broadcast %c28_i32_213 : i32 to vector<8x64xi32>
    %1293 = arith.cmpi eq, %723, %1292 : vector<8x64xi32>
    %cst_214 = arith.constant 0.000000e+00 : f32
    %1294 = vector.broadcast %cst_214 : f32 to vector<8x64xf32>
    %1295 = arith.select %1293, %11, %1294 : vector<8x64xi1>, vector<8x64xf32>
    %cst_215 = arith.constant dense<0.000000e+00> : vector<8xf32>
    %1296 = vector.multi_reduction <add>, %1295, %cst_215 [1] : vector<8x64xf32> to vector<8xf32>
    %1297 = vector.shape_cast %1296 : vector<8xf32> to vector<8x1xf32>
    %c28_i32_216 = arith.constant 28 : i32
    %1298 = vector.broadcast %c28_i32_216 : i32 to vector<8x64xi32>
    %1299 = arith.cmpi eq, %899, %1298 : vector<8x64xi32>
    %cst_217 = arith.constant 0.000000e+00 : f32
    %1300 = vector.broadcast %cst_217 : f32 to vector<8x64xf32>
    %1301 = arith.select %1299, %0, %1300 : vector<8x64xi1>, vector<8x64xf32>
    %cst_218 = arith.constant dense<0.000000e+00> : vector<8xf32>
    %1302 = vector.multi_reduction <add>, %1301, %cst_218 [1] : vector<8x64xf32> to vector<8xf32>
    %1303 = vector.shape_cast %1302 : vector<8xf32> to vector<8x1xf32>
    %1304 = arith.mulf %1303, %1297 : vector<8x1xf32>
    %c0_219 = arith.constant 0 : index
    %c28 = arith.constant 28 : index
    %1305 = vector.load %arg4[%c0_219, %c28] : memref<8x32xf32, #tpu.memory_space<vmem>>, vector<8x1xf32>
    tpu.vector_store %arg4[%c0_219, %c28], %1304 {strides = array<i32>} : memref<8x32xf32, #tpu.memory_space<vmem>>, vector<8x1xf32>,
    %c29_i32_220 = arith.constant 29 : i32
    %1306 = vector.broadcast %c29_i32_220 : i32 to vector<8x64xi32>
    %1307 = arith.cmpi eq, %723, %1306 : vector<8x64xi32>
    %cst_221 = arith.constant 0.000000e+00 : f32
    %1308 = vector.broadcast %cst_221 : f32 to vector<8x64xf32>
    %1309 = arith.select %1307, %11, %1308 : vector<8x64xi1>, vector<8x64xf32>
    %cst_222 = arith.constant dense<0.000000e+00> : vector<8xf32>
    %1310 = vector.multi_reduction <add>, %1309, %cst_222 [1] : vector<8x64xf32> to vector<8xf32>
    %1311 = vector.shape_cast %1310 : vector<8xf32> to vector<8x1xf32>
    %c29_i32_223 = arith.constant 29 : i32
    %1312 = vector.broadcast %c29_i32_223 : i32 to vector<8x64xi32>
    %1313 = arith.cmpi eq, %899, %1312 : vector<8x64xi32>
    %cst_224 = arith.constant 0.000000e+00 : f32
    %1314 = vector.broadcast %cst_224 : f32 to vector<8x64xf32>
    %1315 = arith.select %1313, %0, %1314 : vector<8x64xi1>, vector<8x64xf32>
    %cst_225 = arith.constant dense<0.000000e+00> : vector<8xf32>
    %1316 = vector.multi_reduction <add>, %1315, %cst_225 [1] : vector<8x64xf32> to vector<8xf32>
    %1317 = vector.shape_cast %1316 : vector<8xf32> to vector<8x1xf32>
    %1318 = arith.mulf %1317, %1311 : vector<8x1xf32>
    %c0_226 = arith.constant 0 : index
    %c29 = arith.constant 29 : index
    %1319 = vector.load %arg4[%c0_226, %c29] : memref<8x32xf32, #tpu.memory_space<vmem>>, vector<8x1xf32>
    tpu.vector_store %arg4[%c0_226, %c29], %1318 {strides = array<i32>} : memref<8x32xf32, #tpu.memory_space<vmem>>, vector<8x1xf32>,
    %c30_i32_227 = arith.constant 30 : i32
    %1320 = vector.broadcast %c30_i32_227 : i32 to vector<8x64xi32>
    %1321 = arith.cmpi eq, %723, %1320 : vector<8x64xi32>
    %cst_228 = arith.constant 0.000000e+00 : f32
    %1322 = vector.broadcast %cst_228 : f32 to vector<8x64xf32>
    %1323 = arith.select %1321, %11, %1322 : vector<8x64xi1>, vector<8x64xf32>
    %cst_229 = arith.constant dense<0.000000e+00> : vector<8xf32>
    %1324 = vector.multi_reduction <add>, %1323, %cst_229 [1] : vector<8x64xf32> to vector<8xf32>
    %1325 = vector.shape_cast %1324 : vector<8xf32> to vector<8x1xf32>
    %c30_i32_230 = arith.constant 30 : i32
    %1326 = vector.broadcast %c30_i32_230 : i32 to vector<8x64xi32>
    %1327 = arith.cmpi eq, %899, %1326 : vector<8x64xi32>
    %cst_231 = arith.constant 0.000000e+00 : f32
    %1328 = vector.broadcast %cst_231 : f32 to vector<8x64xf32>
    %1329 = arith.select %1327, %0, %1328 : vector<8x64xi1>, vector<8x64xf32>
    %cst_232 = arith.constant dense<0.000000e+00> : vector<8xf32>
    %1330 = vector.multi_reduction <add>, %1329, %cst_232 [1] : vector<8x64xf32> to vector<8xf32>
    %1331 = vector.shape_cast %1330 : vector<8xf32> to vector<8x1xf32>
    %1332 = arith.mulf %1331, %1325 : vector<8x1xf32>
    %c0_233 = arith.constant 0 : index
    %c30 = arith.constant 30 : index
    %1333 = vector.load %arg4[%c0_233, %c30] : memref<8x32xf32, #tpu.memory_space<vmem>>, vector<8x1xf32>
    tpu.vector_store %arg4[%c0_233, %c30], %1332 {strides = array<i32>} : memref<8x32xf32, #tpu.memory_space<vmem>>, vector<8x1xf32>,
    %c31_i32_234 = arith.constant 31 : i32
    %1334 = vector.broadcast %c31_i32_234 : i32 to vector<8x64xi32>
    %1335 = arith.cmpi eq, %723, %1334 : vector<8x64xi32>
    %cst_235 = arith.constant 0.000000e+00 : f32
    %1336 = vector.broadcast %cst_235 : f32 to vector<8x64xf32>
    %1337 = arith.select %1335, %11, %1336 : vector<8x64xi1>, vector<8x64xf32>
    %cst_236 = arith.constant dense<0.000000e+00> : vector<8xf32>
    %1338 = vector.multi_reduction <add>, %1337, %cst_236 [1] : vector<8x64xf32> to vector<8xf32>
    %1339 = vector.shape_cast %1338 : vector<8xf32> to vector<8x1xf32>
    %c31_i32_237 = arith.constant 31 : i32
    %1340 = vector.broadcast %c31_i32_237 : i32 to vector<8x64xi32>
    %1341 = arith.cmpi eq, %899, %1340 : vector<8x64xi32>
    %cst_238 = arith.constant 0.000000e+00 : f32
    %1342 = vector.broadcast %cst_238 : f32 to vector<8x64xf32>
    %1343 = arith.select %1341, %0, %1342 : vector<8x64xi1>, vector<8x64xf32>
    %cst_239 = arith.constant dense<0.000000e+00> : vector<8xf32>
    %1344 = vector.multi_reduction <add>, %1343, %cst_239 [1] : vector<8x64xf32> to vector<8xf32>
    %1345 = vector.shape_cast %1344 : vector<8xf32> to vector<8x1xf32>
    %1346 = arith.mulf %1345, %1339 : vector<8x1xf32>
    %c0_240 = arith.constant 0 : index
    %c31 = arith.constant 31 : index
    %1347 = vector.load %arg4[%c0_240, %c31] : memref<8x32xf32, #tpu.memory_space<vmem>>, vector<8x1xf32>
    tpu.vector_store %arg4[%c0_240, %c31], %1346 {strides = array<i32>} : memref<8x32xf32, #tpu.memory_space<vmem>>, vector<8x1xf32>,
    return
  }
  func.func @transform_0(%arg0: i32) -> (i32, i32) {
    %c0_i32 = arith.constant 0 : i32
    %c0_i32_0 = arith.constant 0 : i32
    return %arg0, %c0_i32 : i32, i32
  }
  func.func @transform_1(%arg0: i32) -> (i32, i32) {
    %c0_i32 = arith.constant 0 : i32
    %c0_i32_0 = arith.constant 0 : i32
    %c0_i32_1 = arith.constant 0 : i32
    return %c0_i32, %c0_i32_0 : i32, i32
  }
  func.func @transform_2(%arg0: i32) -> (i32, i32) {
    %c0_i32 = arith.constant 0 : i32
    %c0_i32_0 = arith.constant 0 : i32
    %c0_i32_1 = arith.constant 0 : i32
    return %c0_i32, %c0_i32_0 : i32, i32
  }
  func.func @transform_3(%arg0: i32) -> (i32, i32) {
    %c0_i32 = arith.constant 0 : i32
    %c0_i32_0 = arith.constant 0 : i32
    return %arg0, %c0_i32 : i32, i32
  }
}

</mosaic_0001>

<bundles_post_ra>
// kernel: se_block1d_forward.1
= control target key start
LH: loop header
LB: loop body
LE: loop exit
PB: predicated region body
PF: predicated region fallthrough
CT: control target
= control target key end

     0   :  { %8 = vsyncpa [#allocation3], 0  ;;  %s3465_s0 = inlined_call_operand.vmem [shape: f32[16,64], index: 0, kind: input, shape index: {}]   ;;  %s3466_s1 = inlined_call_operand.vmem [shape: f32[64,8], index: 1, kind: input, shape index: {}]   ;;  %s3467_s2 = inlined_call_operand.vmem [shape: f32[8,64], index: 2, kind: input, shape index: {}]   ;;  %s3468_s3 = inlined_call_operand.hbm [shape: f32[16,32], index: 3, kind: output, shape index: {}]  }
   0x1   :  { %10 = vsyncpa [#allocation3 + $0x1], 0  ;;  %s2086_s12 = smov 0   ;;  %s2088_s13 = smov 0  }
   0x2   :  { %s2090_s14 = smov 0   ;;  %s2092_s15 = smov 0  }
   0x3 LB: > { %s2107_s16 = sadd.s32 4294967295, %s1998_s15   ;;  %s1693_s17 = sadd.s32 4294967294, %s1998_s15   ;;  %s1998_s15 = sphi %s2092_s15, %s3600_s15   ;;  %s1994_s14 = sphi %s2090_s14, %s3599_s14   ;;  %s1990_s13 = sphi %s2088_s13, %s3598_s13   ;;  %s1986_s12 = sphi %s2086_s12, %s3597_s12  }
   0x4   : > { %s2111_s18 = sadd.s32 1, %s1998_s15   ;;  %s91_s19 = sadd.s32 1, %s1994_s14 }
   0x5   : > { %s88_s20 = ssub.s32 %s1998_s15, %s2111_s18  ;;  %p101_p0 = scmp.ne.s32.totalorder %s1994_s14, %s1990_s13 }
   0x6   : > { %p89_p1 = scmp.eq.s32.totalorder %s88_s20, 0  ;;  %p102_p2 = scmp.eq.s32.totalorder %s2107_s16, 1 }
   0x7   : > { %p107_p3 = scmp.ne.s32.totalorder %s1990_s13, %s1986_s12  ;;  %p108_p4 = scmp.eq.s32.totalorder %s1693_s17, 1 }
   0x8   : > { %s2122_s21 = scalar_select %p89_p1, %s1994_s14, %s91_s19  }
   0x9   : > { %p2124_p5 = por %p102_p2, %p101_p0  ;;  %p2128_p6 = por %p108_p4, %p107_p3 }
   0xa   : > { %p1696_p7 = scmp.ge.s32.totalorder %s1998_s15, 1  ;;  %p139_p8 = scmp.lt.s32.totalorder %s1998_s15, 3 }
   0xc   : > { %p140_p9 = pnand %p1696_p7, %p139_p8 }
   0xd   : > { %p162_p10 = scmp.lt.s32.totalorder (!%p140_p9), %s2107_s16, 1  ;;  %s159_s29 = sand.u32 (!%p140_p9), 1, %s1990_s13  }
   0xe   : > { %143 = sbr.rel (%p140_p9) target bundleno = 1253 (0x4e5), region = 32  ;;  %s1721_s5 = sshll.u32 (!%p140_p9), %s2107_s16, 3 }
  0x13   : > { %v174_v0 = vld [vmem:[%s3466_s1 + $0x38] sm:$0xff]  ;;  %v173_v1 = vld [vmem:[%s3466_s1 + $0x30] sm:$0xff]  ;;  %v172_v2 = vld [vmem:[%s3466_s1 + $0x28] sm:$0xff]  ;;  %s163_s30 = scalar_select %p162_p10, %s2107_s16, 1  ;;  %vm3469_vm0 = vcmask 523264   ;;  %vm201_vm1 = vcmask 64512  }
  0x14   : > { %187 = vmatpush.msra.mxu0 %v174_v0  ;;  %v171_v3 = vld [vmem:[%s3466_s1 + $0x20] sm:$0xff]  ;;  %v170_v4 = vld [vmem:[%s3466_s1 + $0x18] sm:$0xff]  ;;  %v169_v5 = vld [vmem:[%s3466_s1 + $0x10] sm:$0xff]  ;;  %v2000_v12 = vmov 4   ;;  %v2001_v13 = vmov 2   ;;  %v2002_v14 = vmov 0  }
  0x15   : > { %s1698_s8 = sshll.u32 %s163_s30, 3  ;;  %v168_v6 = vld [vmem:[%s3466_s1 + $0x8] sm:$0xff]  ;;  %v167_v7 = vld [vmem:[%s3466_s1] sm:$0xff]  ;;  %1838 = vset.pattern.permute.xlu2 %v2000_v12  ;;  %1836 = vset.pattern.permute.xlu1 %v2001_v13  ;;  %v2003_v29 = vmov 5   ;;  %v2004_v30 = vmov 3   ;;  %v2005_v31 = vmov 1  }
  0x16   : > { %188 = vmatpush.msra.mxu0 %v173_v1  ;;  %s2160_s24 = scalar_lea.vmem %s3465_s0, %s1698_s8  ;;  %v200_v9 = vld [vmem:[%s3467_s2] sm:$0xff]  ;;  %1834 = vset.pattern.permute.xlu0 %v2002_v14  ;;  %v2006_v32 = vmov 7   ;;  %v2007_v33 = vmov 6   ;;  %v2008_v34 = vmov 8   ;;  %v2009_v35 = vmov 10   ;;  %s1697_s30 = sshll.u32 %s159_s29, 3 }
  0x17   : > { %v166_v8 = vld [vmem:[%s2160_s24] sm:$0xff]  ;;  %220 = vmatpush.msra.mxu1 %v200_v9  ;;  %v2010_v36 = vmov 9   ;;  %v2011_v37 = vmov 13   ;;  %v2012_v38 = vmov 12   ;;  %v2013_v39 = vmov 11   ;;  %s3367_s4 = scalar_lea.vmem [#allocation2], %s1697_s30  ;;  %s1629_s8 = scalar_lea.hbm %s3468_s3, %s1721_s5 }
  0x18   : > { %189 = vmatpush.msra.mxu0 %v172_v2  ;;  %v2014_v40 = vmov 18   ;;  %v2015_v41 = vmov 15   ;;  %v2016_v42 = vmov 14   ;;  %v2017_v43 = vmov 23   ;;  %s1631_s9 = sshll.u32 %s3367_s4, 4  ;;  %s1633_s10 = sshll.u32 %s1629_s8, 4  ;;  %s1632_s9 = int_to_ptr.vmem [resolvable:$true] %s1631_s9  ;;  %s1634_s10 = int_to_ptr.hbm [resolvable:$true] %s1633_s10 }
  0x19   : > { %v2018_v44 = vmov 17   ;;  %v2019_v45 = vmov 16   ;;  %v2020_v46 = vmov 28   ;;  %v2021_v47 = vmov 20   ;;  %s1619_s16 = scalar_lea.sflag [#allocation3], %s159_s29  ;;  %s1950_s11 = sshra.s32 %s1634_s10, 4  ;;  %s1951_s11 = int_to_ptr.hbm [resolvable:$true] %s1950_s11 }
  0x1a   : > { %190 = vmatpush.msra.mxu0 %v171_v3  ;;  %v2022_v48 = vmov 19   ;;  %v2023_v49 = vmov 33   ;;  %v2024_v50 = vmov 22   ;;  %v2025_v51 = vmov 21   ;;  %s1952_s17 = scalar_lea.hbm %s1951_s11, 8  ;;  %p1957_p0 = scmp.lt.s32.totalorder %s1951_s11, %s3468_s3 }
  0x1b   : > { %v2026_v52 = vmov 38   ;;  %v2027_v53 = vmov 25   ;;  %v2028_v54 = vmov 24   ;;  %v2029_v55 = vmov 43   ;;  %p1953_p11 = scmp.ne.s32.totalorder %s1951_s11, %s1952_s17 }
  0x1c   : > { %191 = vmatpush.msra.mxu0 %v170_v4  ;;  %v2030_v57 = vmov 27   ;;  %v2031_v58 = vmov 26   ;;  %v2032_v59 = vmov 48   ;;  %v2033_v61 = vmov 30  }
  0x1d   : > { %v2034_v62 = vmov 29   ;;  %v2035_v63 = vmov 53   ;;  %v2036_v1 = vmov 32   ;;  %v2037_v2 = vmov 31   ;;  %p1954_p12 = pnand %p1953_p11, %p2124_p5 }
  0x1e   : > { %192 = vmatpush.msra.mxu0 %v169_v5  ;;  %v2038_v3 = vmov 58  }
  0x1f   : > { %p1955_p13 = pneg %p1954_p12 }
  0x20   : > { %193 = vmatpush.msra.mxu0 %v168_v6  ;;  %v2039_v6 = vmov 35  }
  0x22   : > { %194 = vmatpush.msra.mxu0 %v167_v7  ;;  %v2040_v7 = vmov 34  }
  0x23   : > { %1699 = vmatmul.msk.f32.vlgmr.msra.gmra.mxu0 %vm3469_vm0, %v166_v8  ;;  %v2041_v8 = vmov 63  }
  0xa0   : > { %v196_v10 = vpop.f32.mrf.mxu0 }
  0xa1   : > { %v199_v11 = vmax.f32 %v196_v10, 0.0 }
  0xa3   : > { %1700 = vmatmul.msk.f32.vlgmr.msra.gmra.mxu1 %vm201_vm1, %v199_v11  ;;  %v2042_v11 = vmov 37  }
 0x120   : > { %v222_v15 = vpop.f32.mrf.mxu1 }
 0x121   : > { %v1701_v16 = vmul.f32 -1.442695, %v222_v15  ;;  %v2043_v15 = vmov 36  }
 0x123   : > { %1931 = vpow2.f32 %v1701_v16 }
 0x129   : > { %v1932_v17 = vpop.eup %1931 }
 0x12a   : > { %v228_v18 = vadd.f32 1.0, %v1932_v17 }
 0x12c   : > { %1933 = vrcp.f32 %v228_v18  ;;  %v240_v22 = vand.u32 2147483648, %v228_v18  ;;  %v238_v24 = vand.u32 2147483647, %v228_v18  ;;  %vm234_vm3 = vweird.f32 %v228_v18 }
 0x12e   : > { %v241_v26 = vor.u32 1.1754944e-38, %v240_v22  ;;  %vm239_vm5 = vcmp.eq.f32.partialorder %v238_v24, 8.507059e+37  ;;  %v2046_v24 = vmov 42  }
 0x132   : > { %v1934_v19 = vpop.eup %1933 }
 0x133   : > { %v230_v20 = vmul.f32 %v1934_v19, %v228_v18  ;;  %vm235_vm2 = vweird.f32 %v1934_v19 }
 0x134   : > { %vm236_vm4 = vmor %vm234_vm3, %vm235_vm2 }
 0x135   : > { %v231_v21 = vsub.f32 1.0, %v230_v20  ;;  %v2045_v20 = vmov 39  }
 0x137   : > { %v232_v23 = vmul.f32 %v1934_v19, %v231_v21 }
 0x139   : > { %v233_v25 = vadd.f32 %v1934_v19, %v232_v23 }
 0x13b   : > { %v237_v27 = vsel %vm236_vm4, %v1934_v19, %v233_v25  ;;  %v2044_v19 = vmov 40   ;;  %v244_v25 = vlaneseq }
 0x13c   : > { %v2173_v28 = vsel %vm239_vm5, %v241_v26, %v237_v27 }
 0x13d   : > { %288 = vperm.xlu2 %1838, %v2173_v28   ;;  %268 = vperm.xlu1 %1836, %v2173_v28   ;;  %v2280_v27 = vand.u32 127, %v244_v25 }
 0x13e   : > { %248 = vperm.xlu0 %1834, %v2173_v28  }
 0x13f   : > { %vm293_vm6 = vcmp.gt.s32.totalorder %v2280_v27, 4  ;;  %vm304_vm8 = vcmp.gt.s32.totalorder %v2280_v27, 5  ;;  %vm253_vm10 = vcmp.gt.s32.totalorder %v2280_v27, 0  ;;  %vm326_vm13 = vcmp.gt.s32.totalorder %v2280_v27, 7 }
 0x140   : > { %vm273_vm2 = vcmp.gt.s32.totalorder %v2280_v27, 2 }
 0x145   : > { %1839 = vset.pattern.permute.xlu2 %v2003_v29  ;;  %1837 = vset.pattern.permute.xlu1 %v2004_v30 }
 0x146   : > { %1835 = vset.pattern.permute.xlu0 %v2005_v31  ;;  %299 = vperm.xlu2 %1839, %v2173_v28  }
 0x147   : > { %278 = vperm.xlu1 %1837, %v2173_v28   ;;  %258 = vperm.xlu0 %1835, %v2173_v28  }
 0x14e   : > { %1841 = vset.pattern.permute.xlu2 %v2006_v32 }
 0x14f   : > { %1840 = vset.pattern.permute.xlu1 %v2007_v33  ;;  %1842 = vset.pattern.permute.xlu0 %v2008_v34 }
 0x150   : > { %321 = vperm.xlu2 %1841, %v2173_v28   ;;  %310 = vperm.xlu1 %1840, %v2173_v28  }
 0x151   : > { %332 = vperm.xlu0 %1842, %v2173_v28  }
 0x158   : > { %1844 = vset.pattern.permute.xlu2 %v2009_v35  ;;  %1843 = vset.pattern.permute.xlu1 %v2010_v36 }
 0x159   : > { %1847 = vset.pattern.permute.xlu0 %v2011_v37  ;;  %354 = vperm.xlu2 %1844, %v2173_v28  }
 0x15a   : > { %343 = vperm.xlu1 %1843, %v2173_v28   ;;  %387 = vperm.xlu0 %1847, %v2173_v28  }
 0x161   : > { %1846 = vset.pattern.permute.xlu2 %v2012_v38 }
 0x162   : > { %1845 = vset.pattern.permute.xlu1 %v2013_v39  ;;  %1852 = vset.pattern.permute.xlu0 %v2014_v40 }
 0x163   : > { %376 = vperm.xlu2 %1846, %v2173_v28   ;;  %365 = vperm.xlu1 %1845, %v2173_v28  }
 0x164   : > { %442 = vperm.xlu0 %1852, %v2173_v28  }
 0x16b   : > { %1849 = vset.pattern.permute.xlu2 %v2015_v41  ;;  %1848 = vset.pattern.permute.xlu1 %v2016_v42 }
 0x16c   : > { %1857 = vset.pattern.permute.xlu0 %v2017_v43  ;;  %409 = vperm.xlu2 %1849, %v2173_v28  }
 0x16d   : > { %398 = vperm.xlu1 %1848, %v2173_v28   ;;  %497 = vperm.xlu0 %1857, %v2173_v28  }
 0x174   : > { %1851 = vset.pattern.permute.xlu2 %v2018_v44 }
 0x175   : > { %1850 = vset.pattern.permute.xlu1 %v2019_v45  ;;  %1862 = vset.pattern.permute.xlu0 %v2020_v46 }
 0x176   : > { %431 = vperm.xlu2 %1851, %v2173_v28   ;;  %420 = vperm.xlu1 %1850, %v2173_v28  }
 0x177   : > { %552 = vperm.xlu0 %1862, %v2173_v28  }
 0x17e   : > { %1854 = vset.pattern.permute.xlu2 %v2021_v47  ;;  %1853 = vset.pattern.permute.xlu1 %v2022_v48 }
 0x17f   : > { %1867 = vset.pattern.permute.xlu0 %v2023_v49  ;;  %464 = vperm.xlu2 %1854, %v2173_v28  }
 0x180   : > { %453 = vperm.xlu1 %1853, %v2173_v28   ;;  %607 = vperm.xlu0 %1867, %v2173_v28  }
 0x187   : > { %1856 = vset.pattern.permute.xlu2 %v2024_v50 }
 0x188   : > { %1855 = vset.pattern.permute.xlu1 %v2025_v51  ;;  %1872 = vset.pattern.permute.xlu0 %v2026_v52  ;;  %v2048_v52 = vmov 45  }
 0x189   : > { %486 = vperm.xlu2 %1856, %v2173_v28   ;;  %475 = vperm.xlu1 %1855, %v2173_v28  }
 0x18a   : > { %662 = vperm.xlu0 %1872, %v2173_v28  }
 0x191   : > { %1859 = vset.pattern.permute.xlu2 %v2027_v53  ;;  %1858 = vset.pattern.permute.xlu1 %v2028_v54 }
 0x192   : > { %1877 = vset.pattern.permute.xlu0 %v2029_v55  ;;  %519 = vperm.xlu2 %1859, %v2173_v28  }
 0x193   : > { %508 = vperm.xlu1 %1858, %v2173_v28   ;;  %717 = vperm.xlu0 %1877, %v2173_v28  }
 0x197   : > { %v2229_v56 = vpop.permute.xlu2 %288 }
 0x198   : > { %vm292_vm7 = vcmp.eq.f32.partialorder %v2229_v56, %v2173_v28  ;;  %vm291_vm15 = vcmp.gt.f32.partialorder %v2229_v56, %v2173_v28  ;;  %v3476_v56 = vmov 0 }
 0x199   : > { %vm294_vm12 = vmand %vm292_vm7, %vm293_vm6 }
 0x19a   : > { %1861 = vset.pattern.permute.xlu2 %v2030_v57  ;;  %vm2318_vm0 = vmor %vm291_vm15, %vm294_vm12  ;;  %vm359_vm12 = vcmp.gt.s32.totalorder %v2280_v27, 10 }
 0x19b   : > { %1860 = vset.pattern.permute.xlu1 %v2031_v58  ;;  %1882 = vset.pattern.permute.xlu0 %v2032_v59  ;;  %v2049_v59 = vmov 44   ;;  %v3477_v56 = vsel %vm2318_vm0, 4294967295, %v3476_v56  ;;  %vm3490_vm0 = vcmp.gt.s32.totalorder %v2280_v27, 8 }
 0x19c   : > { %541 = vperm.xlu2 %1861, %v2173_v28   ;;  %530 = vperm.xlu1 %1860, %v2173_v28  }
 0x19d   : > { %772 = vperm.xlu0 %1882, %v2173_v28  }
 0x1a0   : > { %v2236_v60 = vpop.permute.xlu2 %299 }
 0x1a1   : > { %vm303_vm9 = vcmp.eq.f32.partialorder %v2236_v60, %v2173_v28  ;;  %vm302_vm6 = vcmp.gt.f32.partialorder %v2236_v60, %v2173_v28 }
 0x1a2   : > { %vm2301_vm1 = vmand %vm303_vm9, %vm304_vm8  ;;  %vm283_vm8 = vcmp.gt.s32.totalorder %v2280_v27, 3 }
 0x1a4   : > { %1864 = vset.pattern.permute.xlu2 %v2033_v61  ;;  %1863 = vset.pattern.permute.xlu1 %v2034_v62 }
 0x1a5   : > { %1887 = vset.pattern.permute.xlu0 %v2035_v63  ;;  %574 = vperm.xlu2 %1864, %v2173_v28  }
 0x1a6   : > { %563 = vperm.xlu1 %1863, %v2173_v28   ;;  %827 = vperm.xlu0 %1887, %v2173_v28  }
 0x1aa   : > { %v2243_v0 = vpop.permute.xlu2 %321 }
 0x1ab   : > { %vm325_vm14 = vcmp.eq.f32.partialorder %v2243_v0, %v2173_v28 }
 0x1ac   : > { %vm2311_vm7 = vmand %vm325_vm14, %vm326_vm13 }
 0x1ad   : > { %1866 = vset.pattern.permute.xlu2 %v2036_v1  ;;  %v3472_v1 = vmov 0 }
 0x1ae   : > { %1865 = vset.pattern.permute.xlu1 %v2037_v2  ;;  %1892 = vset.pattern.permute.xlu0 %v2038_v3  ;;  %v3473_v1 = vsel %vm2301_vm1, 4294967295, %v3472_v1  ;;  %v3474_v3 = vmov 0 }
 0x1af   : > { %596 = vperm.xlu2 %1866, %v2173_v28   ;;  %585 = vperm.xlu1 %1865, %v2173_v28   ;;  %v2248_v4 = vpop.permute.xlu1 %268  ;;  %v3475_v3 = vsel %vm2311_vm7, 4294967295, %v3474_v3  ;;  %vm3482_vm15 = vnez %v3473_v1  ;;  %v2052_v1 = vmov 50  }
 0x1b0   : > { %882 = vperm.xlu0 %1892, %v2173_v28   ;;  %v249_v18 = vpop.permute.xlu0 %248  ;;  %vm272_vm3 = vcmp.eq.f32.partialorder %v2248_v4, %v2173_v28 }
 0x1b1   : > { %vm252_vm11 = vcmp.eq.f32.partialorder %v249_v18, %v2173_v28  ;;  %vm251_vm4 = vcmp.gt.f32.partialorder %v249_v18, %v2173_v28  ;;  %vm2322_vm1 = vmand %vm272_vm3, %vm273_vm2  ;;  %v2051_v18 = vmov 46  }
 0x1b2   : > { %vm254_vm5 = vmand %vm252_vm11, %vm253_vm10  ;;  %vm263_vm10 = vcmp.gt.s32.totalorder %v2280_v27, 1 }
 0x1b3   : > { %v2251_v5 = vpop.permute.xlu2 %354  ;;  %vm2331_vm13 = vmor %vm251_vm4, %vm254_vm5  ;;  %vm348_vm4 = vcmp.gt.s32.totalorder %v2280_v27, 9 }
 0x1b4   : > { %vm2340_vm2 = vmor %vm302_vm6, %vm3482_vm15 }
 0x1b7   : > { %1869 = vset.pattern.permute.xlu2 %v2039_v6  ;;  %1868 = vset.pattern.permute.xlu1 %v2040_v7  ;;  %v3478_v6 = vmov 0  ;;  %v3480_v7 = vmov 0 }
 0x1b8   : > { %1897 = vset.pattern.permute.xlu0 %v2041_v8  ;;  %629 = vperm.xlu2 %1869, %v2173_v28   ;;  %v3479_v6 = vsel %vm2322_vm1, 4294967295, %v3478_v6  ;;  %v3481_v7 = vsel %vm2331_vm13, 4294967295, %v3480_v7  ;;  %v2050_v8 = vmov 47  }
 0x1b9   : > { %618 = vperm.xlu1 %1868, %v2173_v28   ;;  %937 = vperm.xlu0 %1897, %v2173_v28   ;;  %v2256_v9 = vpop.permute.xlu1 %278  ;;  %v2273_v23 = vpop.permute.xlu0 %258 }
 0x1ba   : > { %vm282_vm9 = vcmp.eq.f32.partialorder %v2256_v9, %v2173_v28  ;;  %vm262_vm11 = vcmp.eq.f32.partialorder %v2273_v23, %v2173_v28  ;;  %vm281_vm14 = vcmp.gt.f32.partialorder %v2256_v9, %v2173_v28  ;;  %vm261_vm6 = vcmp.gt.f32.partialorder %v2273_v23, %v2173_v28 }
 0x1bb   : > { %vm2344_vm3 = vmand %vm282_vm9, %vm283_vm8  ;;  %vm3487_vm9 = vcmp.eq.f32.partialorder %v2251_v5, %v2173_v28  ;;  %v3491_v23 = vmov 0 }
 0x1bc   : > { %vm264_vm8 = vmand %vm262_vm11, %vm263_vm10  ;;  %vm324_vm10 = vcmp.gt.f32.partialorder %v2243_v0, %v2173_v28 }
 0x1bd   : > { %v2258_v10 = vpop.permute.xlu2 %376  ;;  %vm2366_vm15 = vmand %vm3487_vm9, %vm359_vm12 }
 0x1be   : > { %vm2382_vm12 = vmor %vm281_vm14, %vm2344_vm3  ;;  %vm380_vm13 = vcmp.eq.f32.partialorder %v2258_v10, %v2173_v28  ;;  %vm3495_vm14 = vnez %v3475_v3 }
 0x1bf   : > { %v3492_v23 = vsel %vm2382_vm12, 4294967295, %v3491_v23  ;;  %vm2386_vm9 = vmor %vm261_vm6, %vm264_vm8  ;;  %vm315_vm6 = vcmp.gt.s32.totalorder %v2280_v27, 6 }
 0x1c0   : > { %1871 = vset.pattern.permute.xlu2 %v2042_v11  ;;  %v3483_v11 = vmov 0  ;;  %vm2399_vm3 = vmor %vm324_vm10, %vm3495_vm14 }
 0x1c1   : > { %1870 = vset.pattern.permute.xlu1 %v2043_v15  ;;  %651 = vperm.xlu2 %1871, %v2173_v28   ;;  %v3484_v11 = vsel %vm2340_vm2, 4294967295, %v3483_v11 }
 0x1c2   : > { %640 = vperm.xlu1 %1870, %v2173_v28   ;;  %v2262_v16 = vpop.permute.xlu1 %310  ;;  %1902 = vset.pattern.permute.xlu0 %v2000_v12  ;;  %v2047_v12 = vmov 41  }
 0x1c3   : > { %v333_v55 = vpop.permute.xlu0 %332  ;;  %vm314_vm8 = vcmp.eq.f32.partialorder %v2262_v16, %v2173_v28 }
 0x1c4   : > { %vm336_vm5 = vcmp.eq.f32.partialorder %v333_v55, %v2173_v28  ;;  %vm335_vm11 = vcmp.gt.f32.partialorder %v333_v55, %v2173_v28  ;;  %v3504_v55 = vmov 0 }
 0x1c5   : > { %vm338_vm1 = vmand %vm336_vm5, %vm3490_vm0  ;;  %vm271_vm0 = vcmp.gt.f32.partialorder %v2248_v4, %v2173_v28 }
 0x1c6   : > { %v2265_v17 = vpop.permute.xlu2 %409  ;;  %vm2406_vm12 = vmor %vm335_vm11, %vm338_vm1  ;;  %vm3503_vm1 = vnez %v3479_v6 }
 0x1c7   : > { %vm2425_vm11 = vmor %vm271_vm0, %vm3503_vm1 }
 0x1c8   : > { %v3505_v55 = vsel %vm2425_vm11, 4294967295, %v3504_v55  ;;  %vm2448_vm0 = vmand %vm314_vm8, %vm315_vm6  ;;  %vm3515_vm6 = vcmp.gt.f32.partialorder %v2258_v10, %v2173_v28  ;;  %vm436_vm8 = vcmp.gt.s32.totalorder %v2280_v27, 17 }
 0x1c9   : > { %1874 = vset.pattern.permute.xlu2 %v2044_v19 }
 0x1ca   : > { %1873 = vset.pattern.permute.xlu1 %v2045_v20  ;;  %684 = vperm.xlu2 %1874, %v2173_v28   ;;  %v3488_v20 = vmov 0 }
 0x1cb   : > { %673 = vperm.xlu1 %1873, %v2173_v28   ;;  %v3489_v20 = vsel %vm2366_vm15, 4294967295, %v3488_v20  ;;  %vm381_vm15 = vcmp.gt.s32.totalorder %v2280_v27, 12 }
 0x1cc   : > { %v2269_v21 = vpop.permute.xlu1 %343  ;;  %v388_v19 = vpop.permute.xlu0 %387  ;;  %vm2417_vm10 = vmand %vm380_vm13, %vm381_vm15  ;;  %vm3508_vm13 = vnez %v3477_v56  ;;  %v340_v56 = vsel %vm2406_vm12, 1, %v2002_v14 }
 0x1cd   : > { %vm347_vm2 = vcmp.eq.f32.partialorder %v2269_v21, %v2173_v28  ;;  %vm346_vm5 = vcmp.gt.f32.partialorder %v2269_v21, %v2173_v28  ;;  %v296_v3 = vsel %vm3508_vm13, 1, %v2002_v14  ;;  %vm2470_vm12 = vmor %vm3515_vm6, %vm2417_vm10  ;;  %vm390_vm10 = vcmp.gt.f32.partialorder %v388_v19, %v2173_v28 }
 0x1ce   : > { %vm349_vm7 = vmand %vm347_vm2, %vm348_vm4  ;;  %vm357_vm2 = vcmp.gt.f32.partialorder %v2251_v5, %v2173_v28  ;;  %vm391_vm4 = vcmp.eq.f32.partialorder %v388_v19, %v2173_v28  ;;  %vm413_vm6 = vcmp.eq.f32.partialorder %v2265_v17, %v2173_v28 }
 0x1cf   : > { %vm2429_vm14 = vmor %vm346_vm5, %vm349_vm7  ;;  %vm313_vm7 = vcmp.gt.f32.partialorder %v2262_v16, %v2173_v28  ;;  %vm3512_vm5 = vnez %v3489_v20 }
 0x1d0   : > { %v2271_v22 = vpop.permute.xlu2 %431  ;;  %vm2461_vm1 = vmor %vm357_vm2, %vm3512_vm5  ;;  %vm3518_vm2 = vnez %v3484_v11  ;;  %v351_v20 = vsel %vm2429_vm14, 1, %v2002_v14  ;;  %vm414_vm14 = vcmp.gt.s32.totalorder %v2280_v27, 15 }
 0x1d1   : > { %vm435_vm13 = vcmp.eq.f32.partialorder %v2271_v22, %v2173_v28  ;;  %v307_v5 = vsel %vm3518_vm2, 1, %v2002_v14  ;;  %vm2494_vm5 = vmor %vm313_vm7, %vm2448_vm0  ;;  %vm3521_vm0 = vnez %v3492_v23  ;;  %v329_v23 = vsel %vm2399_vm3, 1, %v2002_v14 }
 0x1d2   : > { %1876 = vset.pattern.permute.xlu2 %v2046_v24  ;;  %v3493_v24 = vmov 0  ;;  %v286_v16 = vsel %vm3521_vm0, 1, %v2002_v14 }
 0x1d3   : > { %1875 = vset.pattern.permute.xlu1 %v2047_v12  ;;  %706 = vperm.xlu2 %1876, %v2173_v28   ;;  %v3494_v24 = vsel %vm2386_vm9, 4294967295, %v3493_v24  ;;  %vm3500_vm9 = vnez %v3481_v7 }
 0x1d4   : > { %695 = vperm.xlu1 %1875, %v2173_v28   ;;  %v256_v4 = vsel %vm3500_vm9, 1, %v2002_v14  ;;  %vm392_vm9 = vcmp.gt.s32.totalorder %v2280_v27, 13  ;;  %vm3509_vm15 = vnez %v3494_v24 }
 0x1d5   : > { %v2277_v26 = vpop.permute.xlu1 %365  ;;  %v266_v6 = vsel %vm3509_vm15, 1, %v2002_v14  ;;  %v297_v15 = vadd.s32 %v296_v3, %v256_v4  ;;  %vm393_vm15 = vmand %vm391_vm4, %vm392_vm9  ;;  %vm434_vm4 = vcmp.gt.f32.partialorder %v2271_v22, %v2173_v28  ;;  %v318_v3 = vsel %vm2494_vm5, 1, %v2002_v14 }
 0x1d6   : > { %v443_v10 = vpop.permute.xlu0 %442  ;;  %v308_v12 = vadd.s32 %v307_v5, %v266_v6  ;;  %vm437_vm9 = vmand %vm435_vm13, %vm436_vm8  ;;  %vm412_vm8 = vcmp.gt.f32.partialorder %v2265_v17, %v2173_v28  ;;  %vm447_vm5 = vcmp.gt.s32.totalorder %v2280_v27, 18  ;;  %v2055_v5 = vmov 51  }
 0x1d7   : > { %v341_v4 = vadd.s32 %v340_v56, %v297_v15  ;;  %vm394_vm2 = vmor %vm390_vm10, %vm393_vm15  ;;  %vm370_vm10 = vcmp.gt.s32.totalorder %v2280_v27, 11  ;;  %vm369_vm15 = vcmp.eq.f32.partialorder %v2277_v26, %v2173_v28  ;;  %v2054_v56 = vmov 52  }
 0x1d8   : > { %v352_v21 = vadd.s32 %v351_v20, %v308_v12  ;;  %vm415_vm13 = vmand %vm413_vm6, %vm414_vm14  ;;  %v395_v6 = vsel %vm394_vm2, 1, %v2002_v14  ;;  %v330_v15 = vadd.s32 %v329_v23, %v286_v16  ;;  %vm3528_vm6 = vnez %v3505_v55 }
 0x1d9   : > { %v2282_v49 = vpop.permute.xlu2 %464  ;;  %vm2516_vm11 = vmor %vm434_vm4, %vm437_vm9  ;;  %v276_v20 = vsel %vm3528_vm6, 1, %v2002_v14  ;;  %vm368_vm4 = vcmp.gt.f32.partialorder %v2277_v26, %v2173_v28  ;;  %vm469_vm2 = vcmp.gt.s32.totalorder %v2280_v27, 20 }
 0x1da   : > { %vm2541_vm3 = vmor %vm412_vm8, %vm415_vm13  ;;  %v396_v24 = vadd.s32 %v395_v6, %v352_v21  ;;  %v439_v17 = vsel %vm2516_vm11, 1, %v2002_v14  ;;  %v319_v12 = vadd.s32 %v318_v3, %v276_v20  ;;  %vm445_vm8 = vcmp.gt.f32.partialorder %v443_v10, %v2173_v28 }
 0x1db   : > { %1879 = vset.pattern.permute.xlu2 %v2048_v52  ;;  %vm371_vm9 = vmand %vm369_vm15, %vm370_vm10  ;;  %vm502_vm15 = vcmp.gt.s32.totalorder %v2280_v27, 23  ;;  %v2056_v3 = vmov 55   ;;  %v2059_v21 = vmov 56  }
 0x1dc   : > { %1878 = vset.pattern.permute.xlu1 %v2049_v59  ;;  %739 = vperm.xlu2 %1879, %v2173_v28   ;;  %v384_v59 = vsel %vm2470_vm12, 1, %v2002_v14  ;;  %vm2578_vm10 = vmor %vm368_vm4, %vm371_vm9 }
 0x1dd   : > { %728 = vperm.xlu1 %1878, %v2173_v28   ;;  %v385_v22 = vadd.s32 %v384_v59, %v341_v4  ;;  %v440_v4 = vadd.s32 %v439_v17, %v396_v24  ;;  %v373_v7 = vsel %vm2578_vm10, 1, %v2002_v14 }
 0x1df   : > { %v2297_v63 = vpop.permute.xlu1 %398  ;;  %v374_v11 = vadd.s32 %v385_v22, %v330_v15  ;;  %v498_v55 = vpop.permute.xlu0 %497 }
 0x1e0   : > { %vm402_vm7 = vcmp.eq.f32.partialorder %v2297_v63, %v2173_v28  ;;  %vm401_vm12 = vcmp.gt.f32.partialorder %v2297_v63, %v2173_v28  ;;  %vm501_vm4 = vcmp.eq.f32.partialorder %v498_v55, %v2173_v28 }
 0x1e3   : > { %v2329_v60 = vpop.permute.xlu2 %486 }
 0x1e4   : > { %1881 = vset.pattern.permute.xlu2 %v2050_v8  ;;  %v2053_v8 = vmov 49   ;;  %vm489_vm9 = vcmp.gt.f32.partialorder %v2329_v60, %v2173_v28 }
 0x1e5   : > { %1880 = vset.pattern.permute.xlu1 %v2051_v18  ;;  %761 = vperm.xlu2 %1881, %v2173_v28   ;;  %v3513_v18 = vmov 0 }
 0x1e6   : > { %750 = vperm.xlu1 %1880, %v2173_v28   ;;  %v3514_v18 = vsel %vm2461_vm1, 4294967295, %v3513_v18  ;;  %vm403_vm1 = vcmp.gt.s32.totalorder %v2280_v27, 14 }
 0x1e7   : > { %vm2532_vm14 = vmand %vm402_vm7, %vm403_vm1  ;;  %vm446_vm1 = vcmp.eq.f32.partialorder %v443_v10, %v2173_v28  ;;  %vm468_vm7 = vcmp.eq.f32.partialorder %v2282_v49, %v2173_v28  ;;  %vm3529_vm0 = vnez %v3514_v18  ;;  %v417_v18 = vsel %vm2541_vm3, 1, %v2002_v14 }
 0x1e8   : > { %v2378_v9 = vpop.permute.xlu1 %420  ;;  %vm405_vm11 = vmor %vm401_vm12, %vm2532_vm14  ;;  %v362_v26 = vsel %vm3529_vm0, 1, %v2002_v14  ;;  %vm491_vm12 = vcmp.gt.s32.totalorder %v2280_v27, 22  ;;  %vm490_vm14 = vcmp.eq.f32.partialorder %v2329_v60, %v2173_v28  ;;  %v429_v16 = vadd.s32 %v417_v18, %v374_v11 }
 0x1e9   : > { %vm448_vm13 = vmand %vm446_vm1, %vm447_vm5  ;;  %vm467_vm5 = vcmp.gt.f32.partialorder %v2282_v49, %v2173_v28  ;;  %v406_v10 = vsel %vm405_vm11, 1, %v2002_v14  ;;  %v363_v22 = vadd.s32 %v362_v26, %v319_v12  ;;  %v2057_v60 = vmov 54   ;;  %v553_v12 = vpop.permute.xlu0 %552 }
 0x1ea   : > { %vm470_vm1 = vmand %vm468_vm7, %vm469_vm2  ;;  %vm500_vm2 = vcmp.gt.f32.partialorder %v498_v55, %v2173_v28  ;;  %vm424_vm10 = vcmp.eq.f32.partialorder %v2378_v9, %v2173_v28  ;;  %v2058_v55 = vmov 57  }
 0x1eb   : > { %vm2596_vm6 = vmor %vm445_vm8, %vm448_vm13  ;;  %v407_v23 = vadd.s32 %v406_v10, %v363_v22  ;;  %vm425_vm13 = vcmp.gt.s32.totalorder %v2280_v27, 16 }
 0x1ec   : > { %v2421_v52 = vpop.permute.xlu2 %519  ;;  %vm492_vm3 = vmand %vm490_vm14, %vm491_vm12 }
 0x1ed   : > { %1884 = vset.pattern.permute.xlu2 %v2052_v1  ;;  %v418_v1 = vadd.s32 %v440_v4, %v429_v16  ;;  %vm2603_vm0 = vmor %vm467_vm5, %vm470_vm1  ;;  %vm557_vm5 = vcmp.gt.s32.totalorder %v2280_v27, 28  ;;  %vm556_vm1 = vcmp.eq.f32.partialorder %v553_v12, %v2173_v28 }
 0x1ee   : > { %1883 = vset.pattern.permute.xlu1 %v2053_v8  ;;  %794 = vperm.xlu2 %1884, %v2173_v28   ;;  %vm503_vm7 = vmand %vm501_vm4, %vm502_vm15  ;;  %v472_v24 = vsel %vm2603_vm0, 1, %v2002_v14  ;;  %vm423_vm15 = vcmp.gt.f32.partialorder %v2378_v9, %v2173_v28  ;;  %vm523_vm4 = vcmp.eq.f32.partialorder %v2421_v52, %v2173_v28  ;;  %vm458_vm0 = vcmp.gt.s32.totalorder %v2280_v27, 19 }
 0x1ef   : > { %783 = vperm.xlu1 %1883, %v2173_v28   ;;  %vm493_vm11 = vmor %vm489_vm9, %vm492_vm3  ;;  %v462_v15 = vadd.s32 %v418_v1, %v373_v7  ;;  %vm555_vm9 = vcmp.gt.f32.partialorder %v553_v12, %v2173_v28  ;;  %v2060_v1 = vmov 60  }
 0x1f0   : > { %vm504_vm8 = vmor %vm500_vm2, %vm503_vm7  ;;  %vm522_vm7 = vcmp.gt.f32.partialorder %v2421_v52, %v2173_v28 }
 0x1f1   : > { %v505_v17 = vsel %vm504_vm8, 1, %v2002_v14  ;;  %vm426_vm12 = vmand %vm424_vm10, %vm425_vm13  ;;  %v506_v11 = vadd.s32 %v472_v24, %v462_v15  ;;  %v2062_v24 = vmov 62  }
 0x1f2   : > { %v2503_v19 = vpop.permute.xlu1 %453  ;;  %vm427_vm14 = vmor %vm423_vm15, %vm426_vm12  ;;  %v608_v22 = vpop.permute.xlu0 %607 }
 0x1f3   : > { %v550_v4 = vadd.s32 %v506_v11, %v505_v17  ;;  %v428_v10 = vsel %vm427_vm14, 1, %v2002_v14  ;;  %vm558_vm3 = vmand %vm556_vm1, %vm557_vm5  ;;  %vm457_vm2 = vcmp.eq.f32.partialorder %v2503_v19, %v2173_v28  ;;  %vm456_vm13 = vcmp.gt.f32.partialorder %v2503_v19, %v2173_v28 }
 0x1f4   : > { %vm559_vm8 = vmor %vm555_vm9, %vm558_vm3  ;;  %vm612_vm14 = vcmp.gt.s32.totalorder %v2280_v27, 33  ;;  %vm611_vm5 = vcmp.eq.f32.partialorder %v608_v22, %v2173_v28  ;;  %vm546_vm1 = vcmp.gt.s32.totalorder %v2280_v27, 27  ;;  %vm480_vm3 = vcmp.gt.s32.totalorder %v2280_v27, 21 }
 0x1f5   : > { %vm459_vm10 = vmand %vm457_vm2, %vm458_vm0  ;;  %v560_v49 = vsel %vm559_vm8, 1, %v2002_v14 }
 0x1f6   : > { %1886 = vset.pattern.permute.xlu2 %v2054_v56  ;;  %v2536_v8 = vpop.permute.xlu2 %541  ;;  %v450_v56 = vsel %vm2596_vm6, 1, %v2002_v14  ;;  %vm524_vm6 = vcmp.gt.s32.totalorder %v2280_v27, 25  ;;  %vm460_vm12 = vmor %vm456_vm13, %vm459_vm10 }
 0x1f7   : > { %1885 = vset.pattern.permute.xlu1 %v2055_v5  ;;  %816 = vperm.xlu2 %1886, %v2173_v28   ;;  %v451_v0 = vadd.s32 %v450_v56, %v407_v23  ;;  %v494_v5 = vsel %vm493_vm11, 1, %v2002_v14  ;;  %vm525_vm11 = vmand %vm523_vm4, %vm524_vm6  ;;  %v2061_v23 = vmov 59   ;;  %vm545_vm6 = vcmp.eq.f32.partialorder %v2536_v8, %v2173_v28 }
 0x1f8   : > { %805 = vperm.xlu1 %1885, %v2173_v28   ;;  %vm526_vm15 = vmor %vm522_vm7, %vm525_vm11  ;;  %v461_v7 = vsel %vm460_vm12, 1, %v2002_v14  ;;  %vm610_vm4 = vcmp.gt.f32.partialorder %v608_v22, %v2173_v28  ;;  %vm544_vm2 = vcmp.gt.f32.partialorder %v2536_v8, %v2173_v28  ;;  %vm667_vm12 = vcmp.gt.s32.totalorder %v2280_v27, 38 }
 0x1f9   : > { %v495_v26 = vadd.s32 %v494_v5, %v451_v0  ;;  %v527_v19 = vsel %vm526_vm15, 1, %v2002_v14  ;;  %vm613_vm9 = vmand %vm611_vm5, %vm612_vm14  ;;  %v2063_v5 = vmov 61   ;;  %vm579_vm5 = vcmp.gt.s32.totalorder %v2280_v27, 30 }
 0x1fa   : > { %vm547_vm7 = vmand %vm545_vm6, %vm546_vm1 }
 0x1fb   : > { %v2586_v63 = vpop.permute.xlu1 %475  ;;  %v484_v9 = vadd.s32 %v550_v4, %v495_v26  ;;  %vm614_vm11 = vmor %vm610_vm4, %vm613_vm9  ;;  %vm513_vm9 = vcmp.gt.s32.totalorder %v2280_v27, 24 }
 0x1fc   : > { %vm479_vm0 = vcmp.eq.f32.partialorder %v2586_v63, %v2173_v28  ;;  %vm478_vm8 = vcmp.gt.f32.partialorder %v2586_v63, %v2173_v28  ;;  %v663_v0 = vpop.permute.xlu0 %662  ;;  %vm548_vm10 = vmor %vm544_vm2, %vm547_vm7  ;;  %v615_v8 = vsel %vm614_vm11, 1, %v2002_v14 }
 0x1fd   : > { %v473_v59 = vadd.s32 %v484_v9, %v428_v10  ;;  %vm481_vm13 = vmand %vm479_vm0, %vm480_vm3  ;;  %vm666_vm14 = vcmp.eq.f32.partialorder %v663_v0, %v2173_v28  ;;  %v549_v63 = vsel %vm548_vm10, 1, %v2002_v14  ;;  %vm665_vm6 = vcmp.gt.f32.partialorder %v663_v0, %v2173_v28 }
 0x1fe   : > { %vm482_vm15 = vmor %vm478_vm8, %vm481_vm13 }
 0x1ff   : > { %1889 = vset.pattern.permute.xlu2 %v2056_v3  ;;  %v2607_v6 = vpop.permute.xlu2 %574  ;;  %v517_v3 = vadd.s32 %v560_v49, %v473_v59  ;;  %v483_v11 = vsel %vm482_vm15, 1, %v2002_v14  ;;  %vm668_vm4 = vmand %vm666_vm14, %vm667_vm12  ;;  %vm722_vm15 = vcmp.gt.s32.totalorder %v2280_v27, 43  ;;  %vm601_vm14 = vcmp.gt.s32.totalorder %v2280_v27, 32 }
 0x200   : > { %1888 = vset.pattern.permute.xlu1 %v2057_v60  ;;  %849 = vperm.xlu2 %1889, %v2173_v28   ;;  %vm578_vm1 = vcmp.eq.f32.partialorder %v2607_v6, %v2173_v28  ;;  %vm577_vm0 = vcmp.gt.f32.partialorder %v2607_v6, %v2173_v28  ;;  %vm669_vm7 = vmor %vm665_vm6, %vm668_vm4  ;;  %vm535_vm4 = vcmp.gt.s32.totalorder %v2280_v27, 26 }
 0x201   : > { %838 = vperm.xlu1 %1888, %v2173_v28   ;;  %v561_v60 = vadd.s32 %v527_v19, %v517_v3  ;;  %vm580_vm2 = vmand %vm578_vm1, %vm579_vm5  ;;  %v670_v10 = vsel %vm669_vm7, 1, %v2002_v14 }
 0x202   : > { %vm581_vm13 = vmor %vm577_vm0, %vm580_vm2 }
 0x203   : > { %v605_v15 = vadd.s32 %v561_v60, %v461_v7 }
 0x205   : > { %v2627_v20 = vpop.permute.xlu1 %508  ;;  %v539_v12 = vadd.s32 %v615_v8, %v605_v15 }
 0x206   : > { %vm512_vm3 = vcmp.eq.f32.partialorder %v2627_v20, %v2173_v28  ;;  %vm511_vm11 = vcmp.gt.f32.partialorder %v2627_v20, %v2173_v28 }
 0x207   : > { %v528_v26 = vadd.s32 %v549_v63, %v539_v12  ;;  %vm514_vm8 = vmand %vm512_vm3, %vm513_vm9 }
 0x208   : > { %1891 = vset.pattern.permute.xlu2 %v2058_v55  ;;  %vm515_vm10 = vmor %vm511_vm11, %vm514_vm8 }
 0x209   : > { %1890 = vset.pattern.permute.xlu1 %v2059_v21  ;;  %871 = vperm.xlu2 %1891, %v2173_v28   ;;  %v2635_v18 = vpop.permute.xlu2 %596  ;;  %v572_v4 = vadd.s32 %v528_v26, %v483_v11  ;;  %v718_v21 = vpop.permute.xlu0 %717  ;;  %v516_v6 = vsel %vm515_vm10, 1, %v2002_v14  ;;  %vm777_vm10 = vcmp.gt.s32.totalorder %v2280_v27, 48 }
 0x20a   : > { %860 = vperm.xlu1 %1890, %v2173_v28   ;;  %vm721_vm12 = vcmp.eq.f32.partialorder %v718_v21, %v2173_v28  ;;  %vm600_vm5 = vcmp.eq.f32.partialorder %v2635_v18, %v2173_v28  ;;  %vm720_vm1 = vcmp.gt.f32.partialorder %v718_v21, %v2173_v28  ;;  %vm599_vm3 = vcmp.gt.f32.partialorder %v2635_v18, %v2173_v28 }
 0x20b   : > { %v616_v59 = vadd.s32 %v670_v10, %v572_v4  ;;  %vm723_vm6 = vmand %vm721_vm12, %vm722_vm15  ;;  %vm634_vm12 = vcmp.gt.s32.totalorder %v2280_v27, 35 }
 0x20c   : > { %vm602_vm0 = vmand %vm600_vm5, %vm601_vm14 }
 0x20d   : > { %vm724_vm2 = vmor %vm720_vm1, %vm723_vm6  ;;  %vm568_vm6 = vcmp.gt.s32.totalorder %v2280_v27, 29 }
 0x20e   : > { %v2648_v16 = vpop.permute.xlu1 %530  ;;  %vm603_vm8 = vmor %vm599_vm3, %vm602_vm0  ;;  %v725_v3 = vsel %vm724_vm2, 1, %v2002_v14 }
 0x20f   : > { %vm534_vm9 = vcmp.eq.f32.partialorder %v2648_v16, %v2173_v28  ;;  %vm533_vm7 = vcmp.gt.f32.partialorder %v2648_v16, %v2173_v28  ;;  %v604_v18 = vsel %vm603_vm8, 1, %v2002_v14 }
 0x210   : > { %vm536_vm11 = vmand %vm534_vm9, %vm535_vm4 }
 0x211   : > { %1894 = vset.pattern.permute.xlu2 %v2060_v1  ;;  %v773_v49 = vpop.permute.xlu0 %772 }
 0x212   : > { %1893 = vset.pattern.permute.xlu1 %v2061_v23  ;;  %904 = vperm.xlu2 %1894, %v2173_v28   ;;  %v2654_v52 = vpop.permute.xlu2 %629  ;;  %vm776_vm15 = vcmp.eq.f32.partialorder %v773_v49, %v2173_v28  ;;  %vm775_vm5 = vcmp.gt.f32.partialorder %v773_v49, %v2173_v28 }
 0x213   : > { %893 = vperm.xlu1 %1893, %v2173_v28   ;;  %vm633_vm14 = vcmp.eq.f32.partialorder %v2654_v52, %v2173_v28  ;;  %vm778_vm1 = vmand %vm776_vm15, %vm777_vm10  ;;  %vm632_vm9 = vcmp.gt.f32.partialorder %v2654_v52, %v2173_v28  ;;  %vm656_vm15 = vcmp.gt.s32.totalorder %v2280_v27, 37 }
 0x214   : > { %vm635_vm3 = vmand %vm633_vm14, %vm634_vm12 }
 0x215   : > { %vm779_vm0 = vmor %vm775_vm5, %vm778_vm1  ;;  %vm590_vm1 = vcmp.gt.s32.totalorder %v2280_v27, 31 }
 0x218   : > { %v2670_v56 = vpop.permute.xlu1 %563 }
 0x219   : > { %vm567_vm4 = vcmp.eq.f32.partialorder %v2670_v56, %v2173_v28  ;;  %vm566_vm2 = vcmp.gt.f32.partialorder %v2670_v56, %v2173_v28  ;;  %v828_v0 = vpop.permute.xlu0 %827 }
 0x21a   : > { %1896 = vset.pattern.permute.xlu2 %v2062_v24  ;;  %vm831_vm10 = vcmp.eq.f32.partialorder %v828_v0, %v2173_v28  ;;  %vm830_vm14 = vcmp.gt.f32.partialorder %v828_v0, %v2173_v28 }
 0x21b   : > { %1895 = vset.pattern.permute.xlu1 %v2063_v5  ;;  %926 = vperm.xlu2 %1896, %v2173_v28   ;;  %v2675_v17 = vpop.permute.xlu2 %651  ;;  %v780_v5 = vsel %vm779_vm0, 1, %v2002_v14 }
 0x21c   : > { %915 = vperm.xlu1 %1895, %v2173_v28   ;;  %vm655_vm12 = vcmp.eq.f32.partialorder %v2675_v17, %v2173_v28 }
 0x221   : > { %v2690_v55 = vpop.permute.xlu1 %585 }
 0x222   : > { %vm588_vm0 = vcmp.gt.f32.partialorder %v2690_v55, %v2173_v28  ;;  %v883_v26 = vpop.permute.xlu0 %882 }
 0x223   : > { %1899 = vset.pattern.permute.xlu2 %v2005_v31  ;;  %v582_v31 = vsel %vm581_vm13, 1, %v2002_v14  ;;  %vm537_vm13 = vmor %vm533_vm7, %vm536_vm11 }
 0x224   : > { %v2697_v9 = vpop.permute.xlu2 %684  ;;  %1898 = vset.pattern.permute.xlu1 %v2002_v14  ;;  %v660_v20 = vadd.s32 %v616_v59, %v582_v31  ;;  %v538_v16 = vsel %vm537_vm13, 1, %v2002_v14  ;;  %vm569_vm7 = vmand %vm567_vm4, %vm568_vm6  ;;  %vm832_vm13 = vcmp.gt.s32.totalorder %v2280_v27, 53  ;;  %vm589_vm6 = vcmp.eq.f32.partialorder %v2690_v55, %v2173_v28 }
 0x225   : > { %vm636_vm11 = vmor %vm632_vm9, %vm635_vm3  ;;  %vm654_vm4 = vcmp.gt.f32.partialorder %v2675_v17, %v2173_v28 }
 0x226   : > { %v594_v1 = vadd.s32 %v660_v20, %v516_v6  ;;  %vm570_vm8 = vmor %vm566_vm2, %vm569_vm7  ;;  %v637_v52 = vsel %vm636_vm11, 1, %v2002_v14 }
 0x227   : > { %v571_v12 = vsel %vm570_vm8, 1, %v2002_v14  ;;  %vm833_vm5 = vmand %vm831_vm10, %vm832_vm13  ;;  %vm887_vm8 = vcmp.gt.s32.totalorder %v2280_v27, 58  ;;  %vm886_vm13 = vcmp.eq.f32.partialorder %v883_v26, %v2173_v28  ;;  %vm689_vm10 = vcmp.gt.s32.totalorder %v2280_v27, 40 }
 0x228   : > { %v583_v19 = vadd.s32 %v725_v3, %v594_v1  ;;  %vm657_vm9 = vmand %vm655_vm12, %vm656_vm15  ;;  %vm688_vm15 = vcmp.eq.f32.partialorder %v2697_v9, %v2173_v28  ;;  %vm885_vm12 = vcmp.gt.f32.partialorder %v883_v26, %v2173_v28 }
 0x229   : > { %vm834_vm3 = vmor %vm830_vm14, %vm833_vm5  ;;  %vm623_vm5 = vcmp.gt.s32.totalorder %v2280_v27, 34 }
 0x22a   : > { %v627_v60 = vadd.s32 %v604_v18, %v583_v19  ;;  %vm591_vm2 = vmand %vm589_vm6, %vm590_vm1  ;;  %v835_v21 = vsel %vm834_vm3, 1, %v2002_v14  ;;  %vm687_vm6 = vcmp.gt.f32.partialorder %v2697_v9, %v2173_v28 }
 0x22b   : > { %v2712_v22 = vpop.permute.xlu1 %618  ;;  %vm658_vm7 = vmor %vm654_vm4, %vm657_vm9  ;;  %v938_v20 = vpop.permute.xlu0 %937 }
 0x22c   : > { %v671_v15 = vadd.s32 %v627_v60, %v538_v16  ;;  %vm592_vm11 = vmor %vm588_vm0, %vm591_vm2  ;;  %v659_v17 = vsel %vm658_vm7, 1, %v2002_v14  ;;  %vm622_vm1 = vcmp.eq.f32.partialorder %v2712_v22, %v2173_v28  ;;  %vm621_vm3 = vcmp.gt.f32.partialorder %v2712_v22, %v2173_v28 }
 0x22d   : > { %v2718_v23 = vpop.permute.xlu2 %706  ;;  %v593_v55 = vsel %vm592_vm11, 1, %v2002_v14  ;;  %vm888_vm14 = vmand %vm886_vm13, %vm887_vm8  ;;  %vm942_vm11 = vcmp.gt.s32.totalorder %v2280_v27, 63  ;;  %vm941_vm8 = vcmp.eq.f32.partialorder %v938_v20, %v2173_v28  ;;  %vm711_vm13 = vcmp.gt.s32.totalorder %v2280_v27, 42 }
 0x22e   : > { %v715_v8 = vadd.s32 %v780_v5, %v671_v15  ;;  %vm690_vm4 = vmand %vm688_vm15, %vm689_vm10  ;;  %vm710_vm10 = vcmp.eq.f32.partialorder %v2718_v23, %v2173_v28  ;;  %vm940_vm15 = vcmp.gt.f32.partialorder %v938_v20, %v2173_v28 }
 0x22f   : > { %vm889_vm9 = vmor %vm885_vm12, %vm888_vm14  ;;  %vm645_vm14 = vcmp.gt.s32.totalorder %v2280_v27, 36 }
 0x230   : > { %v649_v63 = vadd.s32 %v715_v8, %v637_v52  ;;  %vm624_vm0 = vmand %vm622_vm1, %vm623_vm5  ;;  %v890_v49 = vsel %vm889_vm9, 1, %v2002_v14  ;;  %vm709_vm1 = vcmp.gt.f32.partialorder %v2718_v23, %v2173_v28 }
 0x231   : > { %vm691_vm2 = vmor %vm687_vm6, %vm690_vm4 }
 0x232   : > { %v638_v11 = vadd.s32 %v649_v63, %v571_v12  ;;  %vm625_vm7 = vmor %vm621_vm3, %vm624_vm0  ;;  %v692_v19 = vsel %vm691_vm2, 1, %v2002_v14  ;;  %vm744_vm2 = vcmp.gt.s32.totalorder %v2280_v27, 45 }
 0x233   : > { %v626_v22 = vsel %vm625_vm7, 1, %v2002_v14  ;;  %vm943_vm12 = vmand %vm941_vm8, %vm942_vm11  ;;  %vm678_vm8 = vcmp.gt.s32.totalorder %v2280_v27, 39 }
 0x234   : > { %v2729_v7 = vpop.permute.xlu1 %640  ;;  %v682_v10 = vadd.s32 %v835_v21, %v638_v11  ;;  %vm712_vm6 = vmand %vm710_vm10, %vm711_vm13 }
 0x235   : > { %vm644_vm5 = vcmp.eq.f32.partialorder %v2729_v7, %v2173_v28  ;;  %vm944_vm4 = vmor %vm940_vm15, %vm943_vm12  ;;  %vm643_vm9 = vcmp.gt.f32.partialorder %v2729_v7, %v2173_v28 }
 0x236   : > { %v2738_v24 = vpop.permute.xlu2 %739  ;;  %v726_v31 = vadd.s32 %v682_v10, %v659_v17  ;;  %vm646_vm3 = vmand %vm644_vm5, %vm645_vm14  ;;  %v945_v15 = vsel %vm944_vm4, 1, %v2002_v14 }
 0x237   : > { %vm713_vm0 = vmor %vm709_vm1, %vm712_vm6  ;;  %vm743_vm7 = vcmp.eq.f32.partialorder %v2738_v24, %v2173_v28  ;;  %vm742_vm10 = vcmp.gt.f32.partialorder %v2738_v24, %v2173_v28  ;;  %vm766_vm1 = vcmp.gt.s32.totalorder %v2280_v27, 47 }
 0x238   : > { %v770_v6 = vadd.s32 %v726_v31, %v593_v55  ;;  %vm647_vm11 = vmor %vm643_vm9, %vm646_vm3  ;;  %v714_v23 = vsel %vm713_vm0, 1, %v2002_v14  ;;  %vm700_vm9 = vcmp.gt.s32.totalorder %v2280_v27, 41 }
 0x239   : > { %vm745_vm15 = vmand %vm743_vm7, %vm744_vm2  ;;  %v648_v7 = vsel %vm647_vm11, 1, %v2002_v14 }
 0x23a   : > { %v704_v3 = vadd.s32 %v890_v49, %v770_v6  ;;  %vm746_vm5 = vmor %vm742_vm10, %vm745_vm15 }
 0x23b   : > { %v747_v24 = vsel %vm746_vm5, 1, %v2002_v14 }
 0x23c   : > { %v693_v18 = vadd.s32 %v704_v3, %v692_v19 }
 0x23d   : > { %v2747_v56 = vpop.permute.xlu1 %673 }
 0x23e   : > { %v737_v16 = vadd.s32 %v693_v18, %v626_v22  ;;  %vm677_vm13 = vcmp.eq.f32.partialorder %v2747_v56, %v2173_v28  ;;  %vm676_vm12 = vcmp.gt.f32.partialorder %v2747_v56, %v2173_v28 }
 0x23f   : > { %v2758_v4 = vpop.permute.xlu2 %761  ;;  %vm679_vm14 = vmand %vm677_vm13, %vm678_vm8  ;;  %vm799_vm13 = vcmp.gt.s32.totalorder %v2280_v27, 50 }
 0x240   : > { %v781_v5 = vadd.s32 %v945_v15, %v737_v16  ;;  %vm765_vm6 = vcmp.eq.f32.partialorder %v2758_v4, %v2173_v28  ;;  %vm680_vm4 = vmor %vm676_vm12, %vm679_vm14  ;;  %vm764_vm0 = vcmp.gt.f32.partialorder %v2758_v4, %v2173_v28  ;;  %vm733_vm12 = vcmp.gt.s32.totalorder %v2280_v27, 44 }
 0x241   : > { %vm767_vm2 = vmand %vm765_vm6, %vm766_vm1  ;;  %v681_v63 = vsel %vm680_vm4, 1, %v2002_v14 }
 0x242   : > { %v825_v8 = vadd.s32 %v781_v5, %v714_v23  ;;  %vm768_vm8 = vmor %vm764_vm0, %vm767_vm2 }
 0x243   : > { %v769_v4 = vsel %vm768_vm8, 1, %v2002_v14 }
 0x244   : > { %v759_v52 = vadd.s32 %v825_v8, %v648_v7 }
 0x246   : > { %v2764_v59 = vpop.permute.xlu1 %695  ;;  %v748_v11 = vadd.s32 %v759_v52, %v747_v24 }
 0x247   : > { %vm699_vm3 = vcmp.eq.f32.partialorder %v2764_v59, %v2173_v28  ;;  %vm698_vm7 = vcmp.gt.f32.partialorder %v2764_v59, %v2173_v28 }
 0x248   : > { %v2778_v1 = vpop.permute.xlu2 %794  ;;  %vm701_vm11 = vmand %vm699_vm3, %vm700_vm9  ;;  %v792_v26 = vadd.s32 %v748_v11, %v681_v63  ;;  %vm821_vm3 = vcmp.gt.s32.totalorder %v2280_v27, 52 }
 0x249   : > { %vm798_vm10 = vcmp.eq.f32.partialorder %v2778_v1, %v2173_v28  ;;  %vm702_vm15 = vmor %vm698_vm7, %vm701_vm11  ;;  %vm797_vm5 = vcmp.gt.f32.partialorder %v2778_v1, %v2173_v28  ;;  %vm755_vm7 = vcmp.gt.s32.totalorder %v2280_v27, 46 }
 0x24a   : > { %vm800_vm1 = vmand %vm798_vm10, %vm799_vm13  ;;  %v703_v21 = vsel %vm702_vm15, 1, %v2002_v14  ;;  %v836_v10 = vadd.s32 %v792_v26, %v769_v4 }
 0x24b   : > { %vm801_vm9 = vmor %vm797_vm5, %vm800_vm1 }
 0x24c   : > { %v880_v55 = vadd.s32 %v836_v10, %v703_v21  ;;  %v802_v31 = vsel %vm801_vm9, 1, %v2002_v14 }
 0x24e   : > { %v814_v20 = vadd.s32 %v880_v55, %v802_v31 }
 0x24f   : > { %v2783_v9 = vpop.permute.xlu1 %728 }
 0x250   : > { %vm732_vm14 = vcmp.eq.f32.partialorder %v2783_v9, %v2173_v28  ;;  %vm731_vm6 = vcmp.gt.f32.partialorder %v2783_v9, %v2173_v28 }
 0x251   : > { %v2798_v60 = vpop.permute.xlu2 %816  ;;  %vm734_vm4 = vmand %vm732_vm14, %vm733_vm12  ;;  %vm854_vm14 = vcmp.gt.s32.totalorder %v2280_v27, 55 }
 0x252   : > { %vm820_vm0 = vcmp.eq.f32.partialorder %v2798_v60, %v2173_v28  ;;  %vm735_vm2 = vmor %vm731_vm6, %vm734_vm4  ;;  %vm819_vm8 = vcmp.gt.f32.partialorder %v2798_v60, %v2173_v28  ;;  %vm788_vm6 = vcmp.gt.s32.totalorder %v2280_v27, 49 }
 0x253   : > { %vm822_vm13 = vmand %vm820_vm0, %vm821_vm3  ;;  %v736_v6 = vsel %vm735_vm2, 1, %v2002_v14 }
 0x254   : > { %vm823_vm12 = vmor %vm819_vm8, %vm822_vm13  ;;  %v803_v1 = vadd.s32 %v814_v20, %v736_v6 }
 0x255   : > { %v824_v49 = vsel %vm823_vm12, 1, %v2002_v14 }
 0x256   : > { %v847_v22 = vadd.s32 %v824_v49, %v803_v1 }
 0x258   : > { %v751_v0 = vpop.permute.xlu1 %750 }
 0x259   : > { %vm754_vm11 = vcmp.eq.f32.partialorder %v751_v0, %v2173_v28  ;;  %vm753_vm10 = vcmp.gt.f32.partialorder %v751_v0, %v2173_v28 }
 0x25a   : > { %v850_v56 = vpop.permute.xlu2 %849  ;;  %vm756_vm15 = vmand %vm754_vm11, %vm755_vm7  ;;  %vm876_vm11 = vcmp.gt.s32.totalorder %v2280_v27, 57 }
 0x25b   : > { %vm853_vm5 = vcmp.eq.f32.partialorder %v850_v56, %v2173_v28  ;;  %vm757_vm1 = vmor %vm753_vm10, %vm756_vm15  ;;  %vm852_vm9 = vcmp.gt.f32.partialorder %v850_v56, %v2173_v28  ;;  %vm810_vm10 = vcmp.gt.s32.totalorder %v2280_v27, 51 }
 0x25c   : > { %vm855_vm3 = vmand %vm853_vm5, %vm854_vm14  ;;  %v758_v9 = vsel %vm757_vm1, 1, %v2002_v14 }
 0x25d   : > { %vm856_vm7 = vmor %vm852_vm9, %vm855_vm3  ;;  %v891_v18 = vadd.s32 %v847_v22, %v758_v9 }
 0x25e   : > { %v857_v16 = vsel %vm856_vm7, 1, %v2002_v14 }
 0x25f   : > { %v935_v15 = vadd.s32 %v891_v18, %v857_v16 }
 0x261   : > { %v784_v12 = vpop.permute.xlu1 %783 }
 0x262   : > { %vm787_vm4 = vcmp.eq.f32.partialorder %v784_v12, %v2173_v28  ;;  %vm786_vm0 = vcmp.gt.f32.partialorder %v784_v12, %v2173_v28 }
 0x263   : > { %v872_v17 = vpop.permute.xlu2 %871  ;;  %vm789_vm2 = vmand %vm787_vm4, %vm788_vm6  ;;  %vm909_vm4 = vcmp.gt.s32.totalorder %v2280_v27, 60 }
 0x264   : > { %vm875_vm8 = vcmp.eq.f32.partialorder %v872_v17, %v2173_v28  ;;  %vm790_vm13 = vmor %vm786_vm0, %vm789_vm2  ;;  %vm874_vm12 = vcmp.gt.f32.partialorder %v872_v17, %v2173_v28  ;;  %vm843_vm0 = vcmp.gt.s32.totalorder %v2280_v27, 54 }
 0x265   : > { %vm877_vm14 = vmand %vm875_vm8, %vm876_vm11  ;;  %v791_v60 = vsel %vm790_vm13, 1, %v2002_v14 }
 0x266   : > { %vm878_vm6 = vmor %vm874_vm12, %vm877_vm14  ;;  %v869_v5 = vadd.s32 %v935_v15, %v791_v60 }
 0x267   : > { %v879_v23 = vsel %vm878_vm6, 1, %v2002_v14 }
 0x268   : > { %v913_v52 = vadd.s32 %v879_v23, %v869_v5 }
 0x26a   : > { %v806_v59 = vpop.permute.xlu1 %805 }
 0x26b   : > { %vm809_vm15 = vcmp.eq.f32.partialorder %v806_v59, %v2173_v28  ;;  %vm808_vm5 = vcmp.gt.f32.partialorder %v806_v59, %v2173_v28 }
 0x26c   : > { %v905_v19 = vpop.permute.xlu2 %904  ;;  %vm811_vm1 = vmand %vm809_vm15, %vm810_vm10  ;;  %vm931_vm15 = vcmp.gt.s32.totalorder %v2280_v27, 62 }
 0x26d   : > { %vm908_vm9 = vcmp.eq.f32.partialorder %v905_v19, %v2173_v28  ;;  %vm812_vm3 = vmor %vm808_vm5, %vm811_vm1  ;;  %vm907_vm7 = vcmp.gt.f32.partialorder %v905_v19, %v2173_v28  ;;  %vm865_vm5 = vcmp.gt.s32.totalorder %v2280_v27, 56 }
 0x26e   : > { %vm910_vm11 = vmand %vm908_vm9, %vm909_vm4  ;;  %v813_v8 = vsel %vm812_vm3, 1, %v2002_v14  ;;  %vm898_vm9 = vcmp.gt.s32.totalorder %v2280_v27, 59 }
 0x26f   : > { %vm911_vm10 = vmor %vm907_vm7, %vm910_vm11  ;;  %v858_v24 = vadd.s32 %v913_v52, %v813_v8 }
 0x270   : > { %v912_v56 = vsel %vm911_vm10, 1, %v2002_v14 }
 0x271   : > { %v902_v11 = vadd.s32 %v912_v56, %v858_v24 }
 0x273   : > { %v839_v3 = vpop.permute.xlu1 %838 }
 0x274   : > { %vm842_vm2 = vcmp.eq.f32.partialorder %v839_v3, %v2173_v28  ;;  %vm841_vm8 = vcmp.gt.f32.partialorder %v839_v3, %v2173_v28 }
 0x275   : > { %v927_v7 = vpop.permute.xlu2 %926  ;;  %vm844_vm13 = vmand %vm842_vm2, %vm843_vm0 }
 0x276   : > { %vm930_vm12 = vcmp.eq.f32.partialorder %v927_v7, %v2173_v28  ;;  %vm845_vm14 = vmor %vm841_vm8, %vm844_vm13  ;;  %vm929_vm6 = vcmp.gt.f32.partialorder %v927_v7, %v2173_v28 }
 0x277   : > { %vm932_vm4 = vmand %vm930_vm12, %vm931_vm15  ;;  %v846_v63 = vsel %vm845_vm14, 1, %v2002_v14  ;;  %vm920_vm15 = vcmp.gt.s32.totalorder %v2280_v27, 61 }
 0x278   : > { %vm933_vm7 = vmor %vm929_vm6, %vm932_vm4  ;;  %v946_v26 = vadd.s32 %v902_v11, %v846_v63  ;;  %vm3536_vm4 = vcmask 523264  }
 0x279   : > { %v934_v4 = vsel %vm933_vm7, 1, %v2002_v14 }
 0x27a   : > { %v924_v10 = vadd.s32 %v946_v26, %v934_v4 }
 0x27c   : > { %v861_v0 = vpop.permute.xlu1 %860 }
 0x27d   : > { %vm864_vm1 = vcmp.eq.f32.partialorder %v861_v0, %v2173_v28  ;;  %vm863_vm3 = vcmp.gt.f32.partialorder %v861_v0, %v2173_v28 }
 0x27e   : > { %vm866_vm0 = vmand %vm864_vm1, %vm865_vm5 }
 0x27f   : > { %vm867_vm13 = vmor %vm863_vm3, %vm866_vm0 }
 0x280   : > { %v868_v21 = vsel %vm867_vm13, 1, %v2002_v14  ;;  %vm3537_vm3 = vmmov %vm3536_vm4 }
 0x281   : > { %v947_v55 = vadd.s32 %v924_v10, %v868_v21 }
 0x285   : > { %v894_v12 = vpop.permute.xlu1 %893 }
 0x286   : > { %vm897_vm2 = vcmp.eq.f32.partialorder %v894_v12, %v2173_v28  ;;  %vm896_vm11 = vcmp.gt.f32.partialorder %v894_v12, %v2173_v28 }
 0x287   : > { %vm899_vm8 = vmand %vm897_vm2, %vm898_vm9 }
 0x288   : > { %vm900_vm10 = vmor %vm896_vm11, %vm899_vm8 }
 0x289   : > { %v901_v17 = vsel %vm900_vm10, 1, %v2002_v14  ;;  %vm3538_vm2 = vmmov %vm3537_vm3 }
 0x28a   : > { %v948_v31 = vadd.s32 %v947_v55, %v901_v17  ;;  %vm3539_vm11 = vmmov %vm3538_vm2 }
 0x28b   : > { %vm3540_vm13 = vmmov %vm3538_vm2 }
 0x28e   : > { %v916_v59 = vpop.permute.xlu1 %915 }
 0x28f   : > { %vm918_vm12 = vcmp.gt.f32.partialorder %v916_v59, %v2173_v28  ;;  %vm919_vm14 = vcmp.eq.f32.partialorder %v916_v59, %v2173_v28 }
 0x290   : > { %vm921_vm5 = vmand %vm919_vm14, %vm920_vm15 }
 0x291   : > { %vm922_vm1 = vmor %vm918_vm12, %vm921_vm5 }
 0x292   : > { %v923_v6 = vsel %vm922_vm1, 1, %v2002_v14  ;;  %vm3541_vm15 = vmmov %vm3538_vm2 }
 0x293   : > { %v2889_v20 = vadd.s32 %v948_v31, %v923_v6  ;;  %vm3542_vm14 = vmmov %vm3538_vm2 }
 0x294   : > { %vm3543_vm1 = vmmov %vm3538_vm2 }
 0x295   : > { %973 = vperm.xlu0 %1902, %v2889_v20   ;;  %956 = vperm.xlu2 %1899, %v2889_v20   ;;  %vm1215_vm6 = vcmp.eq.s32.totalorder %v2889_v20, 1  ;;  %vm1241_vm9 = vcmp.eq.s32.totalorder %v2889_v20, 3  ;;  %vm1280_vm0 = vcmp.eq.s32.totalorder %v2889_v20, 6  ;;  %vm1319_vm7 = vcmp.eq.s32.totalorder %v2889_v20, 9 }
 0x296   : > { %951 = vperm.xlu1 %1898, %v2889_v20   ;;  %vm1358_vm8 = vcmp.eq.s32.totalorder %v2889_v20, 12  ;;  %vm1397_vm10 = vcmp.eq.s32.totalorder %v2889_v20, 15  ;;  %vm1436_vm12 = vcmp.eq.s32.totalorder %v2889_v20, 18  ;;  %vm1475_vm5 = vcmp.eq.s32.totalorder %v2889_v20, 21 }
 0x29d   : > { %1907 = vset.pattern.permute.xlu0 %v2010_v36  ;;  %1901 = vset.pattern.permute.xlu2 %v2004_v30  ;;  %v1242_v30 = vsel %vm1241_vm9, %v2173_v28, 0.0  ;;  %v1320_v36 = vsel %vm1319_vm7, %v2173_v28, 0.0  ;;  %vm1514_vm9 = vcmp.eq.s32.totalorder %v2889_v20, 24  ;;  %vm1293_vm7 = vcmp.eq.s32.totalorder %v2889_v20, 7 }
 0x29e   : > { %1900 = vset.pattern.permute.xlu1 %v2001_v13  ;;  %1003 = vperm.xlu0 %1907, %v2889_v20   ;;  %v1216_v13 = vsel %vm1215_vm6, %v2173_v28, 0.0  ;;  %vm1254_vm6 = vcmp.eq.s32.totalorder %v2889_v20, 4  ;;  %v1294_v19 = vsel %vm1293_vm7, %v2173_v28, 0.0 }
 0x29f   : > { %967 = vperm.xlu2 %1901, %v2889_v20   ;;  %961 = vperm.xlu1 %1900, %v2889_v20  }
 0x2a6   : > { %1912 = vset.pattern.permute.xlu0 %v2016_v42 }
 0x2a7   : > { %1904 = vset.pattern.permute.xlu2 %v2007_v33  ;;  %1903 = vset.pattern.permute.xlu1 %v2003_v29  ;;  %v1217_v29 = vsel %vm3536_vm4, %v1216_v13, 0.0  ;;  %vm1202_vm4 = vcmp.eq.s32.totalorder %v2889_v20, 0 }
 0x2a8   : > { %1033 = vperm.xlu0 %1912, %v2889_v20   ;;  %985 = vperm.xlu2 %1904, %v2889_v20  }
 0x2a9   : > { %979 = vperm.xlu1 %1903, %v2889_v20  }
 0x2b0   : > { %1917 = vset.pattern.permute.xlu0 %v2022_v48  ;;  %1906 = vset.pattern.permute.xlu2 %v2008_v34  ;;  %v1281_v34 = vsel %vm1280_vm0, %v2173_v28, 0.0  ;;  %vm3545_vm0 = vmmov %vm3543_vm1 }
 0x2b1   : > { %1905 = vset.pattern.permute.xlu1 %v2006_v32  ;;  %1063 = vperm.xlu0 %1917, %v2889_v20   ;;  %v1243_v32 = vsel %vm3537_vm3, %v1242_v30, 0.0  ;;  %vm3544_vm3 = vmmov %vm3543_vm1 }
 0x2b2   : > { %997 = vperm.xlu2 %1906, %v2889_v20   ;;  %991 = vperm.xlu1 %1905, %v2889_v20   ;;  %vm3553_vm7 = vmmov %vm3545_vm0 }
 0x2b9   : > { %1922 = vset.pattern.permute.xlu0 %v2028_v54 }
 0x2ba   : > { %1909 = vset.pattern.permute.xlu2 %v2013_v39  ;;  %1908 = vset.pattern.permute.xlu1 %v2009_v35  ;;  %v1282_v35 = vsel %vm3538_vm2, %v1281_v34, 0.0  ;;  %vm3546_vm2 = vmmov %vm3545_vm0 }
 0x2bb   : > { %1093 = vperm.xlu0 %1922, %v2889_v20   ;;  %1015 = vperm.xlu2 %1909, %v2889_v20  }
 0x2bc   : > { %1009 = vperm.xlu1 %1908, %v2889_v20  }
 0x2c3   : > { %1927 = vset.pattern.permute.xlu0 %v2034_v62  ;;  %1911 = vset.pattern.permute.xlu2 %v2011_v37  ;;  %v1515_v62 = vsel %vm1514_vm9, %v2173_v28, 0.0  ;;  %vm1371_vm9 = vcmp.eq.s32.totalorder %v2889_v20, 13 }
 0x2c4   : > { %1910 = vset.pattern.permute.xlu1 %v2012_v38  ;;  %1123 = vperm.xlu0 %1927, %v2889_v20   ;;  %v1321_v38 = vsel %vm3539_vm11, %v1320_v36, 0.0  ;;  %v1516_v3 = vsel %vm3546_vm2, %v1515_v62, 0.0  ;;  %vm1228_vm11 = vcmp.eq.s32.totalorder %v2889_v20, 2  ;;  %v1372_v26 = vsel %vm1371_vm9, %v2173_v28, 0.0 }
 0x2c5   : > { %1027 = vperm.xlu2 %1911, %v2889_v20   ;;  %1021 = vperm.xlu1 %1910, %v2889_v20   ;;  %v1229_v22 = vsel %vm1228_vm11, %v2173_v28, 0.0  ;;  %v1373_v21 = vsel %vm3545_vm0, %v1372_v26, 0.0  ;;  %vm1410_vm11 = vcmp.eq.s32.totalorder %v2889_v20, 16  ;;  %vm1384_vm9 = vcmp.eq.s32.totalorder %v2889_v20, 14 }
 0x2c6   : > { %v1411_v31 = vsel %vm1410_vm11, %v2173_v28, 0.0 }
 0x2cc   : > { %1930 = vset.pattern.permute.xlu0 %v2037_v2 }
 0x2cd   : > { %1914 = vset.pattern.permute.xlu2 %v2019_v45  ;;  %1913 = vset.pattern.permute.xlu1 %v2015_v41 }
 0x2ce   : > { %1045 = vperm.xlu2 %1914, %v2889_v20   ;;  %1039 = vperm.xlu1 %1913, %v2889_v20  }
 0x2d6   : > { %1916 = vset.pattern.permute.xlu2 %v2014_v40  ;;  %1915 = vset.pattern.permute.xlu1 %v2018_v44  ;;  %v1359_v40 = vsel %vm1358_vm8, %v2173_v28, 0.0  ;;  %v1398_v44 = vsel %vm1397_vm10, %v2173_v28, 0.0  ;;  %vm1553_vm8 = vcmp.eq.s32.totalorder %v2889_v20, 27  ;;  %vm3548_vm10 = vmmov %vm3545_vm0 }
 0x2d7   : > { %1057 = vperm.xlu2 %1916, %v2889_v20   ;;  %1051 = vperm.xlu1 %1915, %v2889_v20   ;;  %v1360_v41 = vsel %vm3540_vm13, %v1359_v40, 0.0  ;;  %v1399_v45 = vsel %vm3541_vm15, %v1398_v44, 0.0  ;;  %v1554_v18 = vsel %vm1553_vm8, %v2173_v28, 0.0  ;;  %vm3547_vm13 = vmmov %vm3545_vm0  ;;  %v1230_v60 = vsel %vm3548_vm10, %v1229_v22, 0.0 }
 0x2d8   : > { %v1295_v16 = vsel %vm3547_vm13, %v1294_v19, 0.0  ;;  %vm3549_vm15 = vmmov %vm3545_vm0  ;;  %vm1345_vm10 = vcmp.eq.s32.totalorder %v2889_v20, 11 }
 0x2d9   : > { %v1555_v15 = vsel %vm3549_vm15, %v1554_v18, 0.0  ;;  %v1346_v30 = vsel %vm1345_vm10, %v2173_v28, 0.0 }
 0x2df   : > { %1919 = vset.pattern.permute.xlu2 %v2025_v51  ;;  %1918 = vset.pattern.permute.xlu1 %v2021_v47  ;;  %v1437_v47 = vsel %vm1436_vm12, %v2173_v28, 0.0  ;;  %vm1332_vm12 = vcmp.eq.s32.totalorder %v2889_v20, 10 }
 0x2e0   : > { %1075 = vperm.xlu2 %1919, %v2889_v20   ;;  %1069 = vperm.xlu1 %1918, %v2889_v20   ;;  %v1333_v23 = vsel %vm1332_vm12, %v2173_v28, 0.0 }
 0x2e8   : > { %1921 = vset.pattern.permute.xlu2 %v2017_v43  ;;  %1920 = vset.pattern.permute.xlu1 %v2024_v50  ;;  %v1438_v50 = vsel %vm3542_vm14, %v1437_v47, 0.0  ;;  %vm1267_vm14 = vcmp.eq.s32.totalorder %v2889_v20, 5 }
 0x2e9   : > { %1087 = vperm.xlu2 %1921, %v2889_v20   ;;  %1081 = vperm.xlu1 %1920, %v2889_v20   ;;  %v1268_v7 = vsel %vm1267_vm14, %v2173_v28, 0.0 }
 0x2ee   : > { %1218 = vadd.xlane.f32.xlu0 %v1217_v29 }
 0x2ef   : > { %v2952_v33 = vpop.permute.xlu2 %956 }
 0x2f0   : > { %vm958_vm15 = vcmp.eq.s32.totalorder %v2280_v27, %v2952_v33 }
 0x2f1   : > { %1924 = vset.pattern.permute.xlu2 %v2031_v58  ;;  %1923 = vset.pattern.permute.xlu1 %v2027_v53  ;;  %v1476_v53 = vsel %vm1475_vm5, %v2173_v28, 0.0  ;;  %v1255_v58 = vsel %vm1254_vm6, %v2173_v28, 0.0  ;;  %vm1592_vm5 = vcmp.eq.s32.totalorder %v2889_v20, 30  ;;  %vm3551_vm6 = vmmov %vm3545_vm0  ;;  %v959_v33 = vsel %vm958_vm15, 1, %v2002_v14 }
 0x2f2   : > { %1105 = vperm.xlu2 %1924, %v2889_v20   ;;  %1099 = vperm.xlu1 %1923, %v2889_v20   ;;  %v1256_v1 = vsel %vm3544_vm3, %v1255_v58, 0.0  ;;  %v1593_v8 = vsel %vm1592_vm5, %v2173_v28, 0.0  ;;  %v1269_v56 = vsel %vm3551_vm6, %v1268_v7, 0.0  ;;  %vm1306_vm3 = vcmp.eq.s32.totalorder %v2889_v20, 8 }
 0x2f3   : > { %v1307_v4 = vsel %vm1306_vm3, %v2173_v28, 0.0  ;;  %vm1449_vm6 = vcmp.eq.s32.totalorder %v2889_v20, 19 }
 0x2f4   : > { %v1308_v10 = vsel %vm3553_vm7, %v1307_v4, 0.0 }
 0x2f6   : > { %1244 = vadd.xlane.f32.xlu0 %v1243_v32 }
 0x2f9   : > { %v2964_v37 = vpop.permute.xlu2 %967 }
 0x2fa   : > { %1926 = vset.pattern.permute.xlu2 %v2020_v46  ;;  %1925 = vset.pattern.permute.xlu1 %v2030_v57  ;;  %v1477_v57 = vsel %vm3543_vm1, %v1476_v53, 0.0  ;;  %vm3550_vm1 = vmmov %vm3545_vm0  ;;  %vm969_vm8 = vcmp.eq.s32.totalorder %v2280_v27, %v2964_v37  ;;  %v3085_v53 = vshrl.u32 %v244_v25, 7 }
 0x2fb   : > { %1117 = vperm.xlu2 %1926, %v2889_v20   ;;  %1111 = vperm.xlu1 %1925, %v2889_v20   ;;  %v1334_v24 = vsel %vm3550_vm1, %v1333_v23, 0.0  ;;  %v970_v6 = vsel %vm969_vm8, 1, %v2002_v14  ;;  %vm3554_vm1 = vmmov %vm3545_vm0 }
 0x2fc   : > { %v971_v36 = vadd.s32 %v970_v6, %v959_v33  ;;  %vm3556_vm11 = vmmov %vm3554_vm1  ;;  %v1150_v62 = vadd.s32 56, %v3085_v53  ;;  %v1144_v26 = vadd.s32 8, %v3085_v53 }
 0x2fe   : > { %1283 = vadd.xlane.f32.xlu0 %v1282_v35  ;;  %v1412_v35 = vsel %vm3554_vm1, %v1411_v31, 0.0 }
 0x302   : > { %v2974_v42 = vpop.permute.xlu2 %985 }
 0x303   : > { %1929 = vset.pattern.permute.xlu2 %v2037_v2  ;;  %1928 = vset.pattern.permute.xlu1 %v2033_v61  ;;  %v1203_v61 = vsel %vm1202_vm4, %v2173_v28, 0.0  ;;  %vm3552_vm4 = vmmov %vm3545_vm0  ;;  %vm987_vm3 = vcmp.eq.s32.totalorder %v2280_v27, %v2974_v42 }
 0x304   : > { %1135 = vperm.xlu2 %1929, %v2889_v20   ;;  %1129 = vperm.xlu1 %1928, %v2889_v20   ;;  %v1204_v49 = vsel %vm3545_vm0, %v1203_v61, 0.0  ;;  %v1594_v12 = vsel %vm3552_vm4, %v1593_v8, 0.0  ;;  %vm3555_vm4 = vmmov %vm3545_vm0  ;;  %v1145_v8 = vadd.s32 16, %v3085_v53 }
 0x305   : > { %v1347_v37 = vsel %vm3555_vm4, %v1346_v30, 0.0 }
 0x306   : > { %1322 = vadd.xlane.f32.xlu0 %v1321_v38 }
 0x307   : > { %v974_v52 = vpop.permute.xlu0 %973 }
 0x308   : > { %v2970_v39 = vpop.permute.xlu1 %951  ;;  %vm975_vm14 = vcmp.eq.s32.totalorder %v2280_v27, %v974_v52 }
 0x309   : > { %vm953_vm13 = vcmp.eq.s32.totalorder %v2280_v27, %v2970_v39  ;;  %v976_v38 = vsel %vm975_vm14, 1, %v2002_v14 }
 0x30a   : > { %v954_v13 = vsel %vm953_vm13, 1, %v2002_v14  ;;  %vm3557_vm13 = vmmov %vm3554_vm1 }
 0x30c   : > { %v2982_v46 = vpop.permute.xlu2 %997 }
 0x30d   : > { %vm999_vm7 = vcmp.eq.s32.totalorder %v2280_v27, %v2982_v46  ;;  %v1149_v46 = vadd.s32 48, %v3085_v53 }
 0x30e   : > { %1361 = vadd.xlane.f32.xlu0 %v1360_v41 }
 0x30f   : > { %vm1157_vm14 = vcmp.lt.s32.totalorder %v1149_v46, %v2280_v27 }
 0x310   : > { %v1004_v17 = vpop.permute.xlu0 %1003 }
 0x311   : > { %v2977_v43 = vpop.permute.xlu1 %961  ;;  %vm1005_vm0 = vcmp.eq.s32.totalorder %v2280_v27, %v1004_v17 }
 0x312   : > { %vm963_vm2 = vcmp.eq.s32.totalorder %v2280_v27, %v2977_v43  ;;  %v1450_v43 = vsel %vm1449_vm6, %v2173_v28, 0.0 }
 0x313   : > { %v964_v59 = vsel %vm963_vm2, 1, %v2002_v14  ;;  %vm1488_vm2 = vcmp.eq.s32.totalorder %v2889_v20, 22  ;;  %v1451_v42 = vsel %vm3556_vm11, %v1450_v43, 0.0 }
 0x314   : > { %v965_v32 = vadd.s32 %v964_v59, %v954_v13  ;;  %v1489_v22 = vsel %vm1488_vm2, %v2173_v28, 0.0  ;;  %vm3558_vm2 = vmmov %vm3556_vm11 }
 0x315   : > { %v2989_v51 = vpop.permute.xlu2 %1015  ;;  %vm3559_vm11 = vmmov %vm3558_vm2 }
 0x316   : > { %1400 = vadd.xlane.f32.xlu0 %v1399_v45  ;;  %v977_v40 = vadd.s32 %v976_v38, %v965_v32  ;;  %v1385_v45 = vsel %vm1384_vm9, %v2173_v28, 0.0  ;;  %vm1017_vm10 = vcmp.eq.s32.totalorder %v2280_v27, %v2989_v51  ;;  %v2064_v51 = vmov 1.0  }
 0x317   : > { %v1386_v58 = vsel %vm3557_vm13, %v1385_v45, 0.0  ;;  %v1018_v18 = vsel %vm1017_vm10, 1, %v2002_v14  ;;  %vm1153_vm13 = vcmp.lt.s32.totalorder %v1145_v8, %v2280_v27 }
 0x31a   : > { %v1034_v44 = vpop.permute.xlu0 %1033 }
 0x31b   : > { %v2985_v48 = vpop.permute.xlu1 %979 }
 0x31c   : > { %vm981_vm12 = vcmp.eq.s32.totalorder %v2280_v27, %v2985_v48  ;;  %v988_v48 = vsel %vm987_vm3, 1, %v2002_v14  ;;  %vm1035_vm3 = vcmp.eq.s32.totalorder %v2280_v27, %v1034_v44 }
 0x31d   : > { %v982_v34 = vsel %vm981_vm12, 1, %v2002_v14  ;;  %vm1158_vm12 = vcmp.lt.s32.totalorder %v1150_v62, %v2280_v27 }
 0x31e   : > { %1439 = vadd.xlane.f32.xlu0 %v1438_v50  ;;  %v983_v41 = vadd.s32 %v982_v34, %v971_v36  ;;  %1711 = vmatpush.msk.msra.mxu2 %vm1158_vm12, %v2064_v51  ;;  %vm1152_vm12 = vcmp.lt.s32.totalorder %v1144_v26, %v2280_v27 }
 0x31f   : > { %v3001_v2 = vpop.permute.xlu2 %1027 }
 0x320   : > { %vm1029_vm1 = vcmp.eq.s32.totalorder %v2280_v27, %v3001_v2  ;;  %1712 = vmatpush.msk.msra.mxu2 %vm1157_vm14, %v2064_v51 }
 0x323   : > { %v1064_v23 = vpop.permute.xlu0 %1063 }
 0x324   : > { %v2992_v54 = vpop.permute.xlu1 %991  ;;  %vm1065_vm14 = vcmp.eq.s32.totalorder %v2280_v27, %v1064_v23 }
 0x325   : > { %vm993_vm5 = vcmp.eq.s32.totalorder %v2280_v27, %v2992_v54  ;;  %v1006_v54 = vsel %vm1005_vm0, 1, %v2002_v14  ;;  %v1066_v32 = vsel %vm1065_vm14, 1, %v2002_v14  ;;  %vm1540_vm14 = vcmp.eq.s32.totalorder %v2889_v20, 26 }
 0x326   : > { %1478 = vadd.xlane.f32.xlu0 %v1477_v57  ;;  %v994_v39 = vsel %vm993_vm5, 1, %v2002_v14  ;;  %v989_v57 = vadd.s32 %v988_v48, %v977_v40  ;;  %vm1423_vm5 = vcmp.eq.s32.totalorder %v2889_v20, 17 }
 0x327   : > { %v995_v47 = vadd.s32 %v994_v39, %v983_v41  ;;  %v1424_v7 = vsel %vm1423_vm5, %v2173_v28, 0.0  ;;  %vm1151_vm5 = vcmp.lt.s32.totalorder %v3085_v53, %v2280_v27 }
 0x328   : > { %v3017_v0 = vpop.permute.xlu2 %1045 }
 0x329   : > { %v1007_v25 = vadd.s32 %v1006_v54, %v995_v47  ;;  %vm1047_vm10 = vcmp.eq.s32.totalorder %v2280_v27, %v3017_v0 }
 0x32a   : > { %v1048_v13 = vsel %vm1047_vm10, 1, %v2002_v14  ;;  %vm3561_vm10 = vmmov %vm3558_vm2 }
 0x32d   : > { %1257 = vadd.xlane.f32.xlu2 %v1256_v1  ;;  %v1148_v1 = vadd.s32 40, %v3085_v53  ;;  %v1094_v33 = vpop.permute.xlu0 %1093 }
 0x32e   : > { %v3006_v9 = vpop.permute.xlu1 %1009  ;;  %1205 = vadd.xlane.f32.xlu1 %v1204_v49  ;;  %1517 = vadd.xlane.f32.xlu0 %v1516_v3  ;;  %v1000_v49 = vsel %vm999_vm7, 1, %v2002_v14 }
 0x32f   : > { %vm1011_vm8 = vcmp.eq.s32.totalorder %v2280_v27, %v3006_v9  ;;  %v1147_v9 = vadd.s32 32, %v3085_v53  ;;  %v1001_v19 = vadd.s32 %v1000_v49, %v989_v57  ;;  %vm1156_vm6 = vcmp.lt.s32.totalorder %v1148_v1, %v2280_v27 }
 0x330   : > { %v1012_v3 = vsel %vm1011_vm8, 1, %v2002_v14  ;;  %1713 = vmatpush.msk.msra.mxu2 %vm1156_vm6, %v2064_v51  ;;  %vm1527_vm8 = vcmp.eq.s32.totalorder %v2889_v20, 25 }
 0x331   : > { %v3032_v63 = vpop.permute.xlu2 %1057  ;;  %vm1155_vm9 = vcmp.lt.s32.totalorder %v1147_v9, %v2280_v27  ;;  %v1528_v6 = vsel %vm1527_vm8, %v2173_v28, 0.0 }
 0x332   : > { %1714 = vmatpush.msk.msra.mxu2 %vm1155_vm9, %v2064_v51  ;;  %vm1566_vm9 = vcmp.eq.s32.totalorder %v2889_v20, 28 }
 0x333   : > { %v1567_v43 = vsel %vm1566_vm9, %v2173_v28, 0.0  ;;  %vm3563_vm9 = vmmov %vm3558_vm2 }
 0x335   : > { %1296 = vadd.xlane.f32.xlu2 %v1295_v16 }
 0x336   : > { %1231 = vadd.xlane.f32.xlu1 %v1230_v60  ;;  %1556 = vadd.xlane.f32.xlu0 %v1555_v15  ;;  %v1013_v60 = vadd.s32 %v1012_v3, %v1001_v19  ;;  %v1019_v15 = vadd.s32 %v1018_v18, %v1007_v25  ;;  %v1124_v62 = vpop.permute.xlu0 %1123  ;;  %v1541_v19 = vsel %vm1540_vm14, %v2173_v28, 0.0  ;;  %vm3566_vm14 = vmmov %vm3558_vm2 }
 0x337   : > { %v3020_v5 = vpop.permute.xlu1 %1021 }
 0x338   : > { %vm1023_vm15 = vcmp.eq.s32.totalorder %v2280_v27, %v3020_v5  ;;  %v1146_v5 = vadd.s32 24, %v3085_v53  ;;  %v1568_v53 = vsel %vm3561_vm10, %v1567_v43, 0.0 }
 0x339   : > { %v1024_v16 = vsel %vm1023_vm15, 1, %v2002_v14  ;;  %vm1462_vm15 = vcmp.eq.s32.totalorder %v2889_v20, 20 }
 0x33a   : > { %v3058_v29 = vpop.permute.xlu2 %1075  ;;  %v1025_v52 = vadd.s32 %v1024_v16, %v1013_v60  ;;  %vm1154_vm7 = vcmp.lt.s32.totalorder %v1146_v5, %v2280_v27  ;;  %v1463_v30 = vsel %vm1462_vm15, %v2173_v28, 0.0  ;;  %vm3562_vm15 = vmmov %vm3558_vm2  ;;  %v1542_v16 = vsel %vm3563_vm9, %v1541_v19, 0.0 }
 0x33b   : > { %1715 = vmatpush.msk.msra.mxu2 %vm1154_vm7, %v2064_v51  ;;  %vm1501_vm7 = vcmp.eq.s32.totalorder %v2889_v20, 23  ;;  %vm3568_vm9 = vmmov %vm3558_vm2 }
 0x33c   : > { %v1502_v47 = vsel %vm1501_vm7, %v2173_v28, 0.0 }
 0x33d   : > { %1335 = vadd.xlane.f32.xlu2 %v1334_v24  ;;  %1716 = vmatpush.msk.msra.mxu2 %vm1153_vm13, %v2064_v51  ;;  %vm1095_vm13 = vcmp.eq.s32.totalorder %v2280_v27, %v1094_v33 }
 0x33e   : > { %1270 = vadd.xlane.f32.xlu1 %v1269_v56  ;;  %1595 = vadd.xlane.f32.xlu0 %v1594_v12  ;;  %v1490_v56 = vsel %vm3558_vm2, %v1489_v22, 0.0  ;;  %v1030_v12 = vsel %vm1029_vm1, 1, %v2002_v14  ;;  %vm1059_vm1 = vcmp.eq.s32.totalorder %v2280_v27, %v3032_v63  ;;  %v1464_v63 = vsel %vm3558_vm2, %v1463_v30, 0.0 }
 0x33f   : > { %v1031_v4 = vadd.s32 %v1030_v12, %v1019_v15  ;;  %1717 = vmatpush.msk.msra.mxu2 %vm1152_vm12, %v2064_v51 }
 0x340   : > { %v3034_v11 = vpop.permute.xlu1 %1039 }
 0x341   : > { %vm1041_vm4 = vcmp.eq.s32.totalorder %v2280_v27, %v3034_v11  ;;  %1718 = vmatpush.msk.msra.mxu2 %vm1151_vm5, %v2064_v51 }
 0x342   : > { %v1042_v11 = vsel %vm1041_vm4, 1, %v2002_v14  ;;  %vm3560_vm4 = vmmov %vm3558_vm2 }
 0x343   : > { %v3091_v61 = vpop.permute.xlu2 %1087 }
 0x345   : > { %1374 = vadd.xlane.f32.xlu2 %v1373_v21  ;;  %v1425_v21 = vsel %vm3559_vm11, %v1424_v7, 0.0  ;;  %vm1089_vm11 = vcmp.eq.s32.totalorder %v2280_v27, %v3091_v61  ;;  %v1096_v61 = vsel %vm1095_vm13, 1, %v2002_v14 }
 0x346   : > { %1309 = vadd.xlane.f32.xlu1 %v1308_v10  ;;  %v1036_v10 = vsel %vm1035_vm3, 1, %v2002_v14  ;;  %vm1077_vm3 = vcmp.eq.s32.totalorder %v2280_v27, %v3058_v29 }
 0x347   : > { %v1037_v2 = vadd.s32 %v1036_v10, %v1025_v52  ;;  %v1078_v40 = vsel %vm1077_vm3, 1, %v2002_v14 }
 0x349   : > { %v3053_v55 = vpop.permute.xlu1 %1051  ;;  %v1049_v0 = vadd.s32 %v1048_v13, %v1037_v2 }
 0x34a   : > { %vm1053_vm0 = vcmp.eq.s32.totalorder %v2280_v27, %v3053_v55  ;;  %v1043_v55 = vadd.s32 %v1042_v11, %v1031_v4  ;;  %v2065_v11 = vmov 0.0  }
 0x34b   : > { %v1054_v17 = vsel %vm1053_vm0, 1, %v2002_v14 }
 0x34c   : > { %v3134_v59 = vpop.permute.xlu2 %1105  ;;  %v1055_v31 = vadd.s32 %v1054_v17, %v1043_v55 }
 0x34d   : > { %1413 = vadd.xlane.f32.xlu2 %v1412_v35  ;;  %v1529_v35 = vsel %vm3560_vm4, %v1528_v6, 0.0  ;;  %vm1107_vm5 = vcmp.eq.s32.totalorder %v2280_v27, %v3134_v59  ;;  %v3203_v59 = vld [vmem:[%s2160_s24] sm:$0xff]  ;;  %s1956_s24 = scalar_lea.hbm %s3468_s3, 16 }
 0x34e   : > { %1348 = vadd.xlane.f32.xlu1 %v1347_v37  ;;  %v1067_v36 = vadd.s32 %v1066_v32, %v1055_v31  ;;  %v1060_v37 = vsel %vm1059_vm1, 1, %v2002_v14  ;;  %vm1125_vm1 = vcmp.eq.s32.totalorder %v2280_v27, %v1124_v62  ;;  %v1108_v3 = vsel %vm1107_vm5, 1, %v2002_v14  ;;  %vm3567_vm5 = vmmov %vm3558_vm2  ;;  %p1958_p1 = scmp.lt.s32.totalorder %s1956_s24, %s1952_s17 }
 0x34f   : > { %v1061_v39 = vadd.s32 %v1060_v37, %v1049_v0  ;;  %v1126_v51 = vsel %vm1125_vm1, 1, %v2002_v14 }
 0x350   : > { %v1079_v45 = vadd.s32 %v1078_v40, %v1067_v36  ;;  %p1959_p2 = por %p1958_p1, %p1957_p0 }
 0x352   : > { %v3081_v50 = vpop.permute.xlu1 %1069  ;;  %p1960_p3 = pnand %p1959_p2, %p1955_p13 }
 0x353   : > { %vm1071_vm6 = vcmp.eq.s32.totalorder %v2280_v27, %v3081_v50  ;;  %v1090_v50 = vsel %vm1089_vm11, 1, %v2002_v14  ;;  %vm3564_vm11 = vmmov %vm3558_vm2 }
 0x354   : > { %v1072_v38 = vsel %vm1071_vm6, 1, %v2002_v14  ;;  %v1091_v54 = vadd.s32 %v1090_v50, %v1079_v45 }
 0x355   : > { %1452 = vadd.xlane.f32.xlu2 %v1451_v42  ;;  %v1118_v41 = vpop.permute.xlu2 %1117  ;;  %v1073_v44 = vadd.s32 %v1072_v38, %v1061_v39 }
 0x356   : > { %1387 = vadd.xlane.f32.xlu1 %v1386_v58  ;;  %v1503_v58 = vsel %vm3562_vm15, %v1502_v47, 0.0  ;;  %vm1119_vm6 = vcmp.eq.s32.totalorder %v2280_v27, %v1118_v41 }
 0x357   : > { %v1120_v60 = vsel %vm1119_vm6, 1, %v2002_v14 }
 0x35b   : > { %v1082_v24 = vpop.permute.xlu1 %1081 }
 0x35c   : > { %vm1083_vm0 = vcmp.eq.s32.totalorder %v2280_v27, %v1082_v24 }
 0x35d   : > { %1491 = vadd.xlane.f32.xlu2 %v1490_v56  ;;  %v1084_v29 = vsel %vm1083_vm0, 1, %v2002_v14  ;;  %vm1579_vm0 = vcmp.eq.s32.totalorder %v2889_v20, 29 }
 0x35e   : > { %1426 = vadd.xlane.f32.xlu1 %v1425_v21  ;;  %v1085_v48 = vadd.s32 %v1084_v29, %v1073_v44  ;;  %v1136_v9 = vpop.permute.xlu2 %1135  ;;  %v1580_v24 = vsel %vm1579_vm0, %v2173_v28, 0.0  ;;  %vm3570_vm0 = vmmov %vm3558_vm2 }
 0x35f   : > { %vm1137_vm4 = vcmp.eq.s32.totalorder %v2280_v27, %v1136_v9  ;;  %v1581_v12 = vsel %vm3558_vm2, %v1580_v24, 0.0 }
 0x360   : > { %v1097_v46 = vadd.s32 %v1096_v61, %v1085_v48  ;;  %v1138_v23 = vsel %vm1137_vm4, 1, %v2002_v14 }
 0x362   : > { %v1109_v22 = vadd.s32 %v1108_v3, %v1097_v46 }
 0x364   : > { %v1100_v34 = vpop.permute.xlu1 %1099  ;;  %v1121_v5 = vadd.s32 %v1120_v60, %v1109_v22 }
 0x365   : > { %1530 = vadd.xlane.f32.xlu2 %v1529_v35  ;;  %vm1101_vm8 = vcmp.eq.s32.totalorder %v2280_v27, %v1100_v34  ;;  %v3217_v34 = vpop.xlane.xlu0 %1218 }
 0x366   : > { %1465 = vadd.xlane.f32.xlu1 %v1464_v63  ;;  %v1102_v42 = vsel %vm1101_vm8, 1, %v2002_v14 }
 0x367   : > { %v1103_v1 = vadd.s32 %v1102_v42, %v1091_v54 }
 0x36d   : > { %v1112_v57 = vpop.permute.xlu1 %1111  ;;  %1569 = vadd.xlane.f32.xlu2 %v1568_v53  ;;  %v3233_v44 = vpop.xlane.xlu0 %1244 }
 0x36e   : > { %vm1113_vm12 = vcmp.eq.s32.totalorder %v2280_v27, %v1112_v57  ;;  %1504 = vadd.xlane.f32.xlu1 %v1503_v58 }
 0x36f   : > { %v1114_v49 = vsel %vm1113_vm12, 1, %v2002_v14  ;;  %vm3565_vm12 = vmmov %vm3558_vm2 }
 0x370   : > { %v1115_v25 = vadd.s32 %v1114_v49, %v1103_v1 }
 0x372   : > { %v1127_v18 = vadd.s32 %v1126_v51, %v1115_v25 }
 0x374   : > { %v1139_v52 = vadd.s32 %v1138_v23, %v1127_v18 }
 0x375   : > { %v3249_v57 = vpop.xlane.xlu0 %1283 }
 0x376   : > { %v1130_v15 = vpop.permute.xlu1 %1129  ;;  %1543 = vadd.xlane.f32.xlu1 %v1542_v16 }
 0x377   : > { %vm1131_vm3 = vcmp.eq.s32.totalorder %v2280_v27, %v1130_v15 }
 0x378   : > { %v1132_v7 = vsel %vm1131_vm3, 1, %v2002_v14  ;;  %vm3569_vm3 = vmmov %vm3558_vm2 }
 0x379   : > { %v1133_v8 = vadd.s32 %v1132_v7, %v1121_v5 }
 0x37b   : > { %v1140_v56 = vadd.s32 %v1139_v52, %v1133_v8 }
 0x37d   : > { %vm1141_vm7 = vcmp.gt.s32.totalorder %v1140_v56, 0  ;;  %v3266_v22 = vpop.xlane.xlu0 %1322 }
 0x37e   : > { %1582 = vadd.xlane.f32.xlu1 %v1581_v12  ;;  %v1710_v26 = vsel %vm1141_vm7, 1.0, %v2065_v11 }
 0x37f   : > { %1719 = vmatmul.msk.f32.vlgmr.msra.gmra.mxu2 %vm3564_vm11, %v1710_v26 }
 0x385   : > { %v3282_v52 = vpop.xlane.xlu0 %1361 }
 0x3a0   : > { %v3251_v58 = vpop.xlane.xlu2 %1257 }
 0x3a1   : > { %v3221_v63 = vpop.xlane.xlu1 %1205 }
 0x3a8   : > { %v3268_v51 = vpop.xlane.xlu2 %1296 }
 0x3a9   : > { %v3237_v45 = vpop.xlane.xlu1 %1231 }
 0x3b0   : > { %v3284_v24 = vpop.xlane.xlu2 %1335 }
 0x3b1   : > { %v3253_v61 = vpop.xlane.xlu1 %1270 }
 0x3b9   : > { %v3271_v16 = vpop.xlane.xlu1 %1309 }
 0x3c1   : > { %v3288_v11 = vpop.xlane.xlu1 %1348 }
 0x402   : > { %v1197_v27 = vpop.f32.mrf.mxu2 }
 0x403   : > { %vm1724_vm8 = vcmp.lt.s32.totalorder %v1197_v27, 0  ;;  %v1725_v4 = vceil.f32 %v1197_v27  ;;  %v1726_v21 = vfloor.f32 %v1197_v27 }
 0x405   : > { %v1727_v10 = vsel %vm1724_vm8, %v1725_v4, %v1726_v21  ;;  %vm3571_vm8 = vmmov %vm3570_vm0 }
 0x406   : > { %v1728_v14 = vcvt.f32.s32 %v1727_v10 }
 0x408   : > { %v3197_v17 = vsel %vm1141_vm7, %v1728_v14, 4294967295 }
 0x409   : > { %vm1207_vm13 = vcmp.eq.s32.totalorder %v3197_v17, 0  ;;  %vm1259_vm10 = vcmp.eq.s32.totalorder %v3197_v17, 4  ;;  %vm1246_vm15 = vcmp.eq.s32.totalorder %v3197_v17, 3  ;;  %vm1220_vm1 = vcmp.eq.s32.totalorder %v3197_v17, 1 }
 0x40a   : > { %v1208_v2 = vsel %vm1207_vm13, %v3203_v59, 0.0  ;;  %v1260_v55 = vsel %vm1259_vm10, %v3203_v59, 0.0  ;;  %v1247_v31 = vsel %vm1246_vm15, %v3203_v59, 0.0  ;;  %vm1298_vm6 = vcmp.eq.s32.totalorder %v3197_v17, 7  ;;  %vm3572_vm13 = vmmov %vm3570_vm0 }
 0x40b   : > { %v1209_v6 = vsel %vm3565_vm12, %v1208_v2, 0.0  ;;  %v1261_v13 = vsel %vm3566_vm14, %v1260_v55, 0.0  ;;  %v1248_v30 = vsel %vm3567_vm5, %v1247_v31, 0.0  ;;  %vm1285_vm4 = vcmp.eq.s32.totalorder %v3197_v17, 6  ;;  %vm3573_vm10 = vmmov %vm3570_vm0  ;;  %v3300_v55 = vpop.xlane.xlu0 %1400  ;;  %v3302_v31 = vpop.xlane.xlu2 %1374 }
 0x40c   : > { %1210 = vadd.xlane.f32.xlu2 %v1209_v6  ;;  %1262 = vadd.xlane.f32.xlu0 %v1261_v13  ;;  %v1221_v0 = vsel %vm1220_vm1, %v3203_v59, 0.0  ;;  %v1299_v32 = vsel %vm1298_vm6, %v3203_v59, 0.0  ;;  %v1286_v33 = vsel %vm1285_vm4, %v3203_v59, 0.0  ;;  %vm1233_vm2 = vcmp.eq.s32.totalorder %v3197_v17, 2  ;;  %vm3574_vm5 = vmmov %vm3570_vm0  ;;  %v3306_v6 = vpop.xlane.xlu1 %1387 }
 0x40d   : > { %1249 = vadd.xlane.f32.xlu1 %v1248_v30  ;;  %v1222_v35 = vsel %vm3568_vm9, %v1221_v0, 0.0  ;;  %v1300_v36 = vsel %vm3569_vm3, %v1299_v32, 0.0  ;;  %v1287_v37 = vsel %vm3570_vm0, %v1286_v33, 0.0  ;;  %vm1337_vm7 = vcmp.eq.s32.totalorder %v3197_v17, 10  ;;  %vm3575_vm1 = vmmov %vm3570_vm0 }
 0x40e   : > { %vm1324_vm11 = vcmp.eq.s32.totalorder %v3197_v17, 9  ;;  %v1234_v38 = vsel %vm1233_vm2, %v3203_v59, 0.0  ;;  %v1338_v39 = vsel %vm1337_vm7, %v3203_v59, 0.0  ;;  %vm1272_vm15 = vcmp.eq.s32.totalorder %v3197_v17, 5  ;;  %vm3576_vm6 = vmmov %vm3570_vm0 }
 0x40f   : > { %v1325_v40 = vsel %vm1324_vm11, %v3203_v59, 0.0  ;;  %v1235_v41 = vsel %vm3571_vm8, %v1234_v38, 0.0  ;;  %v1339_v29 = vsel %vm3572_vm13, %v1338_v39, 0.0  ;;  %vm1376_vm12 = vcmp.eq.s32.totalorder %v3197_v17, 13  ;;  %vm3577_vm2 = vmmov %vm3570_vm0 }
 0x410   : > { %v1326_v43 = vsel %vm3573_vm10, %v1325_v40, 0.0  ;;  %vm1363_vm14 = vcmp.eq.s32.totalorder %v3197_v17, 12  ;;  %v1273_v47 = vsel %vm1272_vm15, %v3203_v59, 0.0  ;;  %v1377_v48 = vsel %vm1376_vm12, %v3203_v59, 0.0  ;;  %vm3578_vm7 = vmmov %vm3570_vm0 }
 0x411   : > { %v1364_v50 = vsel %vm1363_vm14, %v3203_v59, 0.0  ;;  %v1274_v42 = vsel %vm3574_vm5, %v1273_v47, 0.0  ;;  %v1378_v53 = vsel %vm3575_vm1, %v1377_v48, 0.0  ;;  %vm1311_vm4 = vcmp.eq.s32.totalorder %v3197_v17, 8  ;;  %vm3579_vm10 = vmmov %vm3570_vm0 }
 0x412   : > { %v1365_v54 = vsel %vm3576_vm6, %v1364_v50, 0.0  ;;  %vm1415_vm9 = vcmp.eq.s32.totalorder %v3197_v17, 16  ;;  %vm1402_vm3 = vcmp.eq.s32.totalorder %v3197_v17, 15  ;;  %v1312_v62 = vsel %vm1311_vm4, %v3203_v59, 0.0  ;;  %vm3580_vm15 = vmmov %vm3570_vm0 }
 0x413   : > { %v1416_v46 = vsel %vm1415_vm9, %v3203_v59, 0.0  ;;  %v1403_v1 = vsel %vm1402_vm3, %v3203_v59, 0.0  ;;  %v1313_v49 = vsel %vm3570_vm0, %v1312_v62, 0.0  ;;  %vm1350_vm11 = vcmp.eq.s32.totalorder %v3197_v17, 11  ;;  %vm3581_vm12 = vmmov %vm3570_vm0 }
 0x414   : > { %1223 = vadd.xlane.f32.xlu2 %v1222_v35  ;;  %1301 = vadd.xlane.f32.xlu0 %v1300_v36  ;;  %v1417_v25 = vsel %vm3577_vm2, %v1416_v46, 0.0  ;;  %v1404_v3 = vsel %vm3578_vm7, %v1403_v1, 0.0  ;;  %vm1454_vm8 = vcmp.eq.s32.totalorder %v3197_v17, 19  ;;  %vm1441_vm13 = vcmp.eq.s32.totalorder %v3197_v17, 18  ;;  %vm3582_vm6 = vmmov %vm3570_vm0  ;;  %v3318_v36 = vpop.xlane.xlu0 %1439  ;;  %v3322_v38 = vpop.xlane.xlu1 %1426 }
 0x415   : > { %1288 = vadd.xlane.f32.xlu1 %v1287_v37  ;;  %v1351_v9 = vsel %vm1350_vm11, %v3203_v59, 0.0  ;;  %v1455_v19 = vsel %vm1454_vm8, %v3203_v59, 0.0  ;;  %v1442_v18 = vsel %vm1441_vm13, %v3203_v59, 0.0  ;;  %vm1389_vm14 = vcmp.eq.s32.totalorder %v3197_v17, 14  ;;  %vm3583_vm4 = vmmov %vm3570_vm0  ;;  %v3320_v37 = vpop.xlane.xlu2 %1413 }
 0x416   : > { %v1352_v60 = vsel %vm3579_vm10, %v1351_v9, 0.0  ;;  %v1456_v15 = vsel %vm3580_vm15, %v1455_v19, 0.0  ;;  %v1443_v5 = vsel %vm3581_vm12, %v1442_v18, 0.0  ;;  %vm1493_vm5 = vcmp.eq.s32.totalorder %v3197_v17, 22  ;;  %vm3584_vm9 = vmmov %vm3570_vm0 }
 0x417   : > { %vm1480_vm1 = vcmp.eq.s32.totalorder %v3197_v17, 21  ;;  %v1390_v23 = vsel %vm1389_vm14, %v3203_v59, 0.0  ;;  %v1494_v7 = vsel %vm1493_vm5, %v3203_v59, 0.0  ;;  %vm1428_vm3 = vcmp.eq.s32.totalorder %v3197_v17, 17  ;;  %vm3585_vm7 = vmmov %vm3583_vm4 }
 0x418   : > { %v1481_v8 = vsel %vm1480_vm1, %v3203_v59, 0.0  ;;  %v1391_v56 = vsel %vm3582_vm6, %v1390_v23, 0.0  ;;  %v1495_v12 = vsel %vm3583_vm4, %v1494_v7, 0.0  ;;  %vm1532_vm0 = vcmp.eq.s32.totalorder %v3197_v17, 25  ;;  %vm3586_vm11 = vmmov %vm3583_vm4 }
 0x419   : > { %v1482_v26 = vsel %vm3584_vm9, %v1481_v8, 0.0  ;;  %vm1519_vm2 = vcmp.eq.s32.totalorder %v3197_v17, 24  ;;  %v1429_v27 = vsel %vm1428_vm3, %v3203_v59, 0.0  ;;  %v1533_v4 = vsel %vm1532_vm0, %v3203_v59, 0.0  ;;  %vm3587_vm8 = vmmov %vm3583_vm4 }
 0x41a   : > { %v1520_v21 = vsel %vm1519_vm2, %v3203_v59, 0.0  ;;  %v1430_v10 = vsel %vm3585_vm7, %v1429_v27, 0.0  ;;  %v1534_v14 = vsel %vm3586_vm11, %v1533_v4, 0.0  ;;  %vm1467_vm13 = vcmp.eq.s32.totalorder %v3197_v17, 20  ;;  %vm3588_vm12 = vmmov %vm3583_vm4 }
 0x41b   : > { %v1521_v2 = vsel %vm3587_vm8, %v1520_v21, 0.0  ;;  %vm1571_vm10 = vcmp.eq.s32.totalorder %v3197_v17, 28  ;;  %vm1558_vm15 = vcmp.eq.s32.totalorder %v3197_v17, 27  ;;  %v1468_v13 = vsel %vm1467_vm13, %v3203_v59, 0.0  ;;  %vm3589_vm14 = vmmov %vm3583_vm4 }
 0x41c   : > { %1236 = vadd.xlane.f32.xlu2 %v1235_v41  ;;  %1340 = vadd.xlane.f32.xlu0 %v1339_v29  ;;  %v1572_v30 = vsel %vm1571_vm10, %v3203_v59, 0.0  ;;  %v1559_v0 = vsel %vm1558_vm15, %v3203_v59, 0.0  ;;  %v1469_v32 = vsel %vm3588_vm12, %v1468_v13, 0.0  ;;  %vm3590_vm5 = vmmov %vm3583_vm4  ;;  %vm1506_vm1 = vcmp.eq.s32.totalorder %v3197_v17, 23  ;;  %v3332_v50 = vpop.xlane.xlu0 %1478 }
 0x41d   : > { %1327 = vadd.xlane.f32.xlu1 %v1326_v43  ;;  %v1573_v33 = vsel %vm3589_vm14, %v1572_v30, 0.0  ;;  %v1560_v35 = vsel %vm3590_vm5, %v1559_v0, 0.0  ;;  %vm1610_vm6 = vcmp.eq.s32.totalorder %v3197_v17, 31  ;;  %vm1597_vm4 = vcmp.eq.s32.totalorder %v3197_v17, 30  ;;  %vm3591_vm9 = vmmov %vm3590_vm5 }
 0x41e   : > { %v1507_v39 = vsel %vm1506_vm1, %v3203_v59, 0.0  ;;  %v1611_v40 = vsel %vm1610_vm6, %v3203_v59, 0.0  ;;  %v1598_v41 = vsel %vm1597_vm4, %v3203_v59, 0.0  ;;  %vm3592_vm3 = vmmov %vm3590_vm5  ;;  %vm1545_vm2 = vcmp.eq.s32.totalorder %v3197_v17, 26 }
 0x41f   : > { %v1508_v29 = vsel %vm3591_vm9, %v1507_v39, 0.0  ;;  %v1612_v43 = vsel %vm3592_vm3, %v1611_v40, 0.0  ;;  %vm3593_vm0 = vmmov %vm3592_vm3  ;;  %v1546_v48 = vsel %vm1545_vm2, %v3203_v59, 0.0  ;;  %vm1584_vm11 = vcmp.eq.s32.totalorder %v3197_v17, 29 }
 0x420   : > { %v1599_v47 = vsel %vm3593_vm0, %v1598_v41, 0.0  ;;  %vm3594_vm7 = vmmov %vm3593_vm0  ;;  %v1585_v62 = vsel %vm1584_vm11, %v3203_v59, 0.0  ;;  %vm1605_vm13 = vcmp.eq.s32.totalorder %v2889_v20, 31  ;;  %vm1213_vm15 = vcmask 7168  }
 0x421   : > { %vm3595_vm8 = vmmov %vm3593_vm0  ;;  %vm1226_vm12 = vcmask 15368   ;;  %vm1239_vm14 = vcmask 23568   ;;  %vm1252_vm5 = vcmask 31768   ;;  %vm1265_vm1 = vcmask 39968  }
 0x422   : > { %vm3596_vm10 = vmmov %vm3593_vm0  ;;  %vm1278_vm6 = vcmask 48168   ;;  %vm1291_vm4 = vcmask 56368   ;;  %vm1304_vm9 = vcmask 64568   ;;  %vm1317_vm3 = vcmask 72768  }
 0x423   : > { %vm1330_vm0 = vcmask 80968   ;;  %vm1343_vm2 = vcmask 89168   ;;  %vm1369_vm11 = vcmask 105568  }
 0x424   : > { %1275 = vadd.xlane.f32.xlu2 %v1274_v42  ;;  %1379 = vadd.xlane.f32.xlu0 %v1378_v53  ;;  %v3334_v42 = vpop.xlane.xlu2 %1452  ;;  %v3336_v53 = vpop.xlane.xlu1 %1465 }
 0x425   : > { %1366 = vadd.xlane.f32.xlu1 %v1365_v54  ;;  %v1547_v54 = vsel %vm3594_vm7, %v1546_v48, 0.0  ;;  %v3341_v46 = vpop.xlane.xlu0 %1517  ;;  %vm1356_vm7 = vcmask 97368  }
 0x42c   : > { %1314 = vadd.xlane.f32.xlu2 %v1313_v49  ;;  %1418 = vadd.xlane.f32.xlu0 %v1417_v25  ;;  %v3343_v1 = vpop.xlane.xlu2 %1491  ;;  %v1586_v49 = vsel %vm3595_vm8, %v1585_v62, 0.0  ;;  %v3346_v25 = vpop.xlane.xlu1 %1504  ;;  %vm1382_vm8 = vcmask 113768  }
 0x42d   : > { %1405 = vadd.xlane.f32.xlu1 %v1404_v3  ;;  %v1606_v3 = vsel %vm1605_vm13, %v2173_v28, 0.0  ;;  %v3351_v17 = vpop.xlane.xlu0 %1556  ;;  %vm1395_vm13 = vcmask 121968  }
 0x42e   : > { %v1607_v9 = vsel %vm3596_vm10, %v1606_v3, 0.0  ;;  %vm1408_vm10 = vcmask 130168  }
 0x434   : > { %1353 = vadd.xlane.f32.xlu2 %v1352_v60  ;;  %1457 = vadd.xlane.f32.xlu0 %v1456_v15  ;;  %v3353_v59 = vpop.xlane.xlu2 %1530  ;;  %v3355_v19 = vpop.xlane.xlu1 %1543 }
 0x435   : > { %1444 = vadd.xlane.f32.xlu1 %v1443_v5  ;;  %v3357_v18 = vpop.xlane.xlu0 %1595 }
 0x43c   : > { %1392 = vadd.xlane.f32.xlu2 %v1391_v56  ;;  %1496 = vadd.xlane.f32.xlu0 %v1495_v12  ;;  %v3359_v60 = vpop.xlane.xlu2 %1569  ;;  %v3361_v15 = vpop.xlane.xlu1 %1582 }
 0x43d   : > { %1483 = vadd.xlane.f32.xlu1 %v1482_v26 }
 0x444   : > { %1431 = vadd.xlane.f32.xlu2 %v1430_v10  ;;  %1535 = vadd.xlane.f32.xlu0 %v1534_v14 }
 0x445   : > { %1522 = vadd.xlane.f32.xlu1 %v1521_v2 }
 0x44c   : > { %1470 = vadd.xlane.f32.xlu2 %v1469_v32  ;;  %1574 = vadd.xlane.f32.xlu0 %v1573_v33 }
 0x44d   : > { %1561 = vadd.xlane.f32.xlu1 %v1560_v35 }
 0x454   : > { %1509 = vadd.xlane.f32.xlu2 %v1508_v29  ;;  %1613 = vadd.xlane.f32.xlu0 %v1612_v43 }
 0x455   : > { %1600 = vadd.xlane.f32.xlu1 %v1599_v47 }
 0x45c   : > { %1548 = vadd.xlane.f32.xlu2 %v1547_v54 }
 0x464   : > { %1587 = vadd.xlane.f32.xlu2 %v1586_v49 }
 0x46c   : > { %1608 = vadd.xlane.f32.xlu2 %v1607_v9 }
 0x47f   : > { %v1211_v28 = vpop.xlane.xlu2 %1210  ;;  %v1263_v20 = vpop.xlane.xlu0 %1262 }
 0x480   : > { %v1212_v5 = vmul.f32 %v1211_v28, %v3221_v63  ;;  %v1250_v23 = vpop.xlane.xlu1 %1249  ;;  %v1264_v21 = vmul.f32 %v1263_v20, %v3251_v58 }
 0x481   : > { %v1251_v4 = vmul.f32 %v1250_v23, %v3233_v44 }
 0x482   : > { %1214 = vst.msk [vmem:[%s3367_s4] sm:$0xff] %vm1213_vm15, %v1212_v5  ;;  %vm1421_vm15 = vcmask 138368  }
 0x487   : > { %v1224_v7 = vpop.xlane.xlu2 %1223  ;;  %v1302_v12 = vpop.xlane.xlu0 %1301 }
 0x488   : > { %v1225_v8 = vmul.f32 %v1224_v7, %v3217_v34  ;;  %v1289_v56 = vpop.xlane.xlu1 %1288  ;;  %v1303_v44 = vmul.f32 %v1302_v12, %v3268_v51 }
 0x48a   : > { %1227 = vst.msk [vmem:[%s3367_s4] sm:$0xff] %vm1226_vm12, %v1225_v8  ;;  %vm1434_vm12 = vcmask 146568  }
 0x48f   : > { %v1237_v26 = vpop.xlane.xlu2 %1236  ;;  %v1341_v34 = vpop.xlane.xlu0 %1340 }
 0x490   : > { %v1238_v63 = vmul.f32 %v1237_v26, %v3237_v45  ;;  %v1328_v27 = vpop.xlane.xlu1 %1327  ;;  %v1290_v45 = vmul.f32 %v1289_v56, %v3249_v57  ;;  %v1342_v57 = vmul.f32 %v1341_v34, %v3284_v24 }
 0x492   : > { %1240 = vst.msk [vmem:[%s3367_s4] sm:$0xff] %vm1239_vm14, %v1238_v63  ;;  %vm1447_vm14 = vcmask 154768  }
 0x493   : > { %1253 = vst.msk [vmem:[%s3367_s4] sm:$0xff] %vm1252_vm5, %v1251_v4  ;;  %vm1460_vm5 = vcmask 162968  }
 0x494   : > { %1266 = vst.msk [vmem:[%s3367_s4] sm:$0xff] %vm1265_vm1, %v1264_v21  ;;  %vm1473_vm1 = vcmask 171168  }
 0x497   : > { %v1276_v10 = vpop.xlane.xlu2 %1275  ;;  %v1380_v58 = vpop.xlane.xlu0 %1379 }
 0x498   : > { %v1277_v14 = vmul.f32 %v1276_v10, %v3253_v61  ;;  %v1367_v2 = vpop.xlane.xlu1 %1366  ;;  %v1329_v61 = vmul.f32 %v1328_v27, %v3266_v22  ;;  %v1381_v22 = vmul.f32 %v1380_v58, %v3302_v31 }
 0x49a   : > { %1279 = vst.msk [vmem:[%s3367_s4] sm:$0xff] %vm1278_vm6, %v1277_v14  ;;  %vm1486_vm6 = vcmask 179368  }
 0x49b   : > { %1292 = vst.msk [vmem:[%s3367_s4] sm:$0xff] %vm1291_vm4, %v1290_v45  ;;  %vm1499_vm4 = vcmask 187568  }
 0x49c   : > { %1305 = vst.msk [vmem:[%s3367_s4] sm:$0xff] %vm1304_vm9, %v1303_v44  ;;  %vm1512_vm9 = vcmask 195768  }
 0x49f   : > { %v1315_v13 = vpop.xlane.xlu2 %1314  ;;  %v1419_v0 = vpop.xlane.xlu0 %1418 }
 0x4a0   : > { %v1316_v30 = vmul.f32 %v1315_v13, %v3271_v16  ;;  %v1406_v51 = vpop.xlane.xlu1 %1405  ;;  %v1368_v16 = vmul.f32 %v1367_v2, %v3282_v52  ;;  %v1420_v52 = vmul.f32 %v1419_v0, %v3320_v37 }
 0x4a2   : > { %1318 = vst.msk [vmem:[%s3367_s4] sm:$0xff] %vm1317_vm3, %v1316_v30  ;;  %vm1525_vm3 = vcmask 203968  }
 0x4a3   : > { %1331 = vst.msk [vmem:[%s3367_s4] sm:$0xff] %vm1330_vm0, %v1329_v61  ;;  %vm1538_vm0 = vcmask 212168  }
 0x4a4   : > { %1344 = vst.msk [vmem:[%s3367_s4] sm:$0xff] %vm1343_vm2, %v1342_v57  ;;  %vm1551_vm2 = vcmask 220368  }
 0x4a7   : > { %v1354_v32 = vpop.xlane.xlu2 %1353  ;;  %v1458_v40 = vpop.xlane.xlu0 %1457 }
 0x4a8   : > { %v1355_v33 = vmul.f32 %v1354_v32, %v3288_v11  ;;  %v1445_v24 = vpop.xlane.xlu1 %1444  ;;  %v1407_v11 = vmul.f32 %v1406_v51, %v3300_v55  ;;  %v1459_v55 = vmul.f32 %v1458_v40, %v3334_v42 }
 0x4aa   : > { %1357 = vst.msk [vmem:[%s3367_s4] sm:$0xff] %vm1356_vm7, %v1355_v33  ;;  %vm1564_vm7 = vcmask 228568  }
 0x4ab   : > { %1370 = vst.msk [vmem:[%s3367_s4] sm:$0xff] %vm1369_vm11, %v1368_v16  ;;  %vm1577_vm11 = vcmask 236768  }
 0x4ac   : > { %1383 = vst.msk [vmem:[%s3367_s4] sm:$0xff] %vm1382_vm8, %v1381_v22  ;;  %vm1590_vm8 = vcmask 244968  }
 0x4af   : > { %v1393_v35 = vpop.xlane.xlu2 %1392  ;;  %v1497_v43 = vpop.xlane.xlu0 %1496 }
 0x4b0   : > { %v1394_v39 = vmul.f32 %v1393_v35, %v3306_v6  ;;  %v1484_v41 = vpop.xlane.xlu1 %1483  ;;  %v1446_v6 = vmul.f32 %v1445_v24, %v3318_v36  ;;  %v1498_v36 = vmul.f32 %v1497_v43, %v3343_v1 }
 0x4b2   : > { %1396 = vst.msk [vmem:[%s3367_s4] sm:$0xff] %vm1395_vm13, %v1394_v39  ;;  %vm1603_vm13 = vcmask 253168  }
 0x4b3   : > { %1409 = vst.msk [vmem:[%s3367_s4] sm:$0xff] %vm1408_vm10, %v1407_v11  ;;  %vm1616_vm10 = vcmask 261368  }
 0x4b4   : > { %1422 = vst.msk [vmem:[%s3367_s4] sm:$0xff] %vm1421_vm15, %v1420_v52 }
 0x4b7   : > { %v1432_v31 = vpop.xlane.xlu2 %1431  ;;  %v1536_v42 = vpop.xlane.xlu0 %1535 }
 0x4b8   : > { %v1433_v29 = vmul.f32 %v1432_v31, %v3322_v38  ;;  %v1485_v38 = vmul.f32 %v1484_v41, %v3332_v50  ;;  %v1523_v48 = vpop.xlane.xlu1 %1522  ;;  %v1537_v50 = vmul.f32 %v1536_v42, %v3353_v59 }
 0x4ba   : > { %1435 = vst.msk [vmem:[%s3367_s4] sm:$0xff] %vm1434_vm12, %v1433_v29 }
 0x4bb   : > { %1448 = vst.msk [vmem:[%s3367_s4] sm:$0xff] %vm1447_vm14, %v1446_v6 }
 0x4bc   : > { %1461 = vst.msk [vmem:[%s3367_s4] sm:$0xff] %vm1460_vm5, %v1459_v55 }
 0x4bf   : > { %v1471_v37 = vpop.xlane.xlu2 %1470  ;;  %v1575_v49 = vpop.xlane.xlu0 %1574 }
 0x4c0   : > { %v1472_v47 = vmul.f32 %v1471_v37, %v3336_v53  ;;  %v1524_v53 = vmul.f32 %v1523_v48, %v3341_v46  ;;  %v1562_v1 = vpop.xlane.xlu1 %1561  ;;  %v1576_v9 = vmul.f32 %v1575_v49, %v3359_v60 }
 0x4c1   : > { %v1563_v46 = vmul.f32 %v1562_v1, %v3351_v17 }
 0x4c2   : > { %1474 = vst.msk [vmem:[%s3367_s4] sm:$0xff] %vm1473_vm1, %v1472_v47 }
 0x4c3   : > { %1487 = vst.msk [vmem:[%s3367_s4] sm:$0xff] %vm1486_vm6, %v1485_v38 }
 0x4c4   : > { %1500 = vst.msk [vmem:[%s3367_s4] sm:$0xff] %vm1499_vm4, %v1498_v36 }
 0x4c7   : > { %v1510_v54 = vpop.xlane.xlu2 %1509  ;;  %v1614_v17 = vpop.xlane.xlu0 %1613 }
 0x4c8   : > { %v1511_v62 = vmul.f32 %v1510_v54, %v3346_v25  ;;  %v1601_v59 = vpop.xlane.xlu1 %1600 }
 0x4ca   : > { %1513 = vst.msk [vmem:[%s3367_s4] sm:$0xff] %vm1512_vm9, %v1511_v62 }
 0x4cb   : > { %1526 = vst.msk [vmem:[%s3367_s4] sm:$0xff] %vm1525_vm3, %v1524_v53 }
 0x4cc   : > { %1539 = vst.msk [vmem:[%s3367_s4] sm:$0xff] %vm1538_vm0, %v1537_v50 }
 0x4cf   : > { %v1549_v3 = vpop.xlane.xlu2 %1548 }
 0x4d0   : > { %v1550_v25 = vmul.f32 %v1549_v3, %v3355_v19  ;;  %v1602_v19 = vmul.f32 %v1601_v59, %v3357_v18 }
 0x4d2   : > { %1552 = vst.msk [vmem:[%s3367_s4] sm:$0xff] %vm1551_vm2, %v1550_v25 }
 0x4d3   : > { %1565 = vst.msk [vmem:[%s3367_s4] sm:$0xff] %vm1564_vm7, %v1563_v46 }
 0x4d4   : > { %1578 = vst.msk [vmem:[%s3367_s4] sm:$0xff] %vm1577_vm11, %v1576_v9 }
 0x4d7   : > { %v1588_v28 = vpop.xlane.xlu2 %1587 }
 0x4d8   : > { %v1589_v20 = vmul.f32 %v1588_v28, %v3361_v15 }
 0x4da   : > { %1591 = vst.msk [vmem:[%s3367_s4] sm:$0xff] %vm1590_vm8, %v1589_v20 }
 0x4db   : > { %1604 = vst.msk [vmem:[%s3367_s4] sm:$0xff] %vm1603_vm13, %v1602_v19 }
 0x4df   : > { %v1609_v60 = vpop.xlane.xlu2 %1608 }
 0x4e0   : > { %v1615_v5 = vmul.f32 %v1614_v17, %v1609_v60 }
 0x4e2   : > { %1617 = vst.msk [vmem:[%s3367_s4] sm:$0xff] %vm1616_vm10, %v1615_v5 }
 0x4e3   : > { %1963 = shalt.err (!%p1960_p3)
}
 0x4e4   : > { %1729 = dma.vmem_to_hbm [thread:$0]  (%p2124_p5), %s1632_s9, 128, %s1634_s10, %s1619_s16  }
 0x4e5 PF: > { %p1735_p4 = scmp.ge.s32.totalorder %s1998_s15, 2  ;;  %s1645_s27 = sand.u32 1, %s1986_s12  }
 0x4e6   : > { %s1646_s28 = scalar_lea.sflag [#allocation3], %s1645_s27 }
 0x4e7   : > { %p1732_p7 = pnand %p1735_p4, %p2128_p6 }
 0x4e9   : > { %p1733_p8 = pneg %p1732_p7 }
 0x4eb   : > { %1981 = dma.done.wait (%p1733_p8), %s1646_s28, 128  }
 0x4ec   : > { %1983 = vsyncadd (%p1733_p8), %s1646_s28, 4294967168  ;;  %p13_p9 = scmp.ge.s32.totalorder %s2111_s18, 4   ;;  %s3597_s12 = smov %s1990_s13 }
 0x4ed   : > { %s3598_s13 = smov %s1994_s14  ;;  %s3599_s14 = smov %s2122_s21 }
 0x4ee   : > { %s3600_s15 = smov %s2111_s18  ;;  %15 = sbr.rel (!%p13_p9) target bundleno = 3 (0x3), region = 67 }
 0x4f3   :  { %1652 = vsyncpa [#allocation3], 1 }
 0x4f4   :  { %1654 = vsyncpa [#allocation3 + $0x1], 1 }

</bundles_post_ra>
